<compile_context>
chip_gen: v5e
topology: v5e:2x2
jax: 0.10.0
libtpu: 0.0.40
codegen_flags: <defaults>
</compile_context>

<pallas_src>
import functools
import math

import jax
import jax.numpy as jnp
from jax.experimental import pallas as pl
from jax.experimental.pallas import tpu as pltpu


def _detect_vmem_limit():
    """Generation-aware scoped-VMEM budget (~75% of physical VMEM)."""
    cap = 64 * 1024 * 1024  # conservative fallback (v7x per-TC VMEM)
    try:
        info = pltpu.get_tpu_info()
        detected = getattr(info, "vmem_capacity_bytes", None)
        if detected:
            cap = int(detected)
    except Exception:
        pass
    return int(cap * 3 // 4)


VMEM_LIMIT = _detect_vmem_limit()


def _pick_tile(dim, cap, mult):
    """Largest tile <= cap dividing `dim`, multiple of `mult`; else full dim."""
    if dim <= cap:
        return dim
    t = (cap // mult) * mult
    while t >= mult:
        if dim % t == 0:
            return t
        t -= mult
    return dim


# ---------------------------------------------------------------------------
# In-kernel helpers (pure functions of values read from refs)
# ---------------------------------------------------------------------------

def _layer_norm_f32(h, g, b, eps):
    """PyTorch-style LayerNorm (biased variance, eps inside rsqrt), f32."""
    mean = jnp.mean(h, axis=-1, keepdims=True)
    var = jnp.mean(jnp.square(h - mean), axis=-1, keepdims=True)
    return (h - mean) * jax.lax.rsqrt(var + eps) * g + b


def _split_heads(x, num_heads):
    """(S, D) f32 -> (H, S, dh): lane slices stacked along a new major axis."""
    s, d = x.shape
    dh = d // num_heads
    return jnp.stack(
        [x[:, h * dh:(h + 1) * dh] for h in range(num_heads)], axis=0)


def _mha(q, k, v, wo_h, bo, *, num_heads, mask):
    """Batched-over-heads attention with fused output projection.

    q: (Sq, D) f32 (softmax scale already folded into the Q projection),
    k, v: (Sk, D) f32, wo_h: (H, dh, D) bf16 head row-blocks of Wo,
    bo: (1, D) f32.  Returns (Sq, D) f32 = concat_h(softmax_h) @ Wo + bo.
    """
    qh = _split_heads(q, num_heads).astype(jnp.bfloat16)   # (H, Sq, dh)
    kh = _split_heads(k, num_heads).astype(jnp.bfloat16)   # (H, Sk, dh)
    vh = _split_heads(v, num_heads).astype(jnp.bfloat16)   # (H, Sk, dh)

    # One batched MXU matmul over all heads for QK^T.
    s = jnp.einsum("hqd,hkd->hqk", qh, kh,
                   preferred_element_type=jnp.float32)      # (H, Sq, Sk) f32
    if mask is not None:
        s = jnp.where(mask[None, :, :], s, jnp.float32(-1e30))  # mask in f32
    m = jnp.max(s, axis=-1, keepdims=True)
    p = jnp.exp(s - m)
    l = jnp.sum(p, axis=-1, keepdims=True)

    o = jnp.einsum("hqk,hkd->hqd", p.astype(jnp.bfloat16), vh,
                   preferred_element_type=jnp.float32)      # (H, Sq, dh) f32
    o = o * pl.reciprocal(l, approx=True)                   # EUP, not VALU

    # Fused out-projection: per-head row blocks of Wo, summed over heads
    # (no lane-axis concat of narrow head slabs).
    y = jnp.einsum("hqd,hdf->hqf", o.astype(jnp.bfloat16), wo_h,
                   preferred_element_type=jnp.float32)      # (H, Sq, D)
    return jnp.sum(y, axis=0) + bo.astype(jnp.float32)      # (Sq, D) f32


# ---------------------------------------------------------------------------
# Kernel 1: fully fused decoder layer (one grid step per batch element)
# ---------------------------------------------------------------------------

def _decoder_layer_kernel(
        x_ref, enc_ref,
        wqkv_ref, bqkv_ref, wo1_ref, bo1_ref, ln1g_ref, ln1b_ref,
        wq_ref, bq_ref, wkv_ref, bkv_ref, wo2_ref, bo2_ref, ln2g_ref, ln2b_ref,
        w1_ref, fb1_ref, w2_ref, fb2_ref, ln3g_ref, ln3b_ref,
        o_ref, *, num_heads, d_model, eps):
    D = d_model
    x = x_ref[0].astype(jnp.float32)          # (S, D)
    enc = enc_ref[0]                           # (Se, D)
    S = x.shape[0]

    # Causal mask built once per grid step (hoisted out of any head loop).
    row = jax.lax.broadcasted_iota(jnp.int32, (S, S), 0)
    col = jax.lax.broadcasted_iota(jnp.int32, (S, S), 1)
    causal = col <= row

    # ---- masked self-attention: fused QKV proj + MHA + out-proj + LN1 ----
    qkv = (jnp.dot(x.astype(jnp.bfloat16), wqkv_ref[...],
                   preferred_element_type=jnp.float32)
           + bqkv_ref[...].astype(jnp.float32))             # (S, 3D) f32
    q, k, v = qkv[:, :D], qkv[:, D:2 * D], qkv[:, 2 * D:]
    y1 = _mha(q, k, v, wo1_ref[...], bo1_ref[...],
              num_heads=num_heads, mask=causal)
    x1 = _layer_norm_f32(x + y1, ln1g_ref[...].astype(jnp.float32),
                         ln1b_ref[...].astype(jnp.float32), eps)

    # ---- cross-attention: fused Q / KV projections + MHA + out-proj + LN2 ----
    q2 = (jnp.dot(x1.astype(jnp.bfloat16), wq_ref[...],
                  preferred_element_type=jnp.float32)
          + bq_ref[...].astype(jnp.float32))                # (S, D)
    kv = (jnp.dot(enc.astype(jnp.bfloat16), wkv_ref[...],
                  preferred_element_type=jnp.float32)
          + bkv_ref[...].astype(jnp.float32))               # (Se, 2D)
    k2, v2 = kv[:, :D], kv[:, D:]
    y2 = _mha(q2, k2, v2, wo2_ref[...], bo2_ref[...],
              num_heads=num_heads, mask=None)
    x2 = _layer_norm_f32(x1 + y2, ln2g_ref[...].astype(jnp.float32),
                         ln2b_ref[...].astype(jnp.float32), eps)

    # ---- FFN: lin1 + relu + lin2 + residual + LN3 (no HBM round trip) ----
    h = (jnp.dot(x2.astype(jnp.bfloat16), w1_ref[...],
                 preferred_element_type=jnp.float32)
         + fb1_ref[...].astype(jnp.float32))
    h = jnp.maximum(h, 0.0)
    y3 = (jnp.dot(h.astype(jnp.bfloat16), w2_ref[...],
                  preferred_element_type=jnp.float32)
          + fb2_ref[...].astype(jnp.float32))
    x3 = _layer_norm_f32(x2 + y3, ln3g_ref[...].astype(jnp.float32),
                         ln3b_ref[...].astype(jnp.float32), eps)

    o_ref[0] = x3.astype(o_ref.dtype)


def decoder_layer(x, enc, p, num_heads, eps=1e-5):
    """One fused post-norm decoder block. x: (B,S,D), enc: (B,Se,D)."""
    B, S, D = x.shape
    Se = enc.shape[1]
    F = p["w1"].shape[1]
    dh = D // num_heads

    def full(shape):
        return pl.BlockSpec(shape, lambda i, _n=len(shape): (0,) * _n)

    kern = functools.partial(_decoder_layer_kernel, num_heads=num_heads,
                             d_model=D, eps=eps)
    return pl.pallas_call(
        kern,
        out_shape=jax.ShapeDtypeStruct((B, S, D), x.dtype),
        grid=(B,),
        in_specs=[
            pl.BlockSpec((1, S, D), lambda i: (i, 0, 0)),      # x
            pl.BlockSpec((1, Se, D), lambda i: (i, 0, 0)),     # encoder output
            full((D, 3 * D)), full((1, 3 * D)),                # Wqkv, bqkv
            full((num_heads, dh, D)), full((1, D)),            # Wo1 (head blocks), bo1
            full((1, D)), full((1, D)),                        # ln1 g, b
            full((D, D)), full((1, D)),                        # Wq, bq
            full((D, 2 * D)), full((1, 2 * D)),                # Wkv, bkv
            full((num_heads, dh, D)), full((1, D)),            # Wo2 (head blocks), bo2
            full((1, D)), full((1, D)),                        # ln2 g, b
            full((D, F)), full((1, F)),                        # W1, b1
            full((F, D)), full((1, D)),                        # W2, b2
            full((1, D)), full((1, D)),                        # ln3 g, b
        ],
        out_specs=pl.BlockSpec((1, S, D), lambda i: (i, 0, 0)),
        compiler_params=pltpu.CompilerParams(
            dimension_semantics=("parallel",), vmem_limit_bytes=VMEM_LIMIT),
    )(x, enc,
      p["self_wqkv"], p["self_bqkv"].reshape(1, -1),
      p["self_wo"].reshape(num_heads, dh, D), p["self_bo"].reshape(1, -1),
      p["ln1_g"].reshape(1, -1), p["ln1_b"].reshape(1, -1),
      p["cross_wq"], p["cross_bq"].reshape(1, -1),
      p["cross_wkv"], p["cross_bkv"].reshape(1, -1),
      p["cross_wo"].reshape(num_heads, dh, D), p["cross_bo"].reshape(1, -1),
      p["ln2_g"].reshape(1, -1), p["ln2_b"].reshape(1, -1),
      p["w1"], p["b1"].reshape(1, -1),
      p["w2"], p["b2"].reshape(1, -1),
      p["ln3_g"].reshape(1, -1), p["ln3_b"].reshape(1, -1))


# ---------------------------------------------------------------------------
# Kernel 2: standalone LayerNorm (final norm)
# ---------------------------------------------------------------------------

def _ln_kernel(x_ref, g_ref, b_ref, o_ref, *, eps):
    x = x_ref[...].astype(jnp.float32)
    o = _layer_norm_f32(x, g_ref[...].astype(jnp.float32),
                        b_ref[...].astype(jnp.float32), eps)
    o_ref[...] = o.astype(o_ref.dtype)


def layer_norm(x, g, b, eps=1e-5, tm_cap=512):
    shape = x.shape
    D = shape[-1]
    x2 = x.reshape(-1, D)
    M = x2.shape[0]
    tm = _pick_tile(M, tm_cap, 8)
    out = pl.pallas_call(
        functools.partial(_ln_kernel, eps=eps),
        out_shape=jax.ShapeDtypeStruct((M, D), x.dtype),
        grid=(M // tm,),
        in_specs=[
            pl.BlockSpec((tm, D), lambda i: (i, 0)),
            pl.BlockSpec((1, D), lambda i: (0, 0)),
            pl.BlockSpec((1, D), lambda i: (0, 0)),
        ],
        out_specs=pl.BlockSpec((tm, D), lambda i: (i, 0)),
        compiler_params=pltpu.CompilerParams(
            dimension_semantics=("parallel",), vmem_limit_bytes=VMEM_LIMIT),
    )(x2, g.reshape(1, D), b.reshape(1, D))
    return out.reshape(shape)


# ---------------------------------------------------------------------------
# Model glue (plain JAX: embedding lookup, PE table, param setup)
# ---------------------------------------------------------------------------

def sinusoidal_pos_encoding(max_seq_len, d_model):
    pos = jnp.arange(max_seq_len, dtype=jnp.float32)[:, None]
    i = jnp.arange(d_model, dtype=jnp.float32)[None, :]
    angle_rates = 1.0 / jnp.power(10000.0, (2.0 * jnp.floor(i / 2.0)) / d_model)
    angles = pos * angle_rates
    pe = jnp.where(jnp.mod(jnp.arange(d_model), 2) == 0,
                   jnp.sin(angles), jnp.cos(angles))
    return pe.astype(jnp.float32)  # (max_seq_len, d_model)


def init_params(key, vocab_size, d_model, num_heads, ff_dim, num_layers):
    """Matmul weights are stored bf16 (MXU-native); the 1/sqrt(dh) softmax
    scale is folded into the Q projection weight/bias columns at setup time
    so the kernel does no per-query scaling."""
    def dense(k, shape):
        return jax.random.normal(k, shape, dtype=jnp.float32) * 0.02

    dh = d_model // num_heads
    scale = 1.0 / math.sqrt(dh)

    keys = jax.random.split(key, 1 + num_layers)
    params = {
        "embedding": dense(keys[0], (vocab_size, d_model)),
        "norm_g": jnp.ones((d_model,), jnp.float32),
        "norm_b": jnp.zeros((d_model,), jnp.float32),
        "layers": [],
    }
    for l in range(num_layers):
        ks = jax.random.split(keys[1 + l], 7)
        # self-attention: fused Wq|Wk|Wv, scale folded into Q columns + bias
        wqkv = dense(ks[0], (d_model, 3 * d_model))
        wqkv = wqkv.at[:, :d_model].multiply(scale)
        bqkv = jnp.zeros((3 * d_model,), jnp.float32)
        bqkv = bqkv.at[:d_model].multiply(scale)
        # cross-attention: Wq (scale folded) and fused Wk|Wv
        wq = dense(ks[2], (d_model, d_model)) * scale
        bq = jnp.zeros((d_model,), jnp.float32) * scale
        params["layers"].append({
            "self_wqkv": wqkv.astype(jnp.bfloat16),
            "self_bqkv": bqkv,
            "self_wo": dense(ks[1], (d_model, d_model)).astype(jnp.bfloat16),
            "self_bo": jnp.zeros((d_model,), jnp.float32),
            "cross_wq": wq.astype(jnp.bfloat16),
            "cross_bq": bq,
            "cross_wkv": dense(ks[3], (d_model, 2 * d_model)).astype(jnp.bfloat16),
            "cross_bkv": jnp.zeros((2 * d_model,), jnp.float32),
            "cross_wo": dense(ks[4], (d_model, d_model)).astype(jnp.bfloat16),
            "cross_bo": jnp.zeros((d_model,), jnp.float32),
            # FFN
            "w1": dense(ks[5], (d_model, ff_dim)).astype(jnp.bfloat16),
            "b1": jnp.zeros((ff_dim,), jnp.float32),
            "w2": dense(ks[6], (ff_dim, d_model)).astype(jnp.bfloat16),
            "b2": jnp.zeros((d_model,), jnp.float32),
            # post-norms (f32)
            "ln1_g": jnp.ones((d_model,), jnp.float32),
            "ln1_b": jnp.zeros((d_model,), jnp.float32),
            "ln2_g": jnp.ones((d_model,), jnp.float32),
            "ln2_b": jnp.zeros((d_model,), jnp.float32),
            "ln3_g": jnp.ones((d_model,), jnp.float32),
            "ln3_b": jnp.zeros((d_model,), jnp.float32),
        })
    return params


@functools.partial(jax.jit, static_argnums=(3, 4))
def decoder_forward(params, tokens, encoder_output, num_heads, max_seq_len):
    B, S = tokens.shape
    d_model = params["embedding"].shape[1]
    # embedding lookup (glue; gather stays in XLA)
    x = jnp.take(params["embedding"], tokens, axis=0)          # (B, S, D)
    # positional encoding: x += pe[:S]
    pe = sinusoidal_pos_encoding(max_seq_len, d_model)[:S]     # (S, D)
    x = x + pe[None, :, :]
    for lp in params["layers"]:
        x = decoder_layer(x, encoder_output, lp, num_heads)
    return layer_norm(x, params["norm_g"], params["norm_b"])


# ---------------------------------------------------------------------------
# Main
# ---------------------------------------------------------------------------

if __name__ == "__main__":
    vocab_size = 32
    d_model = 32
    num_heads = 4
    ff_dim = 64
    num_layers = 2
    max_seq_len = 16

    B, S_dec, S_enc = 2, 8, 8
    assert d_model % num_heads == 0

    key = jax.random.PRNGKey(0)
    k_par, k_tok, k_enc = jax.random.split(key, 3)

    params = init_params(k_par, vocab_size, d_model, num_heads, ff_dim,
                         num_layers)
    tokens = jax.random.randint(k_tok, (B, S_dec), 0, vocab_size,
                                dtype=jnp.int32)
    encoder_output = jax.random.normal(k_enc, (B, S_enc, d_model),
                                       dtype=jnp.float32)

    out = decoder_forward(params, tokens, encoder_output, num_heads,
                          max_seq_len)
    out = jax.block_until_ready(out)
    assert out.shape == (B, S_dec, d_model)
    assert bool(jnp.all(jnp.isfinite(out)))
    print("KERNEL_OK")
</pallas_src>

<mosaic_0001>
module attributes {stable_mosaic.version = 11 : i64} {
  func.func @_ln_kernel(%arg0: i32, %arg1: memref<16x32xf32, #tpu.memory_space<vmem>>, %arg2: memref<1x32xf32, #tpu.memory_space<vmem>>, %arg3: memref<1x32xf32, #tpu.memory_space<vmem>>, %arg4: memref<16x32xf32, #tpu.memory_space<vmem>>) attributes {dimension_semantics = [#tpu.dimension_semantics<parallel>], iteration_bounds = array<i64: 1>, scalar_prefetch = 0 : i64, scratch_operands = 0 : i64, tpu.core_type = #tpu.core_type<tc>, window_params = [{transform_indices = @transform_0, window_bounds = array<i64: 16, 32>}, {pipeline_mode = #tpu.pipeline_mode<synchronous>, transform_indices = @transform_1, window_bounds = array<i64: 1, 32>}, {pipeline_mode = #tpu.pipeline_mode<synchronous>, transform_indices = @transform_2, window_bounds = array<i64: 1, 32>}, {transform_indices = @transform_3, window_bounds = array<i64: 16, 32>}]} {
    %c0 = arith.constant 0 : index
    %c0_0 = arith.constant 0 : index
    %0 = vector.load %arg1[%c0, %c0_0] : memref<16x32xf32, #tpu.memory_space<vmem>>, vector<16x32xf32>
    %c0_1 = arith.constant 0 : index
    %c0_2 = arith.constant 0 : index
    %1 = vector.load %arg2[%c0_1, %c0_2] : memref<1x32xf32, #tpu.memory_space<vmem>>, vector<1x32xf32>
    %c0_3 = arith.constant 0 : index
    %c0_4 = arith.constant 0 : index
    %2 = vector.load %arg3[%c0_3, %c0_4] : memref<1x32xf32, #tpu.memory_space<vmem>>, vector<1x32xf32>
    %cst = arith.constant dense<0.000000e+00> : vector<16xf32>
    %3 = vector.multi_reduction <add>, %0, %cst [1] : vector<16x32xf32> to vector<16xf32>
    %4 = vector.shape_cast %3 : vector<16xf32> to vector<16x1xf32>
    %cst_5 = arith.constant 3.200000e+01 : f32
    %5 = vector.broadcast %cst_5 : f32 to vector<16x1xf32>
    %6 = arith.divf %4, %5 : vector<16x1xf32>
    %7 = vector.broadcast %6 : vector<16x1xf32> to vector<16x32xf32>
    %8 = arith.subf %0, %7 : vector<16x32xf32>
    %9 = arith.mulf %8, %8 : vector<16x32xf32>
    %cst_6 = arith.constant dense<0.000000e+00> : vector<16xf32>
    %10 = vector.multi_reduction <add>, %9, %cst_6 [1] : vector<16x32xf32> to vector<16xf32>
    %11 = vector.shape_cast %10 : vector<16xf32> to vector<16x1xf32>
    %cst_7 = arith.constant 3.200000e+01 : f32
    %12 = vector.broadcast %cst_7 : f32 to vector<16x1xf32>
    %13 = arith.divf %11, %12 : vector<16x1xf32>
    %14 = vector.broadcast %6 : vector<16x1xf32> to vector<16x32xf32>
    %15 = arith.subf %0, %14 : vector<16x32xf32>
    %cst_8 = arith.constant 9.99999974E-6 : f32
    %16 = vector.broadcast %cst_8 : f32 to vector<16x1xf32>
    %17 = arith.addf %13, %16 : vector<16x1xf32>
    %18 = math.rsqrt %17 : vector<16x1xf32>
    %19 = vector.broadcast %18 : vector<16x1xf32> to vector<16x32xf32>
    %20 = arith.mulf %15, %19 : vector<16x32xf32>
    %21 = vector.broadcast %1 : vector<1x32xf32> to vector<16x32xf32>
    %22 = arith.mulf %20, %21 : vector<16x32xf32>
    %23 = vector.broadcast %2 : vector<1x32xf32> to vector<16x32xf32>
    %24 = arith.addf %22, %23 : vector<16x32xf32>
    %c0_9 = arith.constant 0 : index
    %c0_10 = arith.constant 0 : index
    %25 = vector.load %arg4[%c0_9, %c0_10] : memref<16x32xf32, #tpu.memory_space<vmem>>, vector<16x32xf32>
    tpu.vector_store %arg4[%c0_9, %c0_10], %24 {strides = array<i32>} : memref<16x32xf32, #tpu.memory_space<vmem>>, vector<16x32xf32>,
    return
  }
  func.func @transform_0(%arg0: i32) -> (i32, i32) {
    %c0_i32 = arith.constant 0 : i32
    %c0_i32_0 = arith.constant 0 : i32
    return %arg0, %c0_i32 : i32, i32
  }
  func.func @transform_1(%arg0: i32) -> (i32, i32) {
    %c0_i32 = arith.constant 0 : i32
    %c0_i32_0 = arith.constant 0 : i32
    %c0_i32_1 = arith.constant 0 : i32
    return %c0_i32, %c0_i32_0 : i32, i32
  }
  func.func @transform_2(%arg0: i32) -> (i32, i32) {
    %c0_i32 = arith.constant 0 : i32
    %c0_i32_0 = arith.constant 0 : i32
    %c0_i32_1 = arith.constant 0 : i32
    return %c0_i32, %c0_i32_0 : i32, i32
  }
  func.func @transform_3(%arg0: i32) -> (i32, i32) {
    %c0_i32 = arith.constant 0 : i32
    %c0_i32_0 = arith.constant 0 : i32
    return %arg0, %c0_i32 : i32, i32
  }
}

module attributes {stable_mosaic.version = 11 : i64} {
  func.func @_decoder_layer_kernel(%arg0: i32, %arg1: memref<1x8x32xf32, #tpu.memory_space<vmem>>, %arg2: memref<1x8x32xf32, #tpu.memory_space<vmem>>, %arg3: memref<32x96xbf16, #tpu.memory_space<vmem>>, %arg4: memref<1x96xf32, #tpu.memory_space<vmem>>, %arg5: memref<4x8x32xbf16, #tpu.memory_space<vmem>>, %arg6: memref<1x32xf32, #tpu.memory_space<vmem>>, %arg7: memref<1x32xf32, #tpu.memory_space<vmem>>, %arg8: memref<1x32xf32, #tpu.memory_space<vmem>>, %arg9: memref<32x32xbf16, #tpu.memory_space<vmem>>, %arg10: memref<1x32xf32, #tpu.memory_space<vmem>>, %arg11: memref<32x64xbf16, #tpu.memory_space<vmem>>, %arg12: memref<1x64xf32, #tpu.memory_space<vmem>>, %arg13: memref<4x8x32xbf16, #tpu.memory_space<vmem>>, %arg14: memref<1x32xf32, #tpu.memory_space<vmem>>, %arg15: memref<1x32xf32, #tpu.memory_space<vmem>>, %arg16: memref<1x32xf32, #tpu.memory_space<vmem>>, %arg17: memref<32x64xbf16, #tpu.memory_space<vmem>>, %arg18: memref<1x64xf32, #tpu.memory_space<vmem>>, %arg19: memref<64x32xbf16, #tpu.memory_space<vmem>>, %arg20: memref<1x32xf32, #tpu.memory_space<vmem>>, %arg21: memref<1x32xf32, #tpu.memory_space<vmem>>, %arg22: memref<1x32xf32, #tpu.memory_space<vmem>>, %arg23: memref<1x8x32xf32, #tpu.memory_space<vmem>>) attributes {dimension_semantics = [#tpu.dimension_semantics<parallel>], iteration_bounds = array<i64: 2>, scalar_prefetch = 0 : i64, scratch_operands = 0 : i64, tpu.core_type = #tpu.core_type<tc>, window_params = [{transform_indices = @transform_0, window_bounds = array<i64: 1, 8, 32>}, {transform_indices = @transform_1, window_bounds = array<i64: 1, 8, 32>}, {pipeline_mode = #tpu.pipeline_mode<synchronous>, transform_indices = @transform_2, window_bounds = array<i64: 32, 96>}, {pipeline_mode = #tpu.pipeline_mode<synchronous>, transform_indices = @transform_3, window_bounds = array<i64: 1, 96>}, {pipeline_mode = #tpu.pipeline_mode<synchronous>, transform_indices = @transform_4, window_bounds = array<i64: 4, 8, 32>}, {pipeline_mode = #tpu.pipeline_mode<synchronous>, transform_indices = @transform_5, window_bounds = array<i64: 1, 32>}, {pipeline_mode = #tpu.pipeline_mode<synchronous>, transform_indices = @transform_6, window_bounds = array<i64: 1, 32>}, {pipeline_mode = #tpu.pipeline_mode<synchronous>, transform_indices = @transform_7, window_bounds = array<i64: 1, 32>}, {pipeline_mode = #tpu.pipeline_mode<synchronous>, transform_indices = @transform_8, window_bounds = array<i64: 32, 32>}, {pipeline_mode = #tpu.pipeline_mode<synchronous>, transform_indices = @transform_9, window_bounds = array<i64: 1, 32>}, {pipeline_mode = #tpu.pipeline_mode<synchronous>, transform_indices = @transform_10, window_bounds = array<i64: 32, 64>}, {pipeline_mode = #tpu.pipeline_mode<synchronous>, transform_indices = @transform_11, window_bounds = array<i64: 1, 64>}, {pipeline_mode = #tpu.pipeline_mode<synchronous>, transform_indices = @transform_12, window_bounds = array<i64: 4, 8, 32>}, {pipeline_mode = #tpu.pipeline_mode<synchronous>, transform_indices = @transform_13, window_bounds = array<i64: 1, 32>}, {pipeline_mode = #tpu.pipeline_mode<synchronous>, transform_indices = @transform_14, window_bounds = array<i64: 1, 32>}, {pipeline_mode = #tpu.pipeline_mode<synchronous>, transform_indices = @transform_15, window_bounds = array<i64: 1, 32>}, {pipeline_mode = #tpu.pipeline_mode<synchronous>, transform_indices = @transform_16, window_bounds = array<i64: 32, 64>}, {pipeline_mode = #tpu.pipeline_mode<synchronous>, transform_indices = @transform_17, window_bounds = array<i64: 1, 64>}, {pipeline_mode = #tpu.pipeline_mode<synchronous>, transform_indices = @transform_18, window_bounds = array<i64: 64, 32>}, {pipeline_mode = #tpu.pipeline_mode<synchronous>, transform_indices = @transform_19, window_bounds = array<i64: 1, 32>}, {pipeline_mode = #tpu.pipeline_mode<synchronous>, transform_indices = @transform_20, window_bounds = array<i64: 1, 32>}, {pipeline_mode = #tpu.pipeline_mode<synchronous>, transform_indices = @transform_21, window_bounds = array<i64: 1, 32>}, {transform_indices = @transform_22, window_bounds = array<i64: 1, 8, 32>}]} {
    %c0 = arith.constant 0 : index
    %c0_0 = arith.constant 0 : index
    %c0_1 = arith.constant 0 : index
    %0 = vector.load %arg1[%c0, %c0_0, %c0_1] : memref<1x8x32xf32, #tpu.memory_space<vmem>>, vector<1x8x32xf32>
    %1 = vector.shape_cast %0 : vector<1x8x32xf32> to vector<8x32xf32>
    %c0_2 = arith.constant 0 : index
    %c0_3 = arith.constant 0 : index
    %c0_4 = arith.constant 0 : index
    %2 = vector.load %arg2[%c0_2, %c0_3, %c0_4] : memref<1x8x32xf32, #tpu.memory_space<vmem>>, vector<1x8x32xf32>
    %3 = vector.shape_cast %2 : vector<1x8x32xf32> to vector<8x32xf32>
    %4 = tpu.iota {dimensions = array<i32: 0>} : vector<8x8xi32>
    %5 = tpu.iota {dimensions = array<i32: 1>} : vector<8x8xi32>
    %6 = arith.cmpi sle, %5, %4 : vector<8x8xi32>
    %7 = arith.truncf %1 : vector<8x32xf32> to vector<8x32xbf16>
    %c0_5 = arith.constant 0 : index
    %c0_6 = arith.constant 0 : index
    %8 = vector.load %arg3[%c0_5, %c0_6] : memref<32x96xbf16, #tpu.memory_space<vmem>>, vector<32x96xbf16>
    %cst = arith.constant dense<0.000000e+00> : vector<8x96xf32>
    %9 = tpu.matmul %7, %8, %cst {dimension_numbers = #tpu.dot_dimension_numbers<[1], [0], [0], [1], [0, 0, 1, 1], [], []>} : vector<8x32xbf16>, vector<32x96xbf16>, vector<8x96xf32> -> vector<8x96xf32>
    %c0_7 = arith.constant 0 : index
    %c0_8 = arith.constant 0 : index
    %10 = vector.load %arg4[%c0_7, %c0_8] : memref<1x96xf32, #tpu.memory_space<vmem>>, vector<1x96xf32>
    %11 = vector.broadcast %10 : vector<1x96xf32> to vector<8x96xf32>
    %12 = arith.addf %9, %11 : vector<8x96xf32>
    %13 = vector.extract_strided_slice %12 {offsets = [0, 0], sizes = [8, 32], strides = [1, 1]} : vector<8x96xf32> to vector<8x32xf32>
    %14 = vector.extract_strided_slice %12 {offsets = [0, 32], sizes = [8, 32], strides = [1, 1]} : vector<8x96xf32> to vector<8x32xf32>
    %15 = vector.extract_strided_slice %12 {offsets = [0, 64], sizes = [8, 32], strides = [1, 1]} : vector<8x96xf32> to vector<8x32xf32>
    %c0_9 = arith.constant 0 : index
    %c0_10 = arith.constant 0 : index
    %c0_11 = arith.constant 0 : index
    %16 = vector.load %arg5[%c0_9, %c0_10, %c0_11] : memref<4x8x32xbf16, #tpu.memory_space<vmem>>, vector<4x8x32xbf16>
    %c0_12 = arith.constant 0 : index
    %c0_13 = arith.constant 0 : index
    %17 = vector.load %arg6[%c0_12, %c0_13] : memref<1x32xf32, #tpu.memory_space<vmem>>, vector<1x32xf32>
    %18 = vector.extract_strided_slice %13 {offsets = [0, 0], sizes = [8, 8], strides = [1, 1]} : vector<8x32xf32> to vector<8x8xf32>
    %19 = vector.extract_strided_slice %13 {offsets = [0, 8], sizes = [8, 8], strides = [1, 1]} : vector<8x32xf32> to vector<8x8xf32>
    %20 = vector.extract_strided_slice %13 {offsets = [0, 16], sizes = [8, 8], strides = [1, 1]} : vector<8x32xf32> to vector<8x8xf32>
    %21 = vector.extract_strided_slice %13 {offsets = [0, 24], sizes = [8, 8], strides = [1, 1]} : vector<8x32xf32> to vector<8x8xf32>
    %22 = vector.shape_cast %18 : vector<8x8xf32> to vector<1x8x8xf32>
    %23 = vector.shape_cast %19 : vector<8x8xf32> to vector<1x8x8xf32>
    %24 = vector.shape_cast %20 : vector<8x8xf32> to vector<1x8x8xf32>
    %25 = vector.shape_cast %21 : vector<8x8xf32> to vector<1x8x8xf32>
    %26 = tpu.concatenate %22, %23, %24, %25 in 0 : vector<1x8x8xf32>, vector<1x8x8xf32>, vector<1x8x8xf32>, vector<1x8x8xf32> -> vector<4x8x8xf32>
    %27 = arith.truncf %26 : vector<4x8x8xf32> to vector<4x8x8xbf16>
    %28 = vector.extract_strided_slice %14 {offsets = [0, 0], sizes = [8, 8], strides = [1, 1]} : vector<8x32xf32> to vector<8x8xf32>
    %29 = vector.extract_strided_slice %14 {offsets = [0, 8], sizes = [8, 8], strides = [1, 1]} : vector<8x32xf32> to vector<8x8xf32>
    %30 = vector.extract_strided_slice %14 {offsets = [0, 16], sizes = [8, 8], strides = [1, 1]} : vector<8x32xf32> to vector<8x8xf32>
    %31 = vector.extract_strided_slice %14 {offsets = [0, 24], sizes = [8, 8], strides = [1, 1]} : vector<8x32xf32> to vector<8x8xf32>
    %32 = vector.shape_cast %28 : vector<8x8xf32> to vector<1x8x8xf32>
    %33 = vector.shape_cast %29 : vector<8x8xf32> to vector<1x8x8xf32>
    %34 = vector.shape_cast %30 : vector<8x8xf32> to vector<1x8x8xf32>
    %35 = vector.shape_cast %31 : vector<8x8xf32> to vector<1x8x8xf32>
    %36 = tpu.concatenate %32, %33, %34, %35 in 0 : vector<1x8x8xf32>, vector<1x8x8xf32>, vector<1x8x8xf32>, vector<1x8x8xf32> -> vector<4x8x8xf32>
    %37 = arith.truncf %36 : vector<4x8x8xf32> to vector<4x8x8xbf16>
    %38 = vector.extract_strided_slice %15 {offsets = [0, 0], sizes = [8, 8], strides = [1, 1]} : vector<8x32xf32> to vector<8x8xf32>
    %39 = vector.extract_strided_slice %15 {offsets = [0, 8], sizes = [8, 8], strides = [1, 1]} : vector<8x32xf32> to vector<8x8xf32>
    %40 = vector.extract_strided_slice %15 {offsets = [0, 16], sizes = [8, 8], strides = [1, 1]} : vector<8x32xf32> to vector<8x8xf32>
    %41 = vector.extract_strided_slice %15 {offsets = [0, 24], sizes = [8, 8], strides = [1, 1]} : vector<8x32xf32> to vector<8x8xf32>
    %42 = vector.shape_cast %38 : vector<8x8xf32> to vector<1x8x8xf32>
    %43 = vector.shape_cast %39 : vector<8x8xf32> to vector<1x8x8xf32>
    %44 = vector.shape_cast %40 : vector<8x8xf32> to vector<1x8x8xf32>
    %45 = vector.shape_cast %41 : vector<8x8xf32> to vector<1x8x8xf32>
    %46 = tpu.concatenate %42, %43, %44, %45 in 0 : vector<1x8x8xf32>, vector<1x8x8xf32>, vector<1x8x8xf32>, vector<1x8x8xf32> -> vector<4x8x8xf32>
    %47 = arith.truncf %46 : vector<4x8x8xf32> to vector<4x8x8xbf16>
    "tpu.trace_start"() <{level = 10 : i32, message = "hqd,hkd->hqk"}> : () -> ()
    %cst_14 = arith.constant dense<0.000000e+00> : vector<4x8x8xf32>
    %48 = tpu.matmul %27, %37, %cst_14 {dimension_numbers = #tpu.dot_dimension_numbers<[2], [2], [1], [1], [0, 0, 0, 1, 1, 1], [0], [0]>} : vector<4x8x8xbf16>, vector<4x8x8xbf16>, vector<4x8x8xf32> -> vector<4x8x8xf32>
    "tpu.trace_stop"() : () -> ()
    %49 = vector.shape_cast %6 : vector<8x8xi1> to vector<1x8x8xi1>
    %cst_15 = arith.constant -1.000000e+30 : f32
    %50 = vector.shape_cast %49 : vector<1x8x8xi1> to vector<1x8x8xi1>
    %51 = vector.broadcast %50 : vector<1x8x8xi1> to vector<4x8x8xi1>
    %52 = vector.broadcast %cst_15 : f32 to vector<4x8x8xf32>
    %53 = arith.select %51, %48, %52 : vector<4x8x8xi1>, vector<4x8x8xf32>
    %cst_16 = arith.constant dense<0xFF800000> : vector<4x8xf32>
    %54 = vector.multi_reduction <maximumf>, %53, %cst_16 [2] : vector<4x8x8xf32> to vector<4x8xf32>
    %55 = vector.shape_cast %54 : vector<4x8xf32> to vector<4x8x1xf32>
    %56 = vector.broadcast %55 : vector<4x8x1xf32> to vector<4x8x8xf32>
    %57 = arith.subf %53, %56 : vector<4x8x8xf32>
    %58 = math.exp %57 : vector<4x8x8xf32>
    %cst_17 = arith.constant dense<0.000000e+00> : vector<4x8xf32>
    %59 = vector.multi_reduction <add>, %58, %cst_17 [2] : vector<4x8x8xf32> to vector<4x8xf32>
    %60 = vector.shape_cast %59 : vector<4x8xf32> to vector<4x8x1xf32>
    %61 = arith.truncf %58 : vector<4x8x8xf32> to vector<4x8x8xbf16>
    "tpu.trace_start"() <{level = 10 : i32, message = "hqk,hkd->hqd"}> : () -> ()
    %cst_18 = arith.constant dense<0.000000e+00> : vector<4x8x8xf32>
    %62 = tpu.matmul %61, %47, %cst_18 {dimension_numbers = #tpu.dot_dimension_numbers<[2], [1], [1], [2], [0, 0, 0, 1, 1, 2], [0], [0]>} : vector<4x8x8xbf16>, vector<4x8x8xbf16>, vector<4x8x8xf32> -> vector<4x8x8xf32>
    "tpu.trace_stop"() : () -> ()
    %63 = tpu.reciprocal %60 {approx = true} : vector<4x8x1xf32> -> vector<4x8x1xf32>
    %64 = vector.broadcast %63 : vector<4x8x1xf32> to vector<4x8x8xf32>
    %65 = arith.mulf %62, %64 : vector<4x8x8xf32>
    %66 = arith.truncf %65 : vector<4x8x8xf32> to vector<4x8x8xbf16>
    "tpu.trace_start"() <{level = 10 : i32, message = "hqd,hdf->hqf"}> : () -> ()
    %cst_19 = arith.constant dense<0.000000e+00> : vector<4x8x32xf32>
    %67 = tpu.matmul %66, %16, %cst_19 {dimension_numbers = #tpu.dot_dimension_numbers<[2], [1], [1], [2], [0, 0, 0, 1, 1, 2], [0], [0]>} : vector<4x8x8xbf16>, vector<4x8x32xbf16>, vector<4x8x32xf32> -> vector<4x8x32xf32>
    "tpu.trace_stop"() : () -> ()
    %cst_20 = arith.constant dense<0.000000e+00> : vector<8x32xf32>
    %68 = vector.multi_reduction <add>, %67, %cst_20 [0] : vector<4x8x32xf32> to vector<8x32xf32>
    %69 = vector.broadcast %17 : vector<1x32xf32> to vector<8x32xf32>
    %70 = arith.addf %68, %69 : vector<8x32xf32>
    %71 = arith.addf %1, %70 : vector<8x32xf32>
    %c0_21 = arith.constant 0 : index
    %c0_22 = arith.constant 0 : index
    %72 = vector.load %arg7[%c0_21, %c0_22] : memref<1x32xf32, #tpu.memory_space<vmem>>, vector<1x32xf32>
    %c0_23 = arith.constant 0 : index
    %c0_24 = arith.constant 0 : index
    %73 = vector.load %arg8[%c0_23, %c0_24] : memref<1x32xf32, #tpu.memory_space<vmem>>, vector<1x32xf32>
    %cst_25 = arith.constant dense<0.000000e+00> : vector<8xf32>
    %74 = vector.multi_reduction <add>, %71, %cst_25 [1] : vector<8x32xf32> to vector<8xf32>
    %75 = vector.shape_cast %74 : vector<8xf32> to vector<8x1xf32>
    %cst_26 = arith.constant 3.200000e+01 : f32
    %76 = vector.broadcast %cst_26 : f32 to vector<8x1xf32>
    %77 = arith.divf %75, %76 : vector<8x1xf32>
    %78 = vector.broadcast %77 : vector<8x1xf32> to vector<8x32xf32>
    %79 = arith.subf %71, %78 : vector<8x32xf32>
    %80 = arith.mulf %79, %79 : vector<8x32xf32>
    %cst_27 = arith.constant dense<0.000000e+00> : vector<8xf32>
    %81 = vector.multi_reduction <add>, %80, %cst_27 [1] : vector<8x32xf32> to vector<8xf32>
    %82 = vector.shape_cast %81 : vector<8xf32> to vector<8x1xf32>
    %cst_28 = arith.constant 3.200000e+01 : f32
    %83 = vector.broadcast %cst_28 : f32 to vector<8x1xf32>
    %84 = arith.divf %82, %83 : vector<8x1xf32>
    %85 = vector.broadcast %77 : vector<8x1xf32> to vector<8x32xf32>
    %86 = arith.subf %71, %85 : vector<8x32xf32>
    %cst_29 = arith.constant 9.99999974E-6 : f32
    %87 = vector.broadcast %cst_29 : f32 to vector<8x1xf32>
    %88 = arith.addf %84, %87 : vector<8x1xf32>
    %89 = math.rsqrt %88 : vector<8x1xf32>
    %90 = vector.broadcast %89 : vector<8x1xf32> to vector<8x32xf32>
    %91 = arith.mulf %86, %90 : vector<8x32xf32>
    %92 = vector.broadcast %72 : vector<1x32xf32> to vector<8x32xf32>
    %93 = arith.mulf %91, %92 : vector<8x32xf32>
    %94 = vector.broadcast %73 : vector<1x32xf32> to vector<8x32xf32>
    %95 = arith.addf %93, %94 : vector<8x32xf32>
    %96 = arith.truncf %95 : vector<8x32xf32> to vector<8x32xbf16>
    %c0_30 = arith.constant 0 : index
    %c0_31 = arith.constant 0 : index
    %97 = vector.load %arg9[%c0_30, %c0_31] : memref<32x32xbf16, #tpu.memory_space<vmem>>, vector<32x32xbf16>
    %cst_32 = arith.constant dense<0.000000e+00> : vector<8x32xf32>
    %98 = tpu.matmul %96, %97, %cst_32 {dimension_numbers = #tpu.dot_dimension_numbers<[1], [0], [0], [1], [0, 0, 1, 1], [], []>} : vector<8x32xbf16>, vector<32x32xbf16>, vector<8x32xf32> -> vector<8x32xf32>
    %c0_33 = arith.constant 0 : index
    %c0_34 = arith.constant 0 : index
    %99 = vector.load %arg10[%c0_33, %c0_34] : memref<1x32xf32, #tpu.memory_space<vmem>>, vector<1x32xf32>
    %100 = vector.broadcast %99 : vector<1x32xf32> to vector<8x32xf32>
    %101 = arith.addf %98, %100 : vector<8x32xf32>
    %102 = arith.truncf %3 : vector<8x32xf32> to vector<8x32xbf16>
    %c0_35 = arith.constant 0 : index
    %c0_36 = arith.constant 0 : index
    %103 = vector.load %arg11[%c0_35, %c0_36] : memref<32x64xbf16, #tpu.memory_space<vmem>>, vector<32x64xbf16>
    %cst_37 = arith.constant dense<0.000000e+00> : vector<8x64xf32>
    %104 = tpu.matmul %102, %103, %cst_37 {dimension_numbers = #tpu.dot_dimension_numbers<[1], [0], [0], [1], [0, 0, 1, 1], [], []>} : vector<8x32xbf16>, vector<32x64xbf16>, vector<8x64xf32> -> vector<8x64xf32>
    %c0_38 = arith.constant 0 : index
    %c0_39 = arith.constant 0 : index
    %105 = vector.load %arg12[%c0_38, %c0_39] : memref<1x64xf32, #tpu.memory_space<vmem>>, vector<1x64xf32>
    %106 = vector.broadcast %105 : vector<1x64xf32> to vector<8x64xf32>
    %107 = arith.addf %104, %106 : vector<8x64xf32>
    %108 = vector.extract_strided_slice %107 {offsets = [0, 0], sizes = [8, 32], strides = [1, 1]} : vector<8x64xf32> to vector<8x32xf32>
    %109 = vector.extract_strided_slice %107 {offsets = [0, 32], sizes = [8, 32], strides = [1, 1]} : vector<8x64xf32> to vector<8x32xf32>
    %c0_40 = arith.constant 0 : index
    %c0_41 = arith.constant 0 : index
    %c0_42 = arith.constant 0 : index
    %110 = vector.load %arg13[%c0_40, %c0_41, %c0_42] : memref<4x8x32xbf16, #tpu.memory_space<vmem>>, vector<4x8x32xbf16>
    %c0_43 = arith.constant 0 : index
    %c0_44 = arith.constant 0 : index
    %111 = vector.load %arg14[%c0_43, %c0_44] : memref<1x32xf32, #tpu.memory_space<vmem>>, vector<1x32xf32>
    %112 = vector.extract_strided_slice %101 {offsets = [0, 0], sizes = [8, 8], strides = [1, 1]} : vector<8x32xf32> to vector<8x8xf32>
    %113 = vector.extract_strided_slice %101 {offsets = [0, 8], sizes = [8, 8], strides = [1, 1]} : vector<8x32xf32> to vector<8x8xf32>
    %114 = vector.extract_strided_slice %101 {offsets = [0, 16], sizes = [8, 8], strides = [1, 1]} : vector<8x32xf32> to vector<8x8xf32>
    %115 = vector.extract_strided_slice %101 {offsets = [0, 24], sizes = [8, 8], strides = [1, 1]} : vector<8x32xf32> to vector<8x8xf32>
    %116 = vector.shape_cast %112 : vector<8x8xf32> to vector<1x8x8xf32>
    %117 = vector.shape_cast %113 : vector<8x8xf32> to vector<1x8x8xf32>
    %118 = vector.shape_cast %114 : vector<8x8xf32> to vector<1x8x8xf32>
    %119 = vector.shape_cast %115 : vector<8x8xf32> to vector<1x8x8xf32>
    %120 = tpu.concatenate %116, %117, %118, %119 in 0 : vector<1x8x8xf32>, vector<1x8x8xf32>, vector<1x8x8xf32>, vector<1x8x8xf32> -> vector<4x8x8xf32>
    %121 = arith.truncf %120 : vector<4x8x8xf32> to vector<4x8x8xbf16>
    %122 = vector.extract_strided_slice %108 {offsets = [0, 0], sizes = [8, 8], strides = [1, 1]} : vector<8x32xf32> to vector<8x8xf32>
    %123 = vector.extract_strided_slice %108 {offsets = [0, 8], sizes = [8, 8], strides = [1, 1]} : vector<8x32xf32> to vector<8x8xf32>
    %124 = vector.extract_strided_slice %108 {offsets = [0, 16], sizes = [8, 8], strides = [1, 1]} : vector<8x32xf32> to vector<8x8xf32>
    %125 = vector.extract_strided_slice %108 {offsets = [0, 24], sizes = [8, 8], strides = [1, 1]} : vector<8x32xf32> to vector<8x8xf32>
    %126 = vector.shape_cast %122 : vector<8x8xf32> to vector<1x8x8xf32>
    %127 = vector.shape_cast %123 : vector<8x8xf32> to vector<1x8x8xf32>
    %128 = vector.shape_cast %124 : vector<8x8xf32> to vector<1x8x8xf32>
    %129 = vector.shape_cast %125 : vector<8x8xf32> to vector<1x8x8xf32>
    %130 = tpu.concatenate %126, %127, %128, %129 in 0 : vector<1x8x8xf32>, vector<1x8x8xf32>, vector<1x8x8xf32>, vector<1x8x8xf32> -> vector<4x8x8xf32>
    %131 = arith.truncf %130 : vector<4x8x8xf32> to vector<4x8x8xbf16>
    %132 = vector.extract_strided_slice %109 {offsets = [0, 0], sizes = [8, 8], strides = [1, 1]} : vector<8x32xf32> to vector<8x8xf32>
    %133 = vector.extract_strided_slice %109 {offsets = [0, 8], sizes = [8, 8], strides = [1, 1]} : vector<8x32xf32> to vector<8x8xf32>
    %134 = vector.extract_strided_slice %109 {offsets = [0, 16], sizes = [8, 8], strides = [1, 1]} : vector<8x32xf32> to vector<8x8xf32>
    %135 = vector.extract_strided_slice %109 {offsets = [0, 24], sizes = [8, 8], strides = [1, 1]} : vector<8x32xf32> to vector<8x8xf32>
    %136 = vector.shape_cast %132 : vector<8x8xf32> to vector<1x8x8xf32>
    %137 = vector.shape_cast %133 : vector<8x8xf32> to vector<1x8x8xf32>
    %138 = vector.shape_cast %134 : vector<8x8xf32> to vector<1x8x8xf32>
    %139 = vector.shape_cast %135 : vector<8x8xf32> to vector<1x8x8xf32>
    %140 = tpu.concatenate %136, %137, %138, %139 in 0 : vector<1x8x8xf32>, vector<1x8x8xf32>, vector<1x8x8xf32>, vector<1x8x8xf32> -> vector<4x8x8xf32>
    %141 = arith.truncf %140 : vector<4x8x8xf32> to vector<4x8x8xbf16>
    "tpu.trace_start"() <{level = 10 : i32, message = "hqd,hkd->hqk"}> : () -> ()
    %cst_45 = arith.constant dense<0.000000e+00> : vector<4x8x8xf32>
    %142 = tpu.matmul %121, %131, %cst_45 {dimension_numbers = #tpu.dot_dimension_numbers<[2], [2], [1], [1], [0, 0, 0, 1, 1, 1], [0], [0]>} : vector<4x8x8xbf16>, vector<4x8x8xbf16>, vector<4x8x8xf32> -> vector<4x8x8xf32>
    "tpu.trace_stop"() : () -> ()
    %cst_46 = arith.constant dense<0xFF800000> : vector<4x8xf32>
    %143 = vector.multi_reduction <maximumf>, %142, %cst_46 [2] : vector<4x8x8xf32> to vector<4x8xf32>
    %144 = vector.shape_cast %143 : vector<4x8xf32> to vector<4x8x1xf32>
    %145 = vector.broadcast %144 : vector<4x8x1xf32> to vector<4x8x8xf32>
    %146 = arith.subf %142, %145 : vector<4x8x8xf32>
    %147 = math.exp %146 : vector<4x8x8xf32>
    %cst_47 = arith.constant dense<0.000000e+00> : vector<4x8xf32>
    %148 = vector.multi_reduction <add>, %147, %cst_47 [2] : vector<4x8x8xf32> to vector<4x8xf32>
    %149 = vector.shape_cast %148 : vector<4x8xf32> to vector<4x8x1xf32>
    %150 = arith.truncf %147 : vector<4x8x8xf32> to vector<4x8x8xbf16>
    "tpu.trace_start"() <{level = 10 : i32, message = "hqk,hkd->hqd"}> : () -> ()
    %cst_48 = arith.constant dense<0.000000e+00> : vector<4x8x8xf32>
    %151 = tpu.matmul %150, %141, %cst_48 {dimension_numbers = #tpu.dot_dimension_numbers<[2], [1], [1], [2], [0, 0, 0, 1, 1, 2], [0], [0]>} : vector<4x8x8xbf16>, vector<4x8x8xbf16>, vector<4x8x8xf32> -> vector<4x8x8xf32>
    "tpu.trace_stop"() : () -> ()
    %152 = tpu.reciprocal %149 {approx = true} : vector<4x8x1xf32> -> vector<4x8x1xf32>
    %153 = vector.broadcast %152 : vector<4x8x1xf32> to vector<4x8x8xf32>
    %154 = arith.mulf %151, %153 : vector<4x8x8xf32>
    %155 = arith.truncf %154 : vector<4x8x8xf32> to vector<4x8x8xbf16>
    "tpu.trace_start"() <{level = 10 : i32, message = "hqd,hdf->hqf"}> : () -> ()
    %cst_49 = arith.constant dense<0.000000e+00> : vector<4x8x32xf32>
    %156 = tpu.matmul %155, %110, %cst_49 {dimension_numbers = #tpu.dot_dimension_numbers<[2], [1], [1], [2], [0, 0, 0, 1, 1, 2], [0], [0]>} : vector<4x8x8xbf16>, vector<4x8x32xbf16>, vector<4x8x32xf32> -> vector<4x8x32xf32>
    "tpu.trace_stop"() : () -> ()
    %cst_50 = arith.constant dense<0.000000e+00> : vector<8x32xf32>
    %157 = vector.multi_reduction <add>, %156, %cst_50 [0] : vector<4x8x32xf32> to vector<8x32xf32>
    %158 = vector.broadcast %111 : vector<1x32xf32> to vector<8x32xf32>
    %159 = arith.addf %157, %158 : vector<8x32xf32>
    %160 = arith.addf %95, %159 : vector<8x32xf32>
    %c0_51 = arith.constant 0 : index
    %c0_52 = arith.constant 0 : index
    %161 = vector.load %arg15[%c0_51, %c0_52] : memref<1x32xf32, #tpu.memory_space<vmem>>, vector<1x32xf32>
    %c0_53 = arith.constant 0 : index
    %c0_54 = arith.constant 0 : index
    %162 = vector.load %arg16[%c0_53, %c0_54] : memref<1x32xf32, #tpu.memory_space<vmem>>, vector<1x32xf32>
    %cst_55 = arith.constant dense<0.000000e+00> : vector<8xf32>
    %163 = vector.multi_reduction <add>, %160, %cst_55 [1] : vector<8x32xf32> to vector<8xf32>
    %164 = vector.shape_cast %163 : vector<8xf32> to vector<8x1xf32>
    %cst_56 = arith.constant 3.200000e+01 : f32
    %165 = vector.broadcast %cst_56 : f32 to vector<8x1xf32>
    %166 = arith.divf %164, %165 : vector<8x1xf32>
    %167 = vector.broadcast %166 : vector<8x1xf32> to vector<8x32xf32>
    %168 = arith.subf %160, %167 : vector<8x32xf32>
    %169 = arith.mulf %168, %168 : vector<8x32xf32>
    %cst_57 = arith.constant dense<0.000000e+00> : vector<8xf32>
    %170 = vector.multi_reduction <add>, %169, %cst_57 [1] : vector<8x32xf32> to vector<8xf32>
    %171 = vector.shape_cast %170 : vector<8xf32> to vector<8x1xf32>
    %cst_58 = arith.constant 3.200000e+01 : f32
    %172 = vector.broadcast %cst_58 : f32 to vector<8x1xf32>
    %173 = arith.divf %171, %172 : vector<8x1xf32>
    %174 = vector.broadcast %166 : vector<8x1xf32> to vector<8x32xf32>
    %175 = arith.subf %160, %174 : vector<8x32xf32>
    %cst_59 = arith.constant 9.99999974E-6 : f32
    %176 = vector.broadcast %cst_59 : f32 to vector<8x1xf32>
    %177 = arith.addf %173, %176 : vector<8x1xf32>
    %178 = math.rsqrt %177 : vector<8x1xf32>
    %179 = vector.broadcast %178 : vector<8x1xf32> to vector<8x32xf32>
    %180 = arith.mulf %175, %179 : vector<8x32xf32>
    %181 = vector.broadcast %161 : vector<1x32xf32> to vector<8x32xf32>
    %182 = arith.mulf %180, %181 : vector<8x32xf32>
    %183 = vector.broadcast %162 : vector<1x32xf32> to vector<8x32xf32>
    %184 = arith.addf %182, %183 : vector<8x32xf32>
    %185 = arith.truncf %184 : vector<8x32xf32> to vector<8x32xbf16>
    %c0_60 = arith.constant 0 : index
    %c0_61 = arith.constant 0 : index
    %186 = vector.load %arg17[%c0_60, %c0_61] : memref<32x64xbf16, #tpu.memory_space<vmem>>, vector<32x64xbf16>
    %cst_62 = arith.constant dense<0.000000e+00> : vector<8x64xf32>
    %187 = tpu.matmul %185, %186, %cst_62 {dimension_numbers = #tpu.dot_dimension_numbers<[1], [0], [0], [1], [0, 0, 1, 1], [], []>} : vector<8x32xbf16>, vector<32x64xbf16>, vector<8x64xf32> -> vector<8x64xf32>
    %c0_63 = arith.constant 0 : index
    %c0_64 = arith.constant 0 : index
    %188 = vector.load %arg18[%c0_63, %c0_64] : memref<1x64xf32, #tpu.memory_space<vmem>>, vector<1x64xf32>
    %189 = vector.broadcast %188 : vector<1x64xf32> to vector<8x64xf32>
    %190 = arith.addf %187, %189 : vector<8x64xf32>
    %cst_65 = arith.constant 0.000000e+00 : f32
    %191 = vector.broadcast %cst_65 : f32 to vector<8x64xf32>
    %192 = arith.maximumf %190, %191 : vector<8x64xf32>
    %193 = arith.truncf %192 : vector<8x64xf32> to vector<8x64xbf16>
    %c0_66 = arith.constant 0 : index
    %c0_67 = arith.constant 0 : index
    %194 = vector.load %arg19[%c0_66, %c0_67] : memref<64x32xbf16, #tpu.memory_space<vmem>>, vector<64x32xbf16>
    %cst_68 = arith.constant dense<0.000000e+00> : vector<8x32xf32>
    %195 = tpu.matmul %193, %194, %cst_68 {dimension_numbers = #tpu.dot_dimension_numbers<[1], [0], [0], [1], [0, 0, 1, 1], [], []>} : vector<8x64xbf16>, vector<64x32xbf16>, vector<8x32xf32> -> vector<8x32xf32>
    %c0_69 = arith.constant 0 : index
    %c0_70 = arith.constant 0 : index
    %196 = vector.load %arg20[%c0_69, %c0_70] : memref<1x32xf32, #tpu.memory_space<vmem>>, vector<1x32xf32>
    %197 = vector.broadcast %196 : vector<1x32xf32> to vector<8x32xf32>
    %198 = arith.addf %195, %197 : vector<8x32xf32>
    %199 = arith.addf %184, %198 : vector<8x32xf32>
    %c0_71 = arith.constant 0 : index
    %c0_72 = arith.constant 0 : index
    %200 = vector.load %arg21[%c0_71, %c0_72] : memref<1x32xf32, #tpu.memory_space<vmem>>, vector<1x32xf32>
    %c0_73 = arith.constant 0 : index
    %c0_74 = arith.constant 0 : index
    %201 = vector.load %arg22[%c0_73, %c0_74] : memref<1x32xf32, #tpu.memory_space<vmem>>, vector<1x32xf32>
    %cst_75 = arith.constant dense<0.000000e+00> : vector<8xf32>
    %202 = vector.multi_reduction <add>, %199, %cst_75 [1] : vector<8x32xf32> to vector<8xf32>
    %203 = vector.shape_cast %202 : vector<8xf32> to vector<8x1xf32>
    %cst_76 = arith.constant 3.200000e+01 : f32
    %204 = vector.broadcast %cst_76 : f32 to vector<8x1xf32>
    %205 = arith.divf %203, %204 : vector<8x1xf32>
    %206 = vector.broadcast %205 : vector<8x1xf32> to vector<8x32xf32>
    %207 = arith.subf %199, %206 : vector<8x32xf32>
    %208 = arith.mulf %207, %207 : vector<8x32xf32>
    %cst_77 = arith.constant dense<0.000000e+00> : vector<8xf32>
    %209 = vector.multi_reduction <add>, %208, %cst_77 [1] : vector<8x32xf32> to vector<8xf32>
    %210 = vector.shape_cast %209 : vector<8xf32> to vector<8x1xf32>
    %cst_78 = arith.constant 3.200000e+01 : f32
    %211 = vector.broadcast %cst_78 : f32 to vector<8x1xf32>
    %212 = arith.divf %210, %211 : vector<8x1xf32>
    %213 = vector.broadcast %205 : vector<8x1xf32> to vector<8x32xf32>
    %214 = arith.subf %199, %213 : vector<8x32xf32>
    %cst_79 = arith.constant 9.99999974E-6 : f32
    %215 = vector.broadcast %cst_79 : f32 to vector<8x1xf32>
    %216 = arith.addf %212, %215 : vector<8x1xf32>
    %217 = math.rsqrt %216 : vector<8x1xf32>
    %218 = vector.broadcast %217 : vector<8x1xf32> to vector<8x32xf32>
    %219 = arith.mulf %214, %218 : vector<8x32xf32>
    %220 = vector.broadcast %200 : vector<1x32xf32> to vector<8x32xf32>
    %221 = arith.mulf %219, %220 : vector<8x32xf32>
    %222 = vector.broadcast %201 : vector<1x32xf32> to vector<8x32xf32>
    %223 = arith.addf %221, %222 : vector<8x32xf32>
    %c0_80 = arith.constant 0 : index
    %c0_81 = arith.constant 0 : index
    %c0_82 = arith.constant 0 : index
    %224 = vector.load %arg23[%c0_80, %c0_81, %c0_82] : memref<1x8x32xf32, #tpu.memory_space<vmem>>, vector<1x8x32xf32>
    %225 = vector.shape_cast %224 : vector<1x8x32xf32> to vector<8x32xf32>
    %226 = vector.shape_cast %223 : vector<8x32xf32> to vector<1x8x32xf32>
    tpu.vector_store %arg23[%c0_80, %c0_81, %c0_82], %226 {strides = array<i32>} : memref<1x8x32xf32, #tpu.memory_space<vmem>>, vector<1x8x32xf32>,
    return
  }
  func.func @transform_0(%arg0: i32) -> (i32, i32, i32) {
    %c0_i32 = arith.constant 0 : i32
    %c0_i32_0 = arith.constant 0 : i32
    %c0_i32_1 = arith.constant 0 : i32
    return %arg0, %c0_i32, %c0_i32_0 : i32, i32, i32
  }
  func.func @transform_1(%arg0: i32) -> (i32, i32, i32) {
    %c0_i32 = arith.constant 0 : i32
    %c0_i32_0 = arith.constant 0 : i32
    %c0_i32_1 = arith.constant 0 : i32
    return %arg0, %c0_i32, %c0_i32_0 : i32, i32, i32
  }
  func.func @transform_2(%arg0: i32) -> (i32, i32) {
    %c0_i32 = arith.constant 0 : i32
    %c0_i32_0 = arith.constant 0 : i32
    %c0_i32_1 = arith.constant 0 : i32
    return %c0_i32, %c0_i32_0 : i32, i32
  }
  func.func @transform_3(%arg0: i32) -> (i32, i32) {
    %c0_i32 = arith.constant 0 : i32
    %c0_i32_0 = arith.constant 0 : i32
    %c0_i32_1 = arith.constant 0 : i32
    return %c0_i32, %c0_i32_0 : i32, i32
  }
  func.func @transform_4(%arg0: i32) -> (i32, i32, i32) {
    %c0_i32 = arith.constant 0 : i32
    %c0_i32_0 = arith.constant 0 : i32
    %c0_i32_1 = arith.constant 0 : i32
    %c0_i32_2 = arith.constant 0 : i32
    return %c0_i32, %c0_i32_0, %c0_i32_1 : i32, i32, i32
  }
  func.func @transform_5(%arg0: i32) -> (i32, i32) {
    %c0_i32 = arith.constant 0 : i32
    %c0_i32_0 = arith.constant 0 : i32
    %c0_i32_1 = arith.constant 0 : i32
    return %c0_i32, %c0_i32_0 : i32, i32
  }
  func.func @transform_6(%arg0: i32) -> (i32, i32) {
    %c0_i32 = arith.constant 0 : i32
    %c0_i32_0 = arith.constant 0 : i32
    %c0_i32_1 = arith.constant 0 : i32
    return %c0_i32, %c0_i32_0 : i32, i32
  }
  func.func @transform_7(%arg0: i32) -> (i32, i32) {
    %c0_i32 = arith.constant 0 : i32
    %c0_i32_0 = arith.constant 0 : i32
    %c0_i32_1 = arith.constant 0 : i32
    return %c0_i32, %c0_i32_0 : i32, i32
  }
  func.func @transform_8(%arg0: i32) -> (i32, i32) {
    %c0_i32 = arith.constant 0 : i32
    %c0_i32_0 = arith.constant 0 : i32
    %c0_i32_1 = arith.constant 0 : i32
    return %c0_i32, %c0_i32_0 : i32, i32
  }
  func.func @transform_9(%arg0: i32) -> (i32, i32) {
    %c0_i32 = arith.constant 0 : i32
    %c0_i32_0 = arith.constant 0 : i32
    %c0_i32_1 = arith.constant 0 : i32
    return %c0_i32, %c0_i32_0 : i32, i32
  }
  func.func @transform_10(%arg0: i32) -> (i32, i32) {
    %c0_i32 = arith.constant 0 : i32
    %c0_i32_0 = arith.constant 0 : i32
    %c0_i32_1 = arith.constant 0 : i32
    return %c0_i32, %c0_i32_0 : i32, i32
  }
  func.func @transform_11(%arg0: i32) -> (i32, i32) {
    %c0_i32 = arith.constant 0 : i32
    %c0_i32_0 = arith.constant 0 : i32
    %c0_i32_1 = arith.constant 0 : i32
    return %c0_i32, %c0_i32_0 : i32, i32
  }
  func.func @transform_12(%arg0: i32) -> (i32, i32, i32) {
    %c0_i32 = arith.constant 0 : i32
    %c0_i32_0 = arith.constant 0 : i32
    %c0_i32_1 = arith.constant 0 : i32
    %c0_i32_2 = arith.constant 0 : i32
    return %c0_i32, %c0_i32_0, %c0_i32_1 : i32, i32, i32
  }
  func.func @transform_13(%arg0: i32) -> (i32, i32) {
    %c0_i32 = arith.constant 0 : i32
    %c0_i32_0 = arith.constant 0 : i32
    %c0_i32_1 = arith.constant 0 : i32
    return %c0_i32, %c0_i32_0 : i32, i32
  }
  func.func @transform_14(%arg0: i32) -> (i32, i32) {
    %c0_i32 = arith.constant 0 : i32
    %c0_i32_0 = arith.constant 0 : i32
    %c0_i32_1 = arith.constant 0 : i32
    return %c0_i32, %c0_i32_0 : i32, i32
  }
  func.func @transform_15(%arg0: i32) -> (i32, i32) {
    %c0_i32 = arith.constant 0 : i32
    %c0_i32_0 = arith.constant 0 : i32
    %c0_i32_1 = arith.constant 0 : i32
    return %c0_i32, %c0_i32_0 : i32, i32
  }
  func.func @transform_16(%arg0: i32) -> (i32, i32) {
    %c0_i32 = arith.constant 0 : i32
    %c0_i32_0 = arith.constant 0 : i32
    %c0_i32_1 = arith.constant 0 : i32
    return %c0_i32, %c0_i32_0 : i32, i32
  }
  func.func @transform_17(%arg0: i32) -> (i32, i32) {
    %c0_i32 = arith.constant 0 : i32
    %c0_i32_0 = arith.constant 0 : i32
    %c0_i32_1 = arith.constant 0 : i32
    return %c0_i32, %c0_i32_0 : i32, i32
  }
  func.func @transform_18(%arg0: i32) -> (i32, i32) {
    %c0_i32 = arith.constant 0 : i32
    %c0_i32_0 = arith.constant 0 : i32
    %c0_i32_1 = arith.constant 0 : i32
    return %c0_i32, %c0_i32_0 : i32, i32
  }
  func.func @transform_19(%arg0: i32) -> (i32, i32) {
    %c0_i32 = arith.constant 0 : i32
    %c0_i32_0 = arith.constant 0 : i32
    %c0_i32_1 = arith.constant 0 : i32
    return %c0_i32, %c0_i32_0 : i32, i32
  }
  func.func @transform_20(%arg0: i32) -> (i32, i32) {
    %c0_i32 = arith.constant 0 : i32
    %c0_i32_0 = arith.constant 0 : i32
    %c0_i32_1 = arith.constant 0 : i32
    return %c0_i32, %c0_i32_0 : i32, i32
  }
  func.func @transform_21(%arg0: i32) -> (i32, i32) {
    %c0_i32 = arith.constant 0 : i32
    %c0_i32_0 = arith.constant 0 : i32
    %c0_i32_1 = arith.constant 0 : i32
    return %c0_i32, %c0_i32_0 : i32, i32
  }
  func.func @transform_22(%arg0: i32) -> (i32, i32, i32) {
    %c0_i32 = arith.constant 0 : i32
    %c0_i32_0 = arith.constant 0 : i32
    %c0_i32_1 = arith.constant 0 : i32
    return %arg0, %c0_i32, %c0_i32_0 : i32, i32, i32
  }
}

module attributes {stable_mosaic.version = 11 : i64} {
  func.func @_decoder_layer_kernel(%arg0: i32, %arg1: memref<1x8x32xf32, #tpu.memory_space<vmem>>, %arg2: memref<1x8x32xf32, #tpu.memory_space<vmem>>, %arg3: memref<32x96xbf16, #tpu.memory_space<vmem>>, %arg4: memref<1x96xf32, #tpu.memory_space<vmem>>, %arg5: memref<4x8x32xbf16, #tpu.memory_space<vmem>>, %arg6: memref<1x32xf32, #tpu.memory_space<vmem>>, %arg7: memref<1x32xf32, #tpu.memory_space<vmem>>, %arg8: memref<1x32xf32, #tpu.memory_space<vmem>>, %arg9: memref<32x32xbf16, #tpu.memory_space<vmem>>, %arg10: memref<1x32xf32, #tpu.memory_space<vmem>>, %arg11: memref<32x64xbf16, #tpu.memory_space<vmem>>, %arg12: memref<1x64xf32, #tpu.memory_space<vmem>>, %arg13: memref<4x8x32xbf16, #tpu.memory_space<vmem>>, %arg14: memref<1x32xf32, #tpu.memory_space<vmem>>, %arg15: memref<1x32xf32, #tpu.memory_space<vmem>>, %arg16: memref<1x32xf32, #tpu.memory_space<vmem>>, %arg17: memref<32x64xbf16, #tpu.memory_space<vmem>>, %arg18: memref<1x64xf32, #tpu.memory_space<vmem>>, %arg19: memref<64x32xbf16, #tpu.memory_space<vmem>>, %arg20: memref<1x32xf32, #tpu.memory_space<vmem>>, %arg21: memref<1x32xf32, #tpu.memory_space<vmem>>, %arg22: memref<1x32xf32, #tpu.memory_space<vmem>>, %arg23: memref<1x8x32xf32, #tpu.memory_space<vmem>>) attributes {dimension_semantics = [#tpu.dimension_semantics<parallel>], iteration_bounds = array<i64: 2>, scalar_prefetch = 0 : i64, scratch_operands = 0 : i64, tpu.core_type = #tpu.core_type<tc>, window_params = [{transform_indices = @transform_0, window_bounds = array<i64: 1, 8, 32>}, {transform_indices = @transform_1, window_bounds = array<i64: 1, 8, 32>}, {pipeline_mode = #tpu.pipeline_mode<synchronous>, transform_indices = @transform_2, window_bounds = array<i64: 32, 96>}, {pipeline_mode = #tpu.pipeline_mode<synchronous>, transform_indices = @transform_3, window_bounds = array<i64: 1, 96>}, {pipeline_mode = #tpu.pipeline_mode<synchronous>, transform_indices = @transform_4, window_bounds = array<i64: 4, 8, 32>}, {pipeline_mode = #tpu.pipeline_mode<synchronous>, transform_indices = @transform_5, window_bounds = array<i64: 1, 32>}, {pipeline_mode = #tpu.pipeline_mode<synchronous>, transform_indices = @transform_6, window_bounds = array<i64: 1, 32>}, {pipeline_mode = #tpu.pipeline_mode<synchronous>, transform_indices = @transform_7, window_bounds = array<i64: 1, 32>}, {pipeline_mode = #tpu.pipeline_mode<synchronous>, transform_indices = @transform_8, window_bounds = array<i64: 32, 32>}, {pipeline_mode = #tpu.pipeline_mode<synchronous>, transform_indices = @transform_9, window_bounds = array<i64: 1, 32>}, {pipeline_mode = #tpu.pipeline_mode<synchronous>, transform_indices = @transform_10, window_bounds = array<i64: 32, 64>}, {pipeline_mode = #tpu.pipeline_mode<synchronous>, transform_indices = @transform_11, window_bounds = array<i64: 1, 64>}, {pipeline_mode = #tpu.pipeline_mode<synchronous>, transform_indices = @transform_12, window_bounds = array<i64: 4, 8, 32>}, {pipeline_mode = #tpu.pipeline_mode<synchronous>, transform_indices = @transform_13, window_bounds = array<i64: 1, 32>}, {pipeline_mode = #tpu.pipeline_mode<synchronous>, transform_indices = @transform_14, window_bounds = array<i64: 1, 32>}, {pipeline_mode = #tpu.pipeline_mode<synchronous>, transform_indices = @transform_15, window_bounds = array<i64: 1, 32>}, {pipeline_mode = #tpu.pipeline_mode<synchronous>, transform_indices = @transform_16, window_bounds = array<i64: 32, 64>}, {pipeline_mode = #tpu.pipeline_mode<synchronous>, transform_indices = @transform_17, window_bounds = array<i64: 1, 64>}, {pipeline_mode = #tpu.pipeline_mode<synchronous>, transform_indices = @transform_18, window_bounds = array<i64: 64, 32>}, {pipeline_mode = #tpu.pipeline_mode<synchronous>, transform_indices = @transform_19, window_bounds = array<i64: 1, 32>}, {pipeline_mode = #tpu.pipeline_mode<synchronous>, transform_indices = @transform_20, window_bounds = array<i64: 1, 32>}, {pipeline_mode = #tpu.pipeline_mode<synchronous>, transform_indices = @transform_21, window_bounds = array<i64: 1, 32>}, {transform_indices = @transform_22, window_bounds = array<i64: 1, 8, 32>}]} {
    %c0 = arith.constant 0 : index
    %c0_0 = arith.constant 0 : index
    %c0_1 = arith.constant 0 : index
    %0 = vector.load %arg1[%c0, %c0_0, %c0_1] : memref<1x8x32xf32, #tpu.memory_space<vmem>>, vector<1x8x32xf32>
    %1 = vector.shape_cast %0 : vector<1x8x32xf32> to vector<8x32xf32>
    %c0_2 = arith.constant 0 : index
    %c0_3 = arith.constant 0 : index
    %c0_4 = arith.constant 0 : index
    %2 = vector.load %arg2[%c0_2, %c0_3, %c0_4] : memref<1x8x32xf32, #tpu.memory_space<vmem>>, vector<1x8x32xf32>
    %3 = vector.shape_cast %2 : vector<1x8x32xf32> to vector<8x32xf32>
    %4 = tpu.iota {dimensions = array<i32: 0>} : vector<8x8xi32>
    %5 = tpu.iota {dimensions = array<i32: 1>} : vector<8x8xi32>
    %6 = arith.cmpi sle, %5, %4 : vector<8x8xi32>
    %7 = arith.truncf %1 : vector<8x32xf32> to vector<8x32xbf16>
    %c0_5 = arith.constant 0 : index
    %c0_6 = arith.constant 0 : index
    %8 = vector.load %arg3[%c0_5, %c0_6] : memref<32x96xbf16, #tpu.memory_space<vmem>>, vector<32x96xbf16>
    %cst = arith.constant dense<0.000000e+00> : vector<8x96xf32>
    %9 = tpu.matmul %7, %8, %cst {dimension_numbers = #tpu.dot_dimension_numbers<[1], [0], [0], [1], [0, 0, 1, 1], [], []>} : vector<8x32xbf16>, vector<32x96xbf16>, vector<8x96xf32> -> vector<8x96xf32>
    %c0_7 = arith.constant 0 : index
    %c0_8 = arith.constant 0 : index
    %10 = vector.load %arg4[%c0_7, %c0_8] : memref<1x96xf32, #tpu.memory_space<vmem>>, vector<1x96xf32>
    %11 = vector.broadcast %10 : vector<1x96xf32> to vector<8x96xf32>
    %12 = arith.addf %9, %11 : vector<8x96xf32>
    %13 = vector.extract_strided_slice %12 {offsets = [0, 0], sizes = [8, 32], strides = [1, 1]} : vector<8x96xf32> to vector<8x32xf32>
    %14 = vector.extract_strided_slice %12 {offsets = [0, 32], sizes = [8, 32], strides = [1, 1]} : vector<8x96xf32> to vector<8x32xf32>
    %15 = vector.extract_strided_slice %12 {offsets = [0, 64], sizes = [8, 32], strides = [1, 1]} : vector<8x96xf32> to vector<8x32xf32>
    %c0_9 = arith.constant 0 : index
    %c0_10 = arith.constant 0 : index
    %c0_11 = arith.constant 0 : index
    %16 = vector.load %arg5[%c0_9, %c0_10, %c0_11] : memref<4x8x32xbf16, #tpu.memory_space<vmem>>, vector<4x8x32xbf16>
    %c0_12 = arith.constant 0 : index
    %c0_13 = arith.constant 0 : index
    %17 = vector.load %arg6[%c0_12, %c0_13] : memref<1x32xf32, #tpu.memory_space<vmem>>, vector<1x32xf32>
    %18 = vector.extract_strided_slice %13 {offsets = [0, 0], sizes = [8, 8], strides = [1, 1]} : vector<8x32xf32> to vector<8x8xf32>
    %19 = vector.extract_strided_slice %13 {offsets = [0, 8], sizes = [8, 8], strides = [1, 1]} : vector<8x32xf32> to vector<8x8xf32>
    %20 = vector.extract_strided_slice %13 {offsets = [0, 16], sizes = [8, 8], strides = [1, 1]} : vector<8x32xf32> to vector<8x8xf32>
    %21 = vector.extract_strided_slice %13 {offsets = [0, 24], sizes = [8, 8], strides = [1, 1]} : vector<8x32xf32> to vector<8x8xf32>
    %22 = vector.shape_cast %18 : vector<8x8xf32> to vector<1x8x8xf32>
    %23 = vector.shape_cast %19 : vector<8x8xf32> to vector<1x8x8xf32>
    %24 = vector.shape_cast %20 : vector<8x8xf32> to vector<1x8x8xf32>
    %25 = vector.shape_cast %21 : vector<8x8xf32> to vector<1x8x8xf32>
    %26 = tpu.concatenate %22, %23, %24, %25 in 0 : vector<1x8x8xf32>, vector<1x8x8xf32>, vector<1x8x8xf32>, vector<1x8x8xf32> -> vector<4x8x8xf32>
    %27 = arith.truncf %26 : vector<4x8x8xf32> to vector<4x8x8xbf16>
    %28 = vector.extract_strided_slice %14 {offsets = [0, 0], sizes = [8, 8], strides = [1, 1]} : vector<8x32xf32> to vector<8x8xf32>
    %29 = vector.extract_strided_slice %14 {offsets = [0, 8], sizes = [8, 8], strides = [1, 1]} : vector<8x32xf32> to vector<8x8xf32>
    %30 = vector.extract_strided_slice %14 {offsets = [0, 16], sizes = [8, 8], strides = [1, 1]} : vector<8x32xf32> to vector<8x8xf32>
    %31 = vector.extract_strided_slice %14 {offsets = [0, 24], sizes = [8, 8], strides = [1, 1]} : vector<8x32xf32> to vector<8x8xf32>
    %32 = vector.shape_cast %28 : vector<8x8xf32> to vector<1x8x8xf32>
    %33 = vector.shape_cast %29 : vector<8x8xf32> to vector<1x8x8xf32>
    %34 = vector.shape_cast %30 : vector<8x8xf32> to vector<1x8x8xf32>
    %35 = vector.shape_cast %31 : vector<8x8xf32> to vector<1x8x8xf32>
    %36 = tpu.concatenate %32, %33, %34, %35 in 0 : vector<1x8x8xf32>, vector<1x8x8xf32>, vector<1x8x8xf32>, vector<1x8x8xf32> -> vector<4x8x8xf32>
    %37 = arith.truncf %36 : vector<4x8x8xf32> to vector<4x8x8xbf16>
    %38 = vector.extract_strided_slice %15 {offsets = [0, 0], sizes = [8, 8], strides = [1, 1]} : vector<8x32xf32> to vector<8x8xf32>
    %39 = vector.extract_strided_slice %15 {offsets = [0, 8], sizes = [8, 8], strides = [1, 1]} : vector<8x32xf32> to vector<8x8xf32>
    %40 = vector.extract_strided_slice %15 {offsets = [0, 16], sizes = [8, 8], strides = [1, 1]} : vector<8x32xf32> to vector<8x8xf32>
    %41 = vector.extract_strided_slice %15 {offsets = [0, 24], sizes = [8, 8], strides = [1, 1]} : vector<8x32xf32> to vector<8x8xf32>
    %42 = vector.shape_cast %38 : vector<8x8xf32> to vector<1x8x8xf32>
    %43 = vector.shape_cast %39 : vector<8x8xf32> to vector<1x8x8xf32>
    %44 = vector.shape_cast %40 : vector<8x8xf32> to vector<1x8x8xf32>
    %45 = vector.shape_cast %41 : vector<8x8xf32> to vector<1x8x8xf32>
    %46 = tpu.concatenate %42, %43, %44, %45 in 0 : vector<1x8x8xf32>, vector<1x8x8xf32>, vector<1x8x8xf32>, vector<1x8x8xf32> -> vector<4x8x8xf32>
    %47 = arith.truncf %46 : vector<4x8x8xf32> to vector<4x8x8xbf16>
    "tpu.trace_start"() <{level = 10 : i32, message = "hqd,hkd->hqk"}> : () -> ()
    %cst_14 = arith.constant dense<0.000000e+00> : vector<4x8x8xf32>
    %48 = tpu.matmul %27, %37, %cst_14 {dimension_numbers = #tpu.dot_dimension_numbers<[2], [2], [1], [1], [0, 0, 0, 1, 1, 1], [0], [0]>} : vector<4x8x8xbf16>, vector<4x8x8xbf16>, vector<4x8x8xf32> -> vector<4x8x8xf32>
    "tpu.trace_stop"() : () -> ()
    %49 = vector.shape_cast %6 : vector<8x8xi1> to vector<1x8x8xi1>
    %cst_15 = arith.constant -1.000000e+30 : f32
    %50 = vector.shape_cast %49 : vector<1x8x8xi1> to vector<1x8x8xi1>
    %51 = vector.broadcast %50 : vector<1x8x8xi1> to vector<4x8x8xi1>
    %52 = vector.broadcast %cst_15 : f32 to vector<4x8x8xf32>
    %53 = arith.select %51, %48, %52 : vector<4x8x8xi1>, vector<4x8x8xf32>
    %cst_16 = arith.constant dense<0xFF800000> : vector<4x8xf32>
    %54 = vector.multi_reduction <maximumf>, %53, %cst_16 [2] : vector<4x8x8xf32> to vector<4x8xf32>
    %55 = vector.shape_cast %54 : vector<4x8xf32> to vector<4x8x1xf32>
    %56 = vector.broadcast %55 : vector<4x8x1xf32> to vector<4x8x8xf32>
    %57 = arith.subf %53, %56 : vector<4x8x8xf32>
    %58 = math.exp %57 : vector<4x8x8xf32>
    %cst_17 = arith.constant dense<0.000000e+00> : vector<4x8xf32>
    %59 = vector.multi_reduction <add>, %58, %cst_17 [2] : vector<4x8x8xf32> to vector<4x8xf32>
    %60 = vector.shape_cast %59 : vector<4x8xf32> to vector<4x8x1xf32>
    %61 = arith.truncf %58 : vector<4x8x8xf32> to vector<4x8x8xbf16>
    "tpu.trace_start"() <{level = 10 : i32, message = "hqk,hkd->hqd"}> : () -> ()
    %cst_18 = arith.constant dense<0.000000e+00> : vector<4x8x8xf32>
    %62 = tpu.matmul %61, %47, %cst_18 {dimension_numbers = #tpu.dot_dimension_numbers<[2], [1], [1], [2], [0, 0, 0, 1, 1, 2], [0], [0]>} : vector<4x8x8xbf16>, vector<4x8x8xbf16>, vector<4x8x8xf32> -> vector<4x8x8xf32>
    "tpu.trace_stop"() : () -> ()
    %63 = tpu.reciprocal %60 {approx = true} : vector<4x8x1xf32> -> vector<4x8x1xf32>
    %64 = vector.broadcast %63 : vector<4x8x1xf32> to vector<4x8x8xf32>
    %65 = arith.mulf %62, %64 : vector<4x8x8xf32>
    %66 = arith.truncf %65 : vector<4x8x8xf32> to vector<4x8x8xbf16>
    "tpu.trace_start"() <{level = 10 : i32, message = "hqd,hdf->hqf"}> : () -> ()
    %cst_19 = arith.constant dense<0.000000e+00> : vector<4x8x32xf32>
    %67 = tpu.matmul %66, %16, %cst_19 {dimension_numbers = #tpu.dot_dimension_numbers<[2], [1], [1], [2], [0, 0, 0, 1, 1, 2], [0], [0]>} : vector<4x8x8xbf16>, vector<4x8x32xbf16>, vector<4x8x32xf32> -> vector<4x8x32xf32>
    "tpu.trace_stop"() : () -> ()
    %cst_20 = arith.constant dense<0.000000e+00> : vector<8x32xf32>
    %68 = vector.multi_reduction <add>, %67, %cst_20 [0] : vector<4x8x32xf32> to vector<8x32xf32>
    %69 = vector.broadcast %17 : vector<1x32xf32> to vector<8x32xf32>
    %70 = arith.addf %68, %69 : vector<8x32xf32>
    %71 = arith.addf %1, %70 : vector<8x32xf32>
    %c0_21 = arith.constant 0 : index
    %c0_22 = arith.constant 0 : index
    %72 = vector.load %arg7[%c0_21, %c0_22] : memref<1x32xf32, #tpu.memory_space<vmem>>, vector<1x32xf32>
    %c0_23 = arith.constant 0 : index
    %c0_24 = arith.constant 0 : index
    %73 = vector.load %arg8[%c0_23, %c0_24] : memref<1x32xf32, #tpu.memory_space<vmem>>, vector<1x32xf32>
    %cst_25 = arith.constant dense<0.000000e+00> : vector<8xf32>
    %74 = vector.multi_reduction <add>, %71, %cst_25 [1] : vector<8x32xf32> to vector<8xf32>
    %75 = vector.shape_cast %74 : vector<8xf32> to vector<8x1xf32>
    %cst_26 = arith.constant 3.200000e+01 : f32
    %76 = vector.broadcast %cst_26 : f32 to vector<8x1xf32>
    %77 = arith.divf %75, %76 : vector<8x1xf32>
    %78 = vector.broadcast %77 : vector<8x1xf32> to vector<8x32xf32>
    %79 = arith.subf %71, %78 : vector<8x32xf32>
    %80 = arith.mulf %79, %79 : vector<8x32xf32>
    %cst_27 = arith.constant dense<0.000000e+00> : vector<8xf32>
    %81 = vector.multi_reduction <add>, %80, %cst_27 [1] : vector<8x32xf32> to vector<8xf32>
    %82 = vector.shape_cast %81 : vector<8xf32> to vector<8x1xf32>
    %cst_28 = arith.constant 3.200000e+01 : f32
    %83 = vector.broadcast %cst_28 : f32 to vector<8x1xf32>
    %84 = arith.divf %82, %83 : vector<8x1xf32>
    %85 = vector.broadcast %77 : vector<8x1xf32> to vector<8x32xf32>
    %86 = arith.subf %71, %85 : vector<8x32xf32>
    %cst_29 = arith.constant 9.99999974E-6 : f32
    %87 = vector.broadcast %cst_29 : f32 to vector<8x1xf32>
    %88 = arith.addf %84, %87 : vector<8x1xf32>
    %89 = math.rsqrt %88 : vector<8x1xf32>
    %90 = vector.broadcast %89 : vector<8x1xf32> to vector<8x32xf32>
    %91 = arith.mulf %86, %90 : vector<8x32xf32>
    %92 = vector.broadcast %72 : vector<1x32xf32> to vector<8x32xf32>
    %93 = arith.mulf %91, %92 : vector<8x32xf32>
    %94 = vector.broadcast %73 : vector<1x32xf32> to vector<8x32xf32>
    %95 = arith.addf %93, %94 : vector<8x32xf32>
    %96 = arith.truncf %95 : vector<8x32xf32> to vector<8x32xbf16>
    %c0_30 = arith.constant 0 : index
    %c0_31 = arith.constant 0 : index
    %97 = vector.load %arg9[%c0_30, %c0_31] : memref<32x32xbf16, #tpu.memory_space<vmem>>, vector<32x32xbf16>
    %cst_32 = arith.constant dense<0.000000e+00> : vector<8x32xf32>
    %98 = tpu.matmul %96, %97, %cst_32 {dimension_numbers = #tpu.dot_dimension_numbers<[1], [0], [0], [1], [0, 0, 1, 1], [], []>} : vector<8x32xbf16>, vector<32x32xbf16>, vector<8x32xf32> -> vector<8x32xf32>
    %c0_33 = arith.constant 0 : index
    %c0_34 = arith.constant 0 : index
    %99 = vector.load %arg10[%c0_33, %c0_34] : memref<1x32xf32, #tpu.memory_space<vmem>>, vector<1x32xf32>
    %100 = vector.broadcast %99 : vector<1x32xf32> to vector<8x32xf32>
    %101 = arith.addf %98, %100 : vector<8x32xf32>
    %102 = arith.truncf %3 : vector<8x32xf32> to vector<8x32xbf16>
    %c0_35 = arith.constant 0 : index
    %c0_36 = arith.constant 0 : index
    %103 = vector.load %arg11[%c0_35, %c0_36] : memref<32x64xbf16, #tpu.memory_space<vmem>>, vector<32x64xbf16>
    %cst_37 = arith.constant dense<0.000000e+00> : vector<8x64xf32>
    %104 = tpu.matmul %102, %103, %cst_37 {dimension_numbers = #tpu.dot_dimension_numbers<[1], [0], [0], [1], [0, 0, 1, 1], [], []>} : vector<8x32xbf16>, vector<32x64xbf16>, vector<8x64xf32> -> vector<8x64xf32>
    %c0_38 = arith.constant 0 : index
    %c0_39 = arith.constant 0 : index
    %105 = vector.load %arg12[%c0_38, %c0_39] : memref<1x64xf32, #tpu.memory_space<vmem>>, vector<1x64xf32>
    %106 = vector.broadcast %105 : vector<1x64xf32> to vector<8x64xf32>
    %107 = arith.addf %104, %106 : vector<8x64xf32>
    %108 = vector.extract_strided_slice %107 {offsets = [0, 0], sizes = [8, 32], strides = [1, 1]} : vector<8x64xf32> to vector<8x32xf32>
    %109 = vector.extract_strided_slice %107 {offsets = [0, 32], sizes = [8, 32], strides = [1, 1]} : vector<8x64xf32> to vector<8x32xf32>
    %c0_40 = arith.constant 0 : index
    %c0_41 = arith.constant 0 : index
    %c0_42 = arith.constant 0 : index
    %110 = vector.load %arg13[%c0_40, %c0_41, %c0_42] : memref<4x8x32xbf16, #tpu.memory_space<vmem>>, vector<4x8x32xbf16>
    %c0_43 = arith.constant 0 : index
    %c0_44 = arith.constant 0 : index
    %111 = vector.load %arg14[%c0_43, %c0_44] : memref<1x32xf32, #tpu.memory_space<vmem>>, vector<1x32xf32>
    %112 = vector.extract_strided_slice %101 {offsets = [0, 0], sizes = [8, 8], strides = [1, 1]} : vector<8x32xf32> to vector<8x8xf32>
    %113 = vector.extract_strided_slice %101 {offsets = [0, 8], sizes = [8, 8], strides = [1, 1]} : vector<8x32xf32> to vector<8x8xf32>
    %114 = vector.extract_strided_slice %101 {offsets = [0, 16], sizes = [8, 8], strides = [1, 1]} : vector<8x32xf32> to vector<8x8xf32>
    %115 = vector.extract_strided_slice %101 {offsets = [0, 24], sizes = [8, 8], strides = [1, 1]} : vector<8x32xf32> to vector<8x8xf32>
    %116 = vector.shape_cast %112 : vector<8x8xf32> to vector<1x8x8xf32>
    %117 = vector.shape_cast %113 : vector<8x8xf32> to vector<1x8x8xf32>
    %118 = vector.shape_cast %114 : vector<8x8xf32> to vector<1x8x8xf32>
    %119 = vector.shape_cast %115 : vector<8x8xf32> to vector<1x8x8xf32>
    %120 = tpu.concatenate %116, %117, %118, %119 in 0 : vector<1x8x8xf32>, vector<1x8x8xf32>, vector<1x8x8xf32>, vector<1x8x8xf32> -> vector<4x8x8xf32>
    %121 = arith.truncf %120 : vector<4x8x8xf32> to vector<4x8x8xbf16>
    %122 = vector.extract_strided_slice %108 {offsets = [0, 0], sizes = [8, 8], strides = [1, 1]} : vector<8x32xf32> to vector<8x8xf32>
    %123 = vector.extract_strided_slice %108 {offsets = [0, 8], sizes = [8, 8], strides = [1, 1]} : vector<8x32xf32> to vector<8x8xf32>
    %124 = vector.extract_strided_slice %108 {offsets = [0, 16], sizes = [8, 8], strides = [1, 1]} : vector<8x32xf32> to vector<8x8xf32>
    %125 = vector.extract_strided_slice %108 {offsets = [0, 24], sizes = [8, 8], strides = [1, 1]} : vector<8x32xf32> to vector<8x8xf32>
    %126 = vector.shape_cast %122 : vector<8x8xf32> to vector<1x8x8xf32>
    %127 = vector.shape_cast %123 : vector<8x8xf32> to vector<1x8x8xf32>
    %128 = vector.shape_cast %124 : vector<8x8xf32> to vector<1x8x8xf32>
    %129 = vector.shape_cast %125 : vector<8x8xf32> to vector<1x8x8xf32>
    %130 = tpu.concatenate %126, %127, %128, %129 in 0 : vector<1x8x8xf32>, vector<1x8x8xf32>, vector<1x8x8xf32>, vector<1x8x8xf32> -> vector<4x8x8xf32>
    %131 = arith.truncf %130 : vector<4x8x8xf32> to vector<4x8x8xbf16>
    %132 = vector.extract_strided_slice %109 {offsets = [0, 0], sizes = [8, 8], strides = [1, 1]} : vector<8x32xf32> to vector<8x8xf32>
    %133 = vector.extract_strided_slice %109 {offsets = [0, 8], sizes = [8, 8], strides = [1, 1]} : vector<8x32xf32> to vector<8x8xf32>
    %134 = vector.extract_strided_slice %109 {offsets = [0, 16], sizes = [8, 8], strides = [1, 1]} : vector<8x32xf32> to vector<8x8xf32>
    %135 = vector.extract_strided_slice %109 {offsets = [0, 24], sizes = [8, 8], strides = [1, 1]} : vector<8x32xf32> to vector<8x8xf32>
    %136 = vector.shape_cast %132 : vector<8x8xf32> to vector<1x8x8xf32>
    %137 = vector.shape_cast %133 : vector<8x8xf32> to vector<1x8x8xf32>
    %138 = vector.shape_cast %134 : vector<8x8xf32> to vector<1x8x8xf32>
    %139 = vector.shape_cast %135 : vector<8x8xf32> to vector<1x8x8xf32>
    %140 = tpu.concatenate %136, %137, %138, %139 in 0 : vector<1x8x8xf32>, vector<1x8x8xf32>, vector<1x8x8xf32>, vector<1x8x8xf32> -> vector<4x8x8xf32>
    %141 = arith.truncf %140 : vector<4x8x8xf32> to vector<4x8x8xbf16>
    "tpu.trace_start"() <{level = 10 : i32, message = "hqd,hkd->hqk"}> : () -> ()
    %cst_45 = arith.constant dense<0.000000e+00> : vector<4x8x8xf32>
    %142 = tpu.matmul %121, %131, %cst_45 {dimension_numbers = #tpu.dot_dimension_numbers<[2], [2], [1], [1], [0, 0, 0, 1, 1, 1], [0], [0]>} : vector<4x8x8xbf16>, vector<4x8x8xbf16>, vector<4x8x8xf32> -> vector<4x8x8xf32>
    "tpu.trace_stop"() : () -> ()
    %cst_46 = arith.constant dense<0xFF800000> : vector<4x8xf32>
    %143 = vector.multi_reduction <maximumf>, %142, %cst_46 [2] : vector<4x8x8xf32> to vector<4x8xf32>
    %144 = vector.shape_cast %143 : vector<4x8xf32> to vector<4x8x1xf32>
    %145 = vector.broadcast %144 : vector<4x8x1xf32> to vector<4x8x8xf32>
    %146 = arith.subf %142, %145 : vector<4x8x8xf32>
    %147 = math.exp %146 : vector<4x8x8xf32>
    %cst_47 = arith.constant dense<0.000000e+00> : vector<4x8xf32>
    %148 = vector.multi_reduction <add>, %147, %cst_47 [2] : vector<4x8x8xf32> to vector<4x8xf32>
    %149 = vector.shape_cast %148 : vector<4x8xf32> to vector<4x8x1xf32>
    %150 = arith.truncf %147 : vector<4x8x8xf32> to vector<4x8x8xbf16>
    "tpu.trace_start"() <{level = 10 : i32, message = "hqk,hkd->hqd"}> : () -> ()
    %cst_48 = arith.constant dense<0.000000e+00> : vector<4x8x8xf32>
    %151 = tpu.matmul %150, %141, %cst_48 {dimension_numbers = #tpu.dot_dimension_numbers<[2], [1], [1], [2], [0, 0, 0, 1, 1, 2], [0], [0]>} : vector<4x8x8xbf16>, vector<4x8x8xbf16>, vector<4x8x8xf32> -> vector<4x8x8xf32>
    "tpu.trace_stop"() : () -> ()
    %152 = tpu.reciprocal %149 {approx = true} : vector<4x8x1xf32> -> vector<4x8x1xf32>
    %153 = vector.broadcast %152 : vector<4x8x1xf32> to vector<4x8x8xf32>
    %154 = arith.mulf %151, %153 : vector<4x8x8xf32>
    %155 = arith.truncf %154 : vector<4x8x8xf32> to vector<4x8x8xbf16>
    "tpu.trace_start"() <{level = 10 : i32, message = "hqd,hdf->hqf"}> : () -> ()
    %cst_49 = arith.constant dense<0.000000e+00> : vector<4x8x32xf32>
    %156 = tpu.matmul %155, %110, %cst_49 {dimension_numbers = #tpu.dot_dimension_numbers<[2], [1], [1], [2], [0, 0, 0, 1, 1, 2], [0], [0]>} : vector<4x8x8xbf16>, vector<4x8x32xbf16>, vector<4x8x32xf32> -> vector<4x8x32xf32>
    "tpu.trace_stop"() : () -> ()
    %cst_50 = arith.constant dense<0.000000e+00> : vector<8x32xf32>
    %157 = vector.multi_reduction <add>, %156, %cst_50 [0] : vector<4x8x32xf32> to vector<8x32xf32>
    %158 = vector.broadcast %111 : vector<1x32xf32> to vector<8x32xf32>
    %159 = arith.addf %157, %158 : vector<8x32xf32>
    %160 = arith.addf %95, %159 : vector<8x32xf32>
    %c0_51 = arith.constant 0 : index
    %c0_52 = arith.constant 0 : index
    %161 = vector.load %arg15[%c0_51, %c0_52] : memref<1x32xf32, #tpu.memory_space<vmem>>, vector<1x32xf32>
    %c0_53 = arith.constant 0 : index
    %c0_54 = arith.constant 0 : index
    %162 = vector.load %arg16[%c0_53, %c0_54] : memref<1x32xf32, #tpu.memory_space<vmem>>, vector<1x32xf32>
    %cst_55 = arith.constant dense<0.000000e+00> : vector<8xf32>
    %163 = vector.multi_reduction <add>, %160, %cst_55 [1] : vector<8x32xf32> to vector<8xf32>
    %164 = vector.shape_cast %163 : vector<8xf32> to vector<8x1xf32>
    %cst_56 = arith.constant 3.200000e+01 : f32
    %165 = vector.broadcast %cst_56 : f32 to vector<8x1xf32>
    %166 = arith.divf %164, %165 : vector<8x1xf32>
    %167 = vector.broadcast %166 : vector<8x1xf32> to vector<8x32xf32>
    %168 = arith.subf %160, %167 : vector<8x32xf32>
    %169 = arith.mulf %168, %168 : vector<8x32xf32>
    %cst_57 = arith.constant dense<0.000000e+00> : vector<8xf32>
    %170 = vector.multi_reduction <add>, %169, %cst_57 [1] : vector<8x32xf32> to vector<8xf32>
    %171 = vector.shape_cast %170 : vector<8xf32> to vector<8x1xf32>
    %cst_58 = arith.constant 3.200000e+01 : f32
    %172 = vector.broadcast %cst_58 : f32 to vector<8x1xf32>
    %173 = arith.divf %171, %172 : vector<8x1xf32>
    %174 = vector.broadcast %166 : vector<8x1xf32> to vector<8x32xf32>
    %175 = arith.subf %160, %174 : vector<8x32xf32>
    %cst_59 = arith.constant 9.99999974E-6 : f32
    %176 = vector.broadcast %cst_59 : f32 to vector<8x1xf32>
    %177 = arith.addf %173, %176 : vector<8x1xf32>
    %178 = math.rsqrt %177 : vector<8x1xf32>
    %179 = vector.broadcast %178 : vector<8x1xf32> to vector<8x32xf32>
    %180 = arith.mulf %175, %179 : vector<8x32xf32>
    %181 = vector.broadcast %161 : vector<1x32xf32> to vector<8x32xf32>
    %182 = arith.mulf %180, %181 : vector<8x32xf32>
    %183 = vector.broadcast %162 : vector<1x32xf32> to vector<8x32xf32>
    %184 = arith.addf %182, %183 : vector<8x32xf32>
    %185 = arith.truncf %184 : vector<8x32xf32> to vector<8x32xbf16>
    %c0_60 = arith.constant 0 : index
    %c0_61 = arith.constant 0 : index
    %186 = vector.load %arg17[%c0_60, %c0_61] : memref<32x64xbf16, #tpu.memory_space<vmem>>, vector<32x64xbf16>
    %cst_62 = arith.constant dense<0.000000e+00> : vector<8x64xf32>
    %187 = tpu.matmul %185, %186, %cst_62 {dimension_numbers = #tpu.dot_dimension_numbers<[1], [0], [0], [1], [0, 0, 1, 1], [], []>} : vector<8x32xbf16>, vector<32x64xbf16>, vector<8x64xf32> -> vector<8x64xf32>
    %c0_63 = arith.constant 0 : index
    %c0_64 = arith.constant 0 : index
    %188 = vector.load %arg18[%c0_63, %c0_64] : memref<1x64xf32, #tpu.memory_space<vmem>>, vector<1x64xf32>
    %189 = vector.broadcast %188 : vector<1x64xf32> to vector<8x64xf32>
    %190 = arith.addf %187, %189 : vector<8x64xf32>
    %cst_65 = arith.constant 0.000000e+00 : f32
    %191 = vector.broadcast %cst_65 : f32 to vector<8x64xf32>
    %192 = arith.maximumf %190, %191 : vector<8x64xf32>
    %193 = arith.truncf %192 : vector<8x64xf32> to vector<8x64xbf16>
    %c0_66 = arith.constant 0 : index
    %c0_67 = arith.constant 0 : index
    %194 = vector.load %arg19[%c0_66, %c0_67] : memref<64x32xbf16, #tpu.memory_space<vmem>>, vector<64x32xbf16>
    %cst_68 = arith.constant dense<0.000000e+00> : vector<8x32xf32>
    %195 = tpu.matmul %193, %194, %cst_68 {dimension_numbers = #tpu.dot_dimension_numbers<[1], [0], [0], [1], [0, 0, 1, 1], [], []>} : vector<8x64xbf16>, vector<64x32xbf16>, vector<8x32xf32> -> vector<8x32xf32>
    %c0_69 = arith.constant 0 : index
    %c0_70 = arith.constant 0 : index
    %196 = vector.load %arg20[%c0_69, %c0_70] : memref<1x32xf32, #tpu.memory_space<vmem>>, vector<1x32xf32>
    %197 = vector.broadcast %196 : vector<1x32xf32> to vector<8x32xf32>
    %198 = arith.addf %195, %197 : vector<8x32xf32>
    %199 = arith.addf %184, %198 : vector<8x32xf32>
    %c0_71 = arith.constant 0 : index
    %c0_72 = arith.constant 0 : index
    %200 = vector.load %arg21[%c0_71, %c0_72] : memref<1x32xf32, #tpu.memory_space<vmem>>, vector<1x32xf32>
    %c0_73 = arith.constant 0 : index
    %c0_74 = arith.constant 0 : index
    %201 = vector.load %arg22[%c0_73, %c0_74] : memref<1x32xf32, #tpu.memory_space<vmem>>, vector<1x32xf32>
    %cst_75 = arith.constant dense<0.000000e+00> : vector<8xf32>
    %202 = vector.multi_reduction <add>, %199, %cst_75 [1] : vector<8x32xf32> to vector<8xf32>
    %203 = vector.shape_cast %202 : vector<8xf32> to vector<8x1xf32>
    %cst_76 = arith.constant 3.200000e+01 : f32
    %204 = vector.broadcast %cst_76 : f32 to vector<8x1xf32>
    %205 = arith.divf %203, %204 : vector<8x1xf32>
    %206 = vector.broadcast %205 : vector<8x1xf32> to vector<8x32xf32>
    %207 = arith.subf %199, %206 : vector<8x32xf32>
    %208 = arith.mulf %207, %207 : vector<8x32xf32>
    %cst_77 = arith.constant dense<0.000000e+00> : vector<8xf32>
    %209 = vector.multi_reduction <add>, %208, %cst_77 [1] : vector<8x32xf32> to vector<8xf32>
    %210 = vector.shape_cast %209 : vector<8xf32> to vector<8x1xf32>
    %cst_78 = arith.constant 3.200000e+01 : f32
    %211 = vector.broadcast %cst_78 : f32 to vector<8x1xf32>
    %212 = arith.divf %210, %211 : vector<8x1xf32>
    %213 = vector.broadcast %205 : vector<8x1xf32> to vector<8x32xf32>
    %214 = arith.subf %199, %213 : vector<8x32xf32>
    %cst_79 = arith.constant 9.99999974E-6 : f32
    %215 = vector.broadcast %cst_79 : f32 to vector<8x1xf32>
    %216 = arith.addf %212, %215 : vector<8x1xf32>
    %217 = math.rsqrt %216 : vector<8x1xf32>
    %218 = vector.broadcast %217 : vector<8x1xf32> to vector<8x32xf32>
    %219 = arith.mulf %214, %218 : vector<8x32xf32>
    %220 = vector.broadcast %200 : vector<1x32xf32> to vector<8x32xf32>
    %221 = arith.mulf %219, %220 : vector<8x32xf32>
    %222 = vector.broadcast %201 : vector<1x32xf32> to vector<8x32xf32>
    %223 = arith.addf %221, %222 : vector<8x32xf32>
    %c0_80 = arith.constant 0 : index
    %c0_81 = arith.constant 0 : index
    %c0_82 = arith.constant 0 : index
    %224 = vector.load %arg23[%c0_80, %c0_81, %c0_82] : memref<1x8x32xf32, #tpu.memory_space<vmem>>, vector<1x8x32xf32>
    %225 = vector.shape_cast %224 : vector<1x8x32xf32> to vector<8x32xf32>
    %226 = vector.shape_cast %223 : vector<8x32xf32> to vector<1x8x32xf32>
    tpu.vector_store %arg23[%c0_80, %c0_81, %c0_82], %226 {strides = array<i32>} : memref<1x8x32xf32, #tpu.memory_space<vmem>>, vector<1x8x32xf32>,
    return
  }
  func.func @transform_0(%arg0: i32) -> (i32, i32, i32) {
    %c0_i32 = arith.constant 0 : i32
    %c0_i32_0 = arith.constant 0 : i32
    %c0_i32_1 = arith.constant 0 : i32
    return %arg0, %c0_i32, %c0_i32_0 : i32, i32, i32
  }
  func.func @transform_1(%arg0: i32) -> (i32, i32, i32) {
    %c0_i32 = arith.constant 0 : i32
    %c0_i32_0 = arith.constant 0 : i32
    %c0_i32_1 = arith.constant 0 : i32
    return %arg0, %c0_i32, %c0_i32_0 : i32, i32, i32
  }
  func.func @transform_2(%arg0: i32) -> (i32, i32) {
    %c0_i32 = arith.constant 0 : i32
    %c0_i32_0 = arith.constant 0 : i32
    %c0_i32_1 = arith.constant 0 : i32
    return %c0_i32, %c0_i32_0 : i32, i32
  }
  func.func @transform_3(%arg0: i32) -> (i32, i32) {
    %c0_i32 = arith.constant 0 : i32
    %c0_i32_0 = arith.constant 0 : i32
    %c0_i32_1 = arith.constant 0 : i32
    return %c0_i32, %c0_i32_0 : i32, i32
  }
  func.func @transform_4(%arg0: i32) -> (i32, i32, i32) {
    %c0_i32 = arith.constant 0 : i32
    %c0_i32_0 = arith.constant 0 : i32
    %c0_i32_1 = arith.constant 0 : i32
    %c0_i32_2 = arith.constant 0 : i32
    return %c0_i32, %c0_i32_0, %c0_i32_1 : i32, i32, i32
  }
  func.func @transform_5(%arg0: i32) -> (i32, i32) {
    %c0_i32 = arith.constant 0 : i32
    %c0_i32_0 = arith.constant 0 : i32
    %c0_i32_1 = arith.constant 0 : i32
    return %c0_i32, %c0_i32_0 : i32, i32
  }
  func.func @transform_6(%arg0: i32) -> (i32, i32) {
    %c0_i32 = arith.constant 0 : i32
    %c0_i32_0 = arith.constant 0 : i32
    %c0_i32_1 = arith.constant 0 : i32
    return %c0_i32, %c0_i32_0 : i32, i32
  }
  func.func @transform_7(%arg0: i32) -> (i32, i32) {
    %c0_i32 = arith.constant 0 : i32
    %c0_i32_0 = arith.constant 0 : i32
    %c0_i32_1 = arith.constant 0 : i32
    return %c0_i32, %c0_i32_0 : i32, i32
  }
  func.func @transform_8(%arg0: i32) -> (i32, i32) {
    %c0_i32 = arith.constant 0 : i32
    %c0_i32_0 = arith.constant 0 : i32
    %c0_i32_1 = arith.constant 0 : i32
    return %c0_i32, %c0_i32_0 : i32, i32
  }
  func.func @transform_9(%arg0: i32) -> (i32, i32) {
    %c0_i32 = arith.constant 0 : i32
    %c0_i32_0 = arith.constant 0 : i32
    %c0_i32_1 = arith.constant 0 : i32
    return %c0_i32, %c0_i32_0 : i32, i32
  }
  func.func @transform_10(%arg0: i32) -> (i32, i32) {
    %c0_i32 = arith.constant 0 : i32
    %c0_i32_0 = arith.constant 0 : i32
    %c0_i32_1 = arith.constant 0 : i32
    return %c0_i32, %c0_i32_0 : i32, i32
  }
  func.func @transform_11(%arg0: i32) -> (i32, i32) {
    %c0_i32 = arith.constant 0 : i32
    %c0_i32_0 = arith.constant 0 : i32
    %c0_i32_1 = arith.constant 0 : i32
    return %c0_i32, %c0_i32_0 : i32, i32
  }
  func.func @transform_12(%arg0: i32) -> (i32, i32, i32) {
    %c0_i32 = arith.constant 0 : i32
    %c0_i32_0 = arith.constant 0 : i32
    %c0_i32_1 = arith.constant 0 : i32
    %c0_i32_2 = arith.constant 0 : i32
    return %c0_i32, %c0_i32_0, %c0_i32_1 : i32, i32, i32
  }
  func.func @transform_13(%arg0: i32) -> (i32, i32) {
    %c0_i32 = arith.constant 0 : i32
    %c0_i32_0 = arith.constant 0 : i32
    %c0_i32_1 = arith.constant 0 : i32
    return %c0_i32, %c0_i32_0 : i32, i32
  }
  func.func @transform_14(%arg0: i32) -> (i32, i32) {
    %c0_i32 = arith.constant 0 : i32
    %c0_i32_0 = arith.constant 0 : i32
    %c0_i32_1 = arith.constant 0 : i32
    return %c0_i32, %c0_i32_0 : i32, i32
  }
  func.func @transform_15(%arg0: i32) -> (i32, i32) {
    %c0_i32 = arith.constant 0 : i32
    %c0_i32_0 = arith.constant 0 : i32
    %c0_i32_1 = arith.constant 0 : i32
    return %c0_i32, %c0_i32_0 : i32, i32
  }
  func.func @transform_16(%arg0: i32) -> (i32, i32) {
    %c0_i32 = arith.constant 0 : i32
    %c0_i32_0 = arith.constant 0 : i32
    %c0_i32_1 = arith.constant 0 : i32
    return %c0_i32, %c0_i32_0 : i32, i32
  }
  func.func @transform_17(%arg0: i32) -> (i32, i32) {
    %c0_i32 = arith.constant 0 : i32
    %c0_i32_0 = arith.constant 0 : i32
    %c0_i32_1 = arith.constant 0 : i32
    return %c0_i32, %c0_i32_0 : i32, i32
  }
  func.func @transform_18(%arg0: i32) -> (i32, i32) {
    %c0_i32 = arith.constant 0 : i32
    %c0_i32_0 = arith.constant 0 : i32
    %c0_i32_1 = arith.constant 0 : i32
    return %c0_i32, %c0_i32_0 : i32, i32
  }
  func.func @transform_19(%arg0: i32) -> (i32, i32) {
    %c0_i32 = arith.constant 0 : i32
    %c0_i32_0 = arith.constant 0 : i32
    %c0_i32_1 = arith.constant 0 : i32
    return %c0_i32, %c0_i32_0 : i32, i32
  }
  func.func @transform_20(%arg0: i32) -> (i32, i32) {
    %c0_i32 = arith.constant 0 : i32
    %c0_i32_0 = arith.constant 0 : i32
    %c0_i32_1 = arith.constant 0 : i32
    return %c0_i32, %c0_i32_0 : i32, i32
  }
  func.func @transform_21(%arg0: i32) -> (i32, i32) {
    %c0_i32 = arith.constant 0 : i32
    %c0_i32_0 = arith.constant 0 : i32
    %c0_i32_1 = arith.constant 0 : i32
    return %c0_i32, %c0_i32_0 : i32, i32
  }
  func.func @transform_22(%arg0: i32) -> (i32, i32, i32) {
    %c0_i32 = arith.constant 0 : i32
    %c0_i32_0 = arith.constant 0 : i32
    %c0_i32_1 = arith.constant 0 : i32
    return %arg0, %c0_i32, %c0_i32_0 : i32, i32, i32
  }
}

</mosaic_0001>

<bundles_post_ra>
// kernel: decoder_forward.5
= control target key start
LH: loop header
LB: loop body
LE: loop exit
PB: predicated region body
PF: predicated region fallthrough
CT: control target
= control target key end

     0   :  { %8 = vsyncpa [#allocation3], 0  ;;  %s227_s0 = inlined_call_operand.vmem [shape: f32[16,32], index: 0, kind: input, shape index: {}]   ;;  %s228_s1 = inlined_call_operand.vmem [shape: f32[1,32], index: 1, kind: input, shape index: {}]   ;;  %s229_s2 = inlined_call_operand.hbm [shape: f32[1,32], index: 2, kind: input, shape index: {}]   ;;  %s230_s3 = inlined_call_operand.hbm [shape: f32[16,32], index: 3, kind: output, shape index: {}]  }
   0x1   :  { %9 = vsyncpa [#allocation4], 0  ;;  %s19_s14 = sshll.u32 %s229_s2, 4  ;;  %s181_s15 = smov [#allocation2]   ;;  %s20_s14 = int_to_ptr.hbm [resolvable:$true] %s19_s14 }
   0x2   :  { %s21_s16 = sshll.u32 %s181_s15, 4  ;;  %s22_s16 = int_to_ptr.vmem [resolvable:$true] %s21_s16 }
   0x3   :  { %24 = dma.hbm_to_vmem [thread:$0]  %s20_s14, 16, %s22_s16, [#allocation3]  }
   0x4   :  { %177 = dma.done.wait [#allocation3], 16  }
   0x5   :  { %178 = vsyncadd [#allocation3], 4294967280  ;;  %vm33_vm0 = vcmask 261120   ;;  %v29_v0 = vld [vmem:[%s227_s0] sm:$0xff]  ;;  %v30_v2 = vld [vmem:[%s227_s0 + $0x8] sm:$0xff]  ;;  %v182_v4 = vmov 32.0  }
   0x6   :  { %v34_v1 = vsel %vm33_vm0, %v29_v0, 0.0  ;;  %v37_v3 = vsel %vm33_vm0, %v30_v2, 0.0  ;;  %123 = vrcp.f32 %v182_v4  ;;  %v121_v35 = vld [vmem:[%s228_s1] ss:$0 sm:$0xff]  ;;  %s183_s21 = smov [#allocation5]   ;;  %s103_s24 = sshll.u32 %s230_s3, 4  ;;  %s104_s24 = int_to_ptr.hbm [resolvable:$true] %s103_s24 }
   0x7   :  { %35 = vadd.xlane.f32.xlu0 %v34_v1  ;;  %v122_v38 = vld [vmem:[#allocation2] ss:$0 sm:$0xff]  ;;  %s101_s22 = sshll.u32 %s183_s21, 4  ;;  %s184_s25 = smov 128   ;;  %s102_s22 = int_to_ptr.vmem [resolvable:$true] %s101_s22 }
   0x8   :  { %s185_s26 = smov 8  }
   0xc   :  { %v124_v5 = vpop.eup %123 }
   0xd   :  { %v41_v6 = vmul.f32 32.0, %v124_v5  ;;  %vm45_vm1 = vweird.f32 %v124_v5 }
   0xf   :  { %38 = vadd.xlane.f32.xlu0 %v37_v3  ;;  %v42_v7 = vsub.f32 1.0, %v41_v6 }
  0x11   :  { %v43_v8 = vmul.f32 %v124_v5, %v42_v7 }
  0x13   :  { %v44_v9 = vadd.f32 %v124_v5, %v43_v8 }
  0x15   :  { %v46_v10 = vsel %vm45_vm1, %v124_v5, %v44_v9 }
  0x7a   :  { %v36_v11 = vpop.xlane.xlu0 %35 }
  0x7b   :  { %v47_v12 = vmul.f32 %v46_v10, %v36_v11 }
  0x7d   :  { %v49_v13 = vsub.f32 %v29_v0, %v47_v12 }
  0x7f   :  { %v51_v14 = vmul.f32 %v49_v13, %v49_v13 }
  0x81   :  { %v53_v15 = vsel %vm33_vm0, %v51_v14, 0.0 }
  0x82   :  { %54 = vadd.xlane.f32.xlu1 %v53_v15  ;;  %v39_v16 = vpop.xlane.xlu0 %38 }
  0x83   :  { %v48_v17 = vmul.f32 %v46_v10, %v39_v16 }
  0x85   :  { %v50_v18 = vsub.f32 %v30_v2, %v48_v17 }
  0x87   :  { %v52_v19 = vmul.f32 %v50_v18, %v50_v18 }
  0x89   :  { %v56_v20 = vsel %vm33_vm0, %v52_v19, 0.0 }
  0x8a   :  { %57 = vadd.xlane.f32.xlu1 %v56_v20 }
  0xf5   :  { %v55_v21 = vpop.xlane.xlu1 %54 }
  0xf6   :  { %v59_v22 = vmul.f32 %v55_v21, %v46_v10 }
  0xf8   :  { %v61_v23 = vadd.f32 1e-05, %v59_v22 }
  0xfa   :  { %125 = vrsqrt.f32 %v61_v23  ;;  %vm69_vm3 = vweird.f32 %v61_v23 }
  0xfd   :  { %v58_v24 = vpop.xlane.xlu1 %57 }
  0xfe   :  { %v60_v25 = vmul.f32 %v58_v24, %v46_v10 }
 0x100   :  { %v126_v26 = vpop.eup %125  ;;  %v62_v27 = vadd.f32 1e-05, %v60_v25 }
 0x101   :  { %v64_v28 = vmul.f32 %v126_v26, %v61_v23  ;;  %vm70_vm2 = vweird.f32 %v126_v26 }
 0x102   :  { %127 = vrsqrt.f32 %v62_v27  ;;  %vm71_vm4 = vmor %vm69_vm3, %vm70_vm2  ;;  %vm79_vm6 = vweird.f32 %v62_v27 }
 0x103   :  { %v65_v29 = vmul.f32 %v126_v26, %v64_v28 }
 0x105   :  { %v66_v30 = vmul.f32 0.5, %v65_v29 }
 0x107   :  { %v67_v31 = vsub.f32 1.5, %v66_v30 }
 0x108   :  { %v128_v32 = vpop.eup %127 }
 0x109   :  { %v68_v33 = vmul.f32 %v126_v26, %v67_v31  ;;  %v74_v34 = vmul.f32 %v128_v32, %v62_v27  ;;  %vm80_vm5 = vweird.f32 %v128_v32 }
 0x10a   :  { %vm81_vm7 = vmor %vm79_vm6, %vm80_vm5 }
 0x10b   :  { %v72_v36 = vsel %vm71_vm4, %v126_v26, %v68_v33  ;;  %v75_v37 = vmul.f32 %v128_v32, %v74_v34 }
 0x10c   :  { %v83_v39 = vmul.f32 %v72_v36, %v49_v13 }
 0x10d   :  { %v76_v40 = vmul.f32 0.5, %v75_v37 }
 0x10e   :  { %v88_v41 = vmul.f32 %v121_v35, %v83_v39 }
 0x10f   :  { %v77_v42 = vsub.f32 1.5, %v76_v40 }
 0x110   :  { %v93_v43 = vadd.f32 %v122_v38, %v88_v41 }
 0x111   :  { %v78_v44 = vmul.f32 %v128_v32, %v77_v42 }
 0x112   :  { %95 = vst.msk [vmem:[#allocation5] sm:$0xff] %vm33_vm0, %v93_v43 }
 0x113   :  { %v82_v45 = vsel %vm81_vm7, %v128_v32, %v78_v44 }
 0x114   :  { %v84_v46 = vmul.f32 %v82_v45, %v50_v18 }
 0x116   :  { %v89_v47 = vmul.f32 %v121_v35, %v84_v46 }
 0x118   :  { %v94_v48 = vadd.f32 %v122_v38, %v89_v47 }
 0x11a   :  { %96 = vst.msk [vmem:[#allocation5 + $0x8] sm:$0xff] %vm33_vm0, %v94_v48 }
 0x11b   :  { %109 = dma.vmem_to_hbm [thread:$0]  %s102_s22, 256, %s104_s24, [#allocation4], %s184_s25, %s184_s25, %s185_s26  }
 0x11c   :  { %179 = dma.done.wait [#allocation4], 256  }
 0x11d   :  { %180 = vsyncadd [#allocation4], 4294967040 }
 0x11e   :  { %114 = vsyncpa [#allocation3], 1 }
 0x11f   :  { %115 = vsyncpa [#allocation4], 1 }

// kernel: decoder_forward.4
= control target key start
LH: loop header
LB: loop body
LE: loop exit
PB: predicated region body
PF: predicated region fallthrough
CT: control target
= control target key end

     0   :  { %s2475_s0 = inlined_call_operand.vmem [shape: f32[2,8,32], index: 0, kind: input, shape index: {}]   ;;  %s2476_s1 = inlined_call_operand.vmem [shape: f32[2,8,32], index: 1, kind: input, shape index: {}]   ;;  %s2477_s2 = inlined_call_operand.vmem [shape: bf16[32,96], index: 2, kind: input, shape index: {}]   ;;  %s2478_s3 = inlined_call_operand.vmem [shape: f32[1,96], index: 3, kind: input, shape index: {}]   ;;  %s2479_s4 = inlined_call_operand.vmem [shape: bf16[4,8,32], index: 4, kind: input, shape index: {}]   ;;  %s2480_s5 = inlined_call_operand.vmem [shape: f32[1,32], index: 5, kind: input, shape index: {}]   ;;  %s2481_s6 = inlined_call_operand.vmem [shape: f32[1,32], index: 6, kind: input, shape index: {}]   ;;  %s2482_s7 = inlined_call_operand.vmem [shape: f32[1,32], index: 7, kind: input, shape index: {}]   ;;  %s2483_s8 = inlined_call_operand.vmem [shape: bf16[32,32], index: 8, kind: input, shape index: {}]   ;;  %s2484_s9 = inlined_call_operand.vmem [shape: f32[1,32], index: 9, kind: input, shape index: {}]   ;;  %s2485_s10 = inlined_call_operand.vmem [shape: bf16[32,64], index: 10, kind: input, shape index: {}]   ;;  %s2486_s11 = inlined_call_operand.vmem [shape: f32[1,64], index: 11, kind: input, shape index: {}]   ;;  %s2487_s12 = inlined_call_operand.vmem [shape: bf16[4,8,32], index: 12, kind: input, shape index: {}]   ;;  %s2488_s13 = inlined_call_operand.vmem [shape: f32[1,32], index: 13, kind: input, shape index: {}]   ;;  %s2489_s14 = inlined_call_operand.vmem [shape: f32[1,32], index: 14, kind: input, shape index: {}]   ;;  %s2490_s15 = inlined_call_operand.vmem [shape: f32[1,32], index: 15, kind: input, shape index: {}]   ;;  %s2491_s16 = inlined_call_operand.vmem [shape: bf16[32,64], index: 16, kind: input, shape index: {}]   ;;  %s2492_s17 = inlined_call_operand.vmem [shape: f32[1,64], index: 17, kind: input, shape index: {}]   ;;  %s2493_s18 = inlined_call_operand.vmem [shape: bf16[64,32], index: 18, kind: input, shape index: {}]   ;;  %s2494_s19 = inlined_call_operand.vmem [shape: f32[1,32], index: 19, kind: input, shape index: {}]   ;;  %s2495_s20 = inlined_call_operand.hbm [shape: f32[1,32], index: 20, kind: input, shape index: {}]   ;;  %s2496_s21 = inlined_call_operand.hbm [shape: f32[1,32], index: 21, kind: input, shape index: {}]   ;;  %s2497_s22 = inlined_call_operand.vmem [shape: f32[2,8,32], index: 22, kind: output, shape index: {}]  }
   0x1   :  { %2504 = sst [smem:[#allocation8_spill]] %s2475_s0 }
   0x2   :  { %2505 = sst [smem:[#allocation9_spill]] %s2476_s1 }
   0x3   :  { %2506 = sst [smem:[#allocation10_spill]] %s2477_s2 }
   0x4   :  { %2507 = sst [smem:[#allocation11_spill]] %s2478_s3 }
   0x5   :  { %2508 = sst [smem:[#allocation12_spill]] %s2479_s4 }
   0x6   :  { %2509 = sst [smem:[#allocation13_spill]] %s2480_s5 }
   0x7   :  { %2510 = sst [smem:[#allocation14_spill]] %s2481_s6 }
   0x8   :  { %27 = vsyncpa [#allocation3], 0 }
   0x9   :  { %28 = vsyncpa [#allocation5], 0  ;;  %s2212_s3 = smov 0  }
   0xa LB: > { %s603_s30 = sshll.u32 %s2495_s20, 4  ;;  %s1822_s4 = sadd.s32 4294967295, %s2087_s3   ;;  %s2087_s3 = sphi %s2212_s3, %s34_s3   ;;  %s604_s30 = int_to_ptr.hbm [resolvable:$true] %s603_s30 }
   0xb   : > { %p1824_p0 = scmp.ge.s32.totalorder %s2087_s3, 1  ;;  %p537_p1 = scmp.lt.s32.totalorder %s2087_s3, 3 }
   0xc   : > { %p1940_p2 = scmp.eq.s32.totalorder %s1822_s4, 0  ;;  %s2089_s23 = smov [#allocation2]  }
   0xd   : > { %p2223_p3 = pnand %p1824_p0, %p537_p1  ;;  %s605_s1 = sshll.u32 %s2089_s23, 4  ;;  %s606_s1 = int_to_ptr.vmem [resolvable:$true] %s605_s1 }
   0xe   : > { %s615_s6 = sshll.u32 %s2496_s21, 4  ;;  %s2090_s25 = smov [#allocation4]   ;;  %s616_s6 = int_to_ptr.hbm [resolvable:$true] %s615_s6 }
   0xf   : > { %p1933_p4 = pneg %p2223_p3  ;;  %s617_s26 = sshll.u32 %s2090_s25, 4  ;;  %s618_s26 = int_to_ptr.vmem [resolvable:$true] %s617_s26 }
  0x10   : > { %644 = sbr.rel (%p2223_p3) target bundleno = 2824 (0xb08), region = 108 }
  0x11   : > { %p1934_p5 = pnand %p1940_p2, %p1933_p4 }
  0x13   : > { %1936 = dma.hbm_to_vmem [thread:$0]  (!%p1934_p5), %s604_s30, 16, %s606_s1, [#allocation3]  }
  0x14   : > { %1939 = dma.hbm_to_vmem [thread:$0]  (!%p1934_p5), %s616_s6, 16, %s618_s26, [#allocation5]  }
  0x15   : > { %2078 = dma.done.wait (%p1940_p2), [#allocation3], 16  }
  0x16   : > { %2080 = vsyncadd (%p1940_p2), [#allocation3], 4294967280 }
  0x17   : > { %2082 = dma.done.wait (%p1940_p2), [#allocation5], 16  }
  0x18   : > { %2084 = vsyncadd (%p1940_p2), [#allocation5], 4294967280  ;;  %p714_p6 = scmp.lt.s32.totalorder %s1822_s4, 1  ;;  %s2512_s29 = sld [smem:[#allocation8_spill]]  ;;  %vm755_vm0 = vcmask 261120   ;;  %vm796_vm1 = vcmask 64512   ;;  %v729_v33 = vlaneseq }
  0x19   : > { %s2513_s1 = sld [smem:[#allocation10_spill]]  ;;  %s2091_s26 = smov 104   ;;  %vm939_vm2 = vcmask 1043456   ;;  %vm1684_vm11 = vcmask 523264  }
  0x1a   : > { %s2522_s4 = smov (!%p714_p6, %s1822_s4), 1  ;;  %s2514_s25 = sld [smem:[#allocation11_spill]]  ;;  %v730_v34 = vshrl.u32 %v729_v33, 7  ;;  %v732_v35 = vand.u32 127, %v729_v33 }
  0x1b   : > { %s2239_s2 = sshll.u32 %s2522_s4, 3  ;;  %s2092_s27 = smov 120  }
  0x1c   : > { %s2502_s28 = smov 112   ;;  %vm733_vm3 = vcmp.le.s32.totalorder %v732_v35, %v730_v34  ;;  %s2515_s5 = sld [smem:[#allocation12_spill]] }
  0x1d   : > { %s2516_s4 = sld [smem:[#allocation13_spill]] }
  0x1e   : > { %s717_s30 = scalar_lea.vmem %s2512_s29, %s2239_s2  ;;  %s2500_s29 = smov 96  }
  0x1f   : > { %v1914_v0 = vld [vmem:[%s2513_s1 + $0x8] sm:$0xff]  ;;  %v1913_v1 = vld [vmem:[%s2513_s1] sm:$0xff] }
  0x20   : > { %v2251_v2 = vld [vmem:[%s717_s30] sm:$0xff]  ;;  %765 = vmatpush.bf16.msra.mxu0 %v1914_v0  ;;  %s2095_s30 = smov 64  }
  0x21   : > { %v734_v3 = vpack.c.bf16 %v2251_v2, %v2251_v2  ;;  %v1960_v4 = vld [vmem:[%s2514_s25] ss:$0 sm:$0xff] }
  0x24   : > { %766 = vmatpush.bf16.msra.mxu0 %v1913_v1 }
  0x27   : > { %1842 = vmatmul.msk.bf16.vlgmr.msra.gmra.mxu0 %vm755_vm0, %v734_v3 }
  0xa4   : > { %v768_v5 = vpop.f32.mrf.mxu0 }
  0xa5   : > { %v769_v6 = vadd.f32 %v1960_v4, %v768_v5 }
  0xa7   : > { %784 = vrot.lane.b32.xlu1 %v769_v6, %s2091_s26  ;;  %778 = vrot.lane.b32.xlu0 %v769_v6, %s2092_s27  ;;  %v787_v20 = vpack.c.bf16 %v769_v6, %v769_v6 }
  0xa9   : > { %v792_v21 = vunpack.c.l.b16 %v787_v20 }
  0xab   : > { %v793_v22 = vpack.c.b16 %v792_v21, %v792_v21  ;;  %v773_v21 = vld [vmem:[%s2515_s5 + $0x4] sm:$0xf] }
  0xac   : > { %v770_v7 = vpop.f32.mrf.mxu0 }
  0xaf   : > { %781 = vrot.lane.b32.xlu0 %v769_v6, %s2502_s28  ;;  %s2519_s28 = sld [smem:[#allocation14_spill]] }
 0x119   : > { %v785_v8 = vpop.permute.xlu1 %784  ;;  %v779_v9 = vpop.permute.xlu0 %778 }
 0x11a   : > { %v790_v10 = vpack.c.bf16 %v785_v8, %v785_v8  ;;  %v788_v11 = vpack.c.bf16 %v779_v9, %v779_v9 }
 0x11c   : > { %v865_v12 = vunpack.c.l.b16 %v790_v10  ;;  %v817_v13 = vunpack.c.l.b16 %v788_v11 }
 0x11e   : > { %v866_v14 = vpack.c.b16 %v865_v12, %v865_v12  ;;  %v818_v15 = vpack.c.b16 %v817_v13, %v817_v13 }
 0x120   : > { %867 = vrot.lane.b32.xlu0 %v866_v14, %s2500_s29  ;;  %819 = vrot.lane.b32.xlu1 %v818_v15, %s2500_s29 }
 0x121   : > { %v782_v16 = vpop.permute.xlu0 %781 }
 0x122   : > { %v789_v17 = vpack.c.bf16 %v782_v16, %v782_v16 }
 0x124   : > { %v841_v18 = vunpack.c.l.b16 %v789_v17 }
 0x126   : > { %v842_v19 = vpack.c.b16 %v841_v18, %v841_v18 }
 0x128   : > { %956 = vrot.lane.b32.xlu0 %v818_v15, %s2095_s30  ;;  %843 = vrot.lane.b32.xlu2 %v842_v19, %s2500_s29 }
 0x130   : > { %794 = vrot.lane.b32.xlu2 %v793_v22, %s2500_s29 }
 0x182   : > { %v844_v23 = vpop.permute.xlu2 %843 }
 0x183   : > { %v849_v24 = vsel %vm796_vm1, %v844_v23, 0  ;;  %v775_v23 = vld [vmem:[%s2515_s5 + $0xc] sm:$0xf] }
 0x184   : > { %858 = vmatpush.bf16.xpose.msra.mxu3 %v849_v24  ;;  %v1092_v24 = vsel %vm939_vm2, %v775_v23, 0  ;;  %v1915_v23 = vld [vmem:[%s2483_s8] sm:$0xff] }
 0x18a   : > { %v795_v25 = vpop.permute.xlu2 %794 }
 0x18b   : > { %1845 = vmatmul.msk.bf16.vlgmr.msra.gmra.mxu3 %vm796_vm1, %v789_v17  ;;  %v801_v26 = vsel %vm796_vm1, %v795_v25, 0 }
 0x18c   : > { %810 = vmatpush.bf16.xpose.msra.mxu1 %v801_v26 }
 0x192   : > { %v820_v27 = vpop.permute.xlu1 %819  ;;  %v868_v28 = vpop.permute.xlu0 %867 }
 0x193   : > { %1843 = vmatmul.msk.bf16.vlgmr.msra.gmra.mxu1 %vm796_vm1, %v787_v20  ;;  %v825_v29 = vsel %vm796_vm1, %v820_v27, 0  ;;  %v873_v30 = vsel %vm796_vm1, %v868_v28, 0 }
 0x194   : > { %834 = vmatpush.bf16.xpose.msra.mxu2 %v825_v29  ;;  %882 = vmatpush.bf16.xpose.msrb.mxu0 %v873_v30  ;;  %v772_v30 = vld [vmem:[%s2515_s5] sm:$0xf] }
 0x19a   : > { %v957_v31 = vpop.permute.xlu0 %956 }
 0x19b   : > { %1844 = vmatmul.msk.bf16.vlgmr.msra.gmra.mxu2 %vm796_vm1, %v788_v11  ;;  %1846 = vmatmul.msk.bf16.vlgmr.msrb.gmra.mxu0 %vm796_vm1, %v790_v10  ;;  %v962_v32 = vsel %vm939_vm2, %v957_v31, 0  ;;  %v1035_v31 = vsel %vm939_vm2, %v772_v30, 0 }
 0x19c   : > { %971 = vmatpush.bf16.msrb.mxu2 %v962_v32 }
 0x20e   : > { %v860_v36 = vpop.f32.mrf.mxu3 }
 0x20f   : > { %v892_v37 = vsel %vm733_vm3, %v860_v36, -1e+30 }
 0x210   : > { %v812_v38 = vpop.f32.mrf.mxu1  ;;  %v900_v39 = vsel %vm796_vm1, %v892_v37, -inf }
 0x211   : > { %v890_v40 = vsel %vm733_vm3, %v812_v38, -1e+30  ;;  %901 = vmax.xlane.f32.xlu2 %v900_v39 }
 0x212   : > { %v894_v41 = vsel %vm796_vm1, %v890_v40, -inf }
 0x213   : > { %895 = vmax.xlane.f32.xlu0 %v894_v41 }
 0x216   : > { %v862_v42 = vpop.f32.mrf.mxu3 }
 0x218   : > { %v814_v43 = vpop.f32.mrf.mxu1  ;;  %v884_v44 = vpop.f32.mrf.mxu0 }
 0x219   : > { %v893_v49 = vsel %vm733_vm3, %v884_v44, -1e+30 }
 0x21a   : > { %v903_v51 = vsel %vm796_vm1, %v893_v49, -inf }
 0x21e   : > { %v836_v45 = vpop.f32.mrf.mxu2 }
 0x21f   : > { %v891_v46 = vsel %vm733_vm3, %v836_v45, -1e+30 }
 0x220   : > { %v886_v47 = vpop.f32.mrf.mxu0  ;;  %v897_v48 = vsel %vm796_vm1, %v891_v46, -inf }
 0x221   : > { %898 = vmax.xlane.f32.xlu1 %v897_v48 }
 0x226   : > { %v838_v50 = vpop.f32.mrf.mxu2 }
 0x227   : > { %998 = vrot.lane.b32.xlu0 %v866_v14, %s2095_s30 }
 0x229   : > { %904 = vmax.xlane.f32.xlu1 %v903_v51  ;;  %977 = vrot.lane.b32.xlu2 %v842_v19, %s2095_s30  ;;  %v774_v19 = vld [vmem:[%s2515_s5 + $0x8] sm:$0xf] }
 0x22a   : > { %v1073_v20 = vsel %vm939_vm2, %v774_v19, 0 }
 0x242   : > { %934 = vrot.lane.b32.xlu1 %v793_v22, %s2095_s30  ;;  %v1054_v22 = vsel %vm939_vm2, %v773_v21, 0  ;;  %s2517_s30 = sld [smem:[#allocation9_spill]] }
 0x243   : > { %1063 = vmatpush.bf16.msra.mxu2 %v1054_v22  ;;  %v1916_v22 = vld [vmem:[%s2483_s8 + $0x8] sm:$0xff] }
 0x248   : > { %s721_s23 = scalar_lea.vmem %s2517_s30, %s2239_s2  ;;  %s2520_s30 = smov 96  }
 0x284   : > { %v902_v52 = vpop.xlane.xlu2 %901 }
 0x285   : > { %v908_v53 = vsub.f32 %v892_v37, %v902_v52 }
 0x286   : > { %v896_v54 = vpop.xlane.xlu0 %895 }
 0x287   : > { %v914_v55 = vmul.f32 1.442695, %v908_v53  ;;  %v906_v56 = vsub.f32 %v890_v40, %v896_v54 }
 0x289   : > { %1973 = vpow2.f32 %v914_v55  ;;  %v910_v57 = vmul.f32 1.442695, %v906_v56 }
 0x28b   : > { %1975 = vpow2.f32 %v910_v57 }
 0x28c   : > { %v978_v58 = vpop.permute.xlu2 %977 }
 0x28d   : > { %v983_v59 = vsel %vm939_vm2, %v978_v58, 0 }
 0x28e   : > { %992 = vmatpush.bf16.msrb.mxu3 %v983_v59 }
 0x28f   : > { %v1974_v60 = vpop.eup %1973 }
 0x290   : > { %v924_v61 = vsel %vm796_vm1, %v1974_v60, 0.0  ;;  %v932_v62 = vpack.c.bf16 %v1974_v60, %v1974_v60 }
 0x291   : > { %v1976_v63 = vpop.eup %1975  ;;  %925 = vadd.xlane.f32.xlu1 %v924_v61 }
 0x292   : > { %1849 = vmatmul.msk.bf16.vlgmr.msrb.gmra.mxu3 %vm796_vm1, %v932_v62  ;;  %v918_v0 = vsel %vm796_vm1, %v1976_v63, 0.0  ;;  %v930_v18 = vpack.c.bf16 %v1976_v63, %v1976_v63  ;;  %v1961_v63 = vld [vmem:[%s2516_s4] ss:$0 sm:$0xff] }
 0x293   : > { %919 = vadd.xlane.f32.xlu0 %v918_v0  ;;  %1082 = vmatpush.bf16.msra.mxu3 %v1073_v20 }
 0x294   : > { %v899_v1 = vpop.xlane.xlu1 %898 }
 0x295   : > { %v907_v3 = vsub.f32 %v891_v46, %v899_v1 }
 0x297   : > { %v912_v4 = vmul.f32 1.442695, %v907_v3 }
 0x299   : > { %1977 = vpow2.f32 %v912_v4  ;;  %v999_v5 = vpop.permute.xlu0 %998 }
 0x29a   : > { %v1004_v6 = vsel %vm939_vm2, %v999_v5, 0 }
 0x29b   : > { %1013 = vmatpush.bf16.msra.mxu0 %v1004_v6 }
 0x29c   : > { %v905_v7 = vpop.xlane.xlu1 %904 }
 0x29d   : > { %v909_v8 = vsub.f32 %v893_v49, %v905_v7  ;;  %v2096_v7 = vmov 32.0  }
 0x29f   : > { %v1978_v9 = vpop.eup %1977  ;;  %v916_v10 = vmul.f32 1.442695, %v909_v8  ;;  %1101 = vmatpush.bf16.msrb.mxu0 %v1092_v24  ;;  %v1918_v8 = vld [vmem:[%s2485_s10 + $0x8] sm:$0xff]  ;;  %v1964_v24 = vld [vmem:[%s2486_s11] ss:$0 sm:$0xff] }
 0x2a0   : > { %v921_v11 = vsel %vm796_vm1, %v1978_v9, 0.0  ;;  %v931_v12 = vpack.c.bf16 %v1978_v9, %v1978_v9  ;;  %v728_v9 = vld [vmem:[%s721_s23] sm:$0xff]  ;;  %s2518_s23 = smov 112  }
 0x2a1   : > { %1979 = vpow2.f32 %v916_v10  ;;  %922 = vadd.xlane.f32.xlu2 %v921_v11  ;;  %v1917_v10 = vld [vmem:[%s2485_s10] sm:$0xff]  ;;  %v1195_v11 = vpack.c.bf16 %v728_v9, %v728_v9 }
 0x2a2   : > { %1848 = vmatmul.msk.bf16.vlgmr.msrb.gmra.mxu2 %vm796_vm1, %v931_v12 }
 0x2a3   : > { %1225 = vmatpush.bf16.msrb.mxu2 %v1918_v8 }
 0x2a7   : > { %v1980_v13 = vpop.eup %1979  ;;  %1226 = vmatpush.bf16.msrb.mxu2 %v1917_v10 }
 0x2a8   : > { %v933_v14 = vpack.c.bf16 %v1980_v13, %v1980_v13  ;;  %v927_v15 = vsel %vm796_vm1, %v1980_v13, 0.0 }
 0x2a9   : > { %928 = vadd.xlane.f32.xlu2 %v927_v15 }
 0x2aa   : > { %1850 = vmatmul.msk.bf16.vlgmr.msra.gmra.mxu0 %vm796_vm1, %v933_v14 }
 0x2b4   : > { %v935_v16 = vpop.permute.xlu1 %934 }
 0x2b5   : > { %v941_v17 = vsel %vm939_vm2, %v935_v16, 0 }
 0x2b6   : > { %950 = vmatpush.bf16.msrb.mxu1 %v941_v17 }
 0x2b9   : > { %1847 = vmatmul.msk.bf16.vlgmr.msrb.gmra.mxu1 %vm796_vm1, %v930_v18 }
 0x2ba   : > { %1044 = vmatpush.bf16.msra.mxu1 %v1035_v31 }
 0x2be   : > { %1188 = vmatpush.bf16.msrb.mxu1 %v1916_v22 }
 0x2c2   : > { %1189 = vmatpush.bf16.msrb.mxu1 %v1915_v23 }
 0x304   : > { %v926_v25 = vpop.xlane.xlu1 %925 }
 0x305   : > { %1981 = vrcp.f32 %v926_v25 }
 0x306   : > { %v920_v43 = vpop.xlane.xlu0 %919 }
 0x30b   : > { %v1982_v27 = vpop.eup %1981 }
 0x314   : > { %v923_v26 = vpop.xlane.xlu2 %922 }
 0x315   : > { %v994_v28 = vpop.f32.mrf.mxu3  ;;  %1983 = vrcp.f32 %v923_v26 }
 0x316   : > { %v1025_v29 = vmul.f32 %v1982_v27, %v994_v28 }
 0x318   : > { %v1029_v32 = vpack.c.bf16 %v1025_v29, %v1025_v29 }
 0x31a   : > { %1853 = vmatmul.msk.bf16.vlgmr.msra.gmra.mxu3 %vm796_vm1, %v1029_v32 }
 0x31b   : > { %v1984_v35 = vpop.eup %1983 }
 0x31c   : > { %v929_v34 = vpop.xlane.xlu2 %928 }
 0x31d   : > { %v996_v33 = vpop.f32.mrf.mxu3  ;;  %1985 = vrcp.f32 %v929_v34 }
 0x31e   : > { %1987 = vrcp.f32 %v920_v43 }
 0x31f   : > { %1989 = vrcp.f32 %v2096_v7 }
 0x323   : > { %v1986_v38 = vpop.eup %1985 }
 0x324   : > { %v1988_v46 = vpop.eup %1987 }
 0x325   : > { %v973_v36 = vpop.f32.mrf.mxu2 }
 0x326   : > { %v1024_v37 = vmul.f32 %v1984_v35, %v973_v36 }
 0x327   : > { %v1015_v39 = vpop.f32.mrf.mxu0 }
 0x328   : > { %v1028_v40 = vpack.c.bf16 %v1024_v37, %v1024_v37  ;;  %v1026_v41 = vmul.f32 %v1986_v38, %v1015_v39  ;;  %v1962_v39 = vld [vmem:[%s2519_s28] ss:$0 sm:$0xff] }
 0x32a   : > { %v1030_v42 = vpack.c.bf16 %v1026_v41, %v1026_v41  ;;  %1852 = vmatmul.msk.bf16.vlgmr.msra.gmra.mxu2 %vm796_vm1, %v1028_v40  ;;  %v1963_v41 = vld [vmem:[%s2482_s7] ss:$0 sm:$0xff] }
 0x32c   : > { %1854 = vmatmul.msk.bf16.vlgmr.msrb.gmra.mxu0 %vm796_vm1, %v1030_v42 }
 0x32d   : > { %v975_v44 = vpop.f32.mrf.mxu2 }
 0x32f   : > { %v1017_v45 = vpop.f32.mrf.mxu0 }
 0x336   : > { %v952_v47 = vpop.f32.mrf.mxu1 }
 0x337   : > { %v1023_v48 = vmul.f32 %v1988_v46, %v952_v47 }
 0x339   : > { %v1027_v49 = vpack.c.bf16 %v1023_v48, %v1023_v48 }
 0x33a   : > { %1872 = vmatmul.msk.bf16.vlgmr.msrb.gmra.mxu2 %vm755_vm0, %v1195_v11 }
 0x33b   : > { %1851 = vmatmul.msk.bf16.vlgmr.msra.gmra.mxu1 %vm796_vm1, %v1027_v49  ;;  %v1965_v49 = vld [vmem:[%s2484_s9] ss:$0 sm:$0xff] }
 0x33e   : > { %v954_v50 = vpop.f32.mrf.mxu1 }
 0x39d   : > { %v1084_v51 = vpop.f32.mrf.mxu3 }
 0x39e   : > { %v1110_v61 = vsel %vm755_vm0, %v1084_v51, 0.0 }
 0x3a5   : > { %v1086_v52 = vpop.f32.mrf.mxu3 }
 0x3a9   : > { %v1103_v53 = vpop.f32.mrf.mxu0 }
 0x3aa   : > { %v1112_v0 = vsel %vm755_vm0, %v1103_v53, 0.0 }
 0x3ad   : > { %v1065_v54 = vpop.f32.mrf.mxu2 }
 0x3ae   : > { %v1108_v58 = vsel %vm755_vm0, %v1065_v54, 0.0 }
 0x3b1   : > { %v1105_v55 = vpop.f32.mrf.mxu0 }
 0x3b5   : > { %v1067_v56 = vpop.f32.mrf.mxu2 }
 0x3b8   : > { %v1046_v57 = vpop.f32.mrf.mxu1 }
 0x3b9   : > { %v1107_v59 = vsel %vm755_vm0, %v1046_v57, 0.0 }
 0x3ba   : > { %v1109_v60 = vadd.f32 %v1108_v58, %v1107_v59 }
 0x3bc   : > { %v1111_v62 = vadd.f32 %v1110_v61, %v1109_v60 }
 0x3bd   : > { %v1228_v25 = vpop.f32.mrf.mxu2 }
 0x3be   : > { %v1113_v1 = vadd.f32 %v1112_v0, %v1111_v62  ;;  %v1229_v28 = vadd.f32 %v1964_v24, %v1228_v25 }
 0x3c0   : > { %v1048_v3 = vpop.f32.mrf.mxu1  ;;  %v1117_v4 = vadd.f32 %v1961_v63, %v1113_v1  ;;  %1258 = vrot.lane.b32.xlu0 %v1229_v28, %s2091_s26  ;;  %v1261_v30 = vpack.c.bf16 %v1229_v28, %v1229_v28 }
 0x3c2   : > { %v1118_v5 = vadd.f32 %v1117_v4, %v2251_v2  ;;  %v1990_v2 = vpop.eup %1989  ;;  %v1269_v31 = vsel %vm796_vm1, %v1261_v30, 0  ;;  %v1382_v53 = vunpack.c.l.b16 %v1261_v30 }
 0x3c3   : > { %v1125_v12 = vmul.f32 32.0, %v1990_v2  ;;  %vm1129_vm4 = vweird.f32 %v1990_v2  ;;  %1278 = vmatpush.bf16.xpose.msrb.mxu3 %v1269_v31 }
 0x3c4   : > { %v1121_v6 = vsel %vm755_vm0, %v1118_v5, 0.0  ;;  %v1383_v55 = vpack.c.b16 %v1382_v53, %v1382_v53  ;;  %v1232_v53 = vld [vmem:[%s2487_s12] sm:$0xf] }
 0x3c5   : > { %1122 = vadd.xlane.f32.xlu2 %v1121_v6  ;;  %v1126_v13 = vsub.f32 1.0, %v1125_v12  ;;  %v1230_v32 = vpop.f32.mrf.mxu2 }
 0x3c7   : > { %v1127_v14 = vmul.f32 %v1990_v2, %v1126_v13 }
 0x3c8   : > { %1255 = vrot.lane.b32.xlu0 %v1229_v28, %s2518_s23 }
 0x3c9   : > { %v1128_v15 = vadd.f32 %v1990_v2, %v1127_v14 }
 0x3cb   : > { %v2338_v16 = vsel %vm1129_vm4, %v1990_v2, %v1128_v15 }
 0x432   : > { %v1259_v46 = vpop.permute.xlu0 %1258 }
 0x433   : > { %v1264_v47 = vpack.c.bf16 %v1259_v46, %v1259_v46 }
 0x435   : > { %v1326_v48 = vsel %vm796_vm1, %v1264_v47, 0 }
 0x436   : > { %1335 = vmatpush.bf16.xpose.msra.mxu2 %v1326_v48 }
 0x438   : > { %v1123_v17 = vpop.xlane.xlu2 %1122 }
 0x439   : > { %v1131_v18 = vmul.f32 %v2338_v16, %v1123_v17 }
 0x43a   : > { %v1256_v59 = vpop.permute.xlu0 %1255 }
 0x43b   : > { %v1132_v19 = vsub.f32 %v1118_v5, %v1131_v18  ;;  %v1263_v60 = vpack.c.bf16 %v1256_v59, %v1256_v59 }
 0x43d   : > { %v1133_v20 = vmul.f32 %v1132_v19, %v1132_v19  ;;  %v1307_v61 = vsel %vm796_vm1, %v1263_v60, 0  ;;  %v1430_v15 = vunpack.c.l.b16 %v1263_v60 }
 0x43e   : > { %1316 = vmatpush.bf16.xpose.msra.mxu1 %v1307_v61 }
 0x43f   : > { %v1134_v21 = vsel %vm755_vm0, %v1133_v20, 0.0  ;;  %v1431_v20 = vpack.c.b16 %v1430_v15, %v1430_v15 }
 0x440   : > { %1135 = vadd.xlane.f32.xlu1 %v1134_v21 }
 0x459   : > { %1252 = vrot.lane.b32.xlu1 %v1229_v28, %s2092_s27 }
 0x4b3   : > { %v1136_v26 = vpop.xlane.xlu1 %1135 }
 0x4b4   : > { %v1137_v27 = vmul.f32 %v1136_v26, %v2338_v16 }
 0x4b6   : > { %v1138_v29 = vadd.f32 1e-05, %v1137_v27 }
 0x4b8   : > { %1991 = vrsqrt.f32 %v1138_v29  ;;  %vm1145_vm6 = vweird.f32 %v1138_v29 }
 0x4be   : > { %v1992_v33 = vpop.eup %1991 }
 0x4bf   : > { %v1140_v34 = vmul.f32 %v1992_v33, %v1138_v29  ;;  %vm1146_vm5 = vweird.f32 %v1992_v33 }
 0x4c0   : > { %vm1147_vm7 = vmor %vm1145_vm6, %vm1146_vm5 }
 0x4c1   : > { %v1141_v35 = vmul.f32 %v1992_v33, %v1140_v34 }
 0x4c3   : > { %v1142_v36 = vmul.f32 0.5, %v1141_v35 }
 0x4c5   : > { %v1143_v37 = vsub.f32 1.5, %v1142_v36 }
 0x4c7   : > { %v1144_v38 = vmul.f32 %v1992_v33, %v1143_v37 }
 0x4c9   : > { %v1148_v40 = vsel %vm1147_vm7, %v1992_v33, %v1144_v38 }
 0x4ca   : > { %v1149_v42 = vmul.f32 %v1148_v40, %v1132_v19  ;;  %v1454_v19 = vunpack.c.l.b16 %v1264_v47 }
 0x4cb   : > { %v1253_v56 = vpop.permute.xlu1 %1252 }
 0x4cc   : > { %v1153_v43 = vmul.f32 %v1962_v39, %v1149_v42  ;;  %v1262_v57 = vpack.c.bf16 %v1253_v56, %v1253_v56  ;;  %v1455_v21 = vpack.c.b16 %v1454_v19, %v1454_v19 }
 0x4ce   : > { %v2362_v44 = vadd.f32 %v1963_v41, %v1153_v43  ;;  %v1288_v58 = vsel %vm796_vm1, %v1262_v57, 0  ;;  %v1406_v28 = vunpack.c.l.b16 %v1262_v57 }
 0x4cf   : > { %1297 = vmatpush.bf16.xpose.msra.mxu0 %v1288_v58 }
 0x4d0   : > { %v1158_v45 = vpack.c.bf16 %v2362_v44, %v2362_v44  ;;  %v1407_v29 = vpack.c.b16 %v1406_v28, %v1406_v28 }
 0x4d2   : > { %1863 = vmatmul.msk.bf16.vlgmr.msrb.gmra.mxu1 %vm755_vm0, %v1158_v45 }
 0x54f   : > { %v1191_v50 = vpop.f32.mrf.mxu1 }
 0x550   : > { %v1192_v51 = vadd.f32 %v1965_v49, %v1191_v50 }
 0x552   : > { %v1247_v52 = vpack.c.bf16 %v1192_v51, %v1192_v51  ;;  %1241 = vrot.lane.b32.xlu0 %v1192_v51, %s2518_s23  ;;  %1244 = vrot.lane.b32.xlu2 %v1192_v51, %s2091_s26 }
 0x554   : > { %1873 = vmatmul.msk.bf16.vlgmr.msrb.gmra.mxu3 %vm796_vm1, %v1247_v52 }
 0x557   : > { %v1193_v54 = vpop.f32.mrf.mxu1 }
 0x558   : > { %v1493_v54 = vsel %vm939_vm2, %v1232_v53, 0 }
 0x55a   : > { %1384 = vrot.lane.b32.xlu0 %v1383_v55, %s2520_s30  ;;  %1238 = vrot.lane.b32.xlu2 %v1192_v51, %s2092_s27 }
 0x5ac   : > { %v1245_v62 = vpop.permute.xlu2 %1244 }
 0x5ad   : > { %v1250_v63 = vpack.c.bf16 %v1245_v62, %v1245_v62 }
 0x5af   : > { %1876 = vmatmul.msk.bf16.vlgmr.msra.gmra.mxu2 %vm796_vm1, %v1250_v63 }
 0x5b4   : > { %v1239_v0 = vpop.permute.xlu2 %1238 }
 0x5b5   : > { %v1248_v1 = vpack.c.bf16 %v1239_v0, %v1239_v0  ;;  %v1235_v0 = vld [vmem:[%s2487_s12 + $0xc] sm:$0xf] }
 0x5b7   : > { %1874 = vmatmul.msk.bf16.vlgmr.msra.gmra.mxu0 %vm796_vm1, %v1248_v1  ;;  %v1550_v1 = vsel %vm939_vm2, %v1235_v0, 0  ;;  %v1968_v0 = vld [vmem:[%s2490_s15] ss:$0 sm:$0xff] }
 0x5c4   : > { %v1242_v3 = vpop.permute.xlu0 %1241 }
 0x5c5   : > { %v1249_v4 = vpack.c.bf16 %v1242_v3, %v1242_v3  ;;  %v1234_v3 = vld [vmem:[%s2487_s12 + $0x8] sm:$0xf] }
 0x5c7   : > { %1875 = vmatmul.msk.bf16.vlgmr.msra.gmra.mxu1 %vm796_vm1, %v1249_v4  ;;  %v1531_v4 = vsel %vm939_vm2, %v1234_v3, 0 }
 0x5cc   : > { %v1385_v5 = vpop.permute.xlu0 %1384 }
 0x5cd   : > { %v1390_v6 = vsel %vm939_vm2, %v1385_v5, 0 }
 0x5ce   : > { %1399 = vmatpush.bf16.msra.mxu3 %v1390_v6  ;;  %v1233_v6 = vld [vmem:[%s2487_s12 + $0x4] sm:$0xf] }
 0x5d2   : > { %1502 = vmatpush.bf16.msrb.mxu3 %v1493_v54  ;;  %v1923_v54 = vld [vmem:[%s2493_s18 + $0x10] sm:$0xff] }
 0x5d7   : > { %v1280_v7 = vpop.f32.mrf.mxu3 }
 0x5d8   : > { %v1341_v8 = vsel %vm796_vm1, %v1280_v7, -inf }
 0x5d9   : > { %1342 = vmax.xlane.f32.xlu1 %v1341_v8 }
 0x5df   : > { %v1282_v9 = vpop.f32.mrf.mxu3 }
 0x632   : > { %v1337_v10 = vpop.f32.mrf.mxu2 }
 0x633   : > { %v1350_v2 = vsel %vm796_vm1, %v1337_v10, -inf }
 0x634   : > { %1351 = vmax.xlane.f32.xlu2 %v1350_v2  ;;  %v1299_v11 = vpop.f32.mrf.mxu0 }
 0x635   : > { %v1344_v12 = vsel %vm796_vm1, %v1299_v11, -inf }
 0x636   : > { %1345 = vmax.xlane.f32.xlu0 %v1344_v12 }
 0x63a   : > { %v1339_v13 = vpop.f32.mrf.mxu2 }
 0x63c   : > { %v1301_v14 = vpop.f32.mrf.mxu0 }
 0x644   : > { %v1318_v17 = vpop.f32.mrf.mxu1 }
 0x645   : > { %v1347_v18 = vsel %vm796_vm1, %v1318_v17, -inf }
 0x646   : > { %1348 = vmax.xlane.f32.xlu1 %v1347_v18 }
 0x64a   : > { %1432 = vrot.lane.b32.xlu0 %v1431_v20, %s2520_s30 }
 0x64c   : > { %v1320_v22 = vpop.f32.mrf.mxu1  ;;  %1456 = vrot.lane.b32.xlu2 %v1455_v21, %s2520_s30  ;;  %v1343_v23 = vpop.xlane.xlu1 %1342 }
 0x64d   : > { %v1353_v24 = vsub.f32 %v1280_v7, %v1343_v23  ;;  %v1512_v7 = vsel %vm939_vm2, %v1233_v6, 0  ;;  %v1922_v6 = vld [vmem:[%s2493_s18 + $0x8] sm:$0xff] }
 0x64f   : > { %v1357_v25 = vmul.f32 1.442695, %v1353_v24 }
 0x651   : > { %1993 = vpow2.f32 %v1357_v25 }
 0x657   : > { %v1994_v26 = vpop.eup %1993 }
 0x658   : > { %v1377_v27 = vpack.c.bf16 %v1994_v26, %v1994_v26  ;;  %v1365_v30 = vsel %vm796_vm1, %v1994_v26, 0.0 }
 0x65a   : > { %1877 = vmatmul.msk.bf16.vlgmr.msra.gmra.mxu3 %vm796_vm1, %v1377_v27 }
 0x65f   : > { %1408 = vrot.lane.b32.xlu1 %v1407_v29, %s2520_s30  ;;  %s725_s30 = scalar_lea.vmem %s2497_s22, %s2239_s2 }
 0x675   : > { %1366 = vadd.xlane.f32.xlu2 %v1365_v30 }
 0x6a7   : > { %v1352_v31 = vpop.xlane.xlu2 %1351 }
 0x6a8   : > { %v1356_v32 = vsub.f32 %v1337_v10, %v1352_v31 }
 0x6a9   : > { %v1346_v33 = vpop.xlane.xlu0 %1345 }
 0x6aa   : > { %v1363_v34 = vmul.f32 1.442695, %v1356_v32  ;;  %v1354_v35 = vsub.f32 %v1299_v11, %v1346_v33 }
 0x6ac   : > { %1995 = vpow2.f32 %v1363_v34  ;;  %v1359_v36 = vmul.f32 1.442695, %v1354_v35 }
 0x6ae   : > { %1997 = vpow2.f32 %v1359_v36 }
 0x6af   : > { %v1457_v37 = vpop.permute.xlu2 %1456 }
 0x6b0   : > { %v1462_v38 = vsel %vm939_vm2, %v1457_v37, 0  ;;  %v1966_v37 = vld [vmem:[%s2488_s13] ss:$0 sm:$0xff] }
 0x6b1   : > { %1471 = vmatpush.bf16.msrb.mxu2 %v1462_v38 }
 0x6b2   : > { %v1996_v39 = vpop.eup %1995 }
 0x6b3   : > { %v1380_v40 = vpack.c.bf16 %v1996_v39, %v1996_v39  ;;  %v1374_v41 = vsel %vm796_vm1, %v1996_v39, 0.0 }
 0x6b4   : > { %v1998_v42 = vpop.eup %1997  ;;  %1375 = vadd.xlane.f32.xlu1 %v1374_v41 }
 0x6b5   : > { %1880 = vmatmul.msk.bf16.vlgmr.msrb.gmra.mxu2 %vm796_vm1, %v1380_v40  ;;  %v1368_v43 = vsel %vm796_vm1, %v1998_v42, 0.0  ;;  %v1378_v57 = vpack.c.bf16 %v1998_v42, %v1998_v42 }
 0x6b6   : > { %1369 = vadd.xlane.f32.xlu0 %v1368_v43  ;;  %1559 = vmatpush.bf16.msra.mxu2 %v1550_v1 }
 0x6b9   : > { %v1349_v45 = vpop.xlane.xlu1 %1348 }
 0x6ba   : > { %v1355_v46 = vsub.f32 %v1318_v17, %v1349_v45 }
 0x6bc   : > { %v1361_v47 = vmul.f32 1.442695, %v1355_v46  ;;  %v1433_v48 = vpop.permute.xlu0 %1432 }
 0x6bd   : > { %v1438_v49 = vsel %vm939_vm2, %v1433_v48, 0 }
 0x6be   : > { %1999 = vpow2.f32 %v1361_v47  ;;  %1447 = vmatpush.bf16.msrb.mxu1 %v1438_v49 }
 0x6c2   : > { %1540 = vmatpush.bf16.msra.mxu1 %v1531_v4 }
 0x6c4   : > { %v2000_v50 = vpop.eup %1999 }
 0x6c5   : > { %v1379_v51 = vpack.c.bf16 %v2000_v50, %v2000_v50  ;;  %v1371_v52 = vsel %vm796_vm1, %v2000_v50, 0.0  ;;  %v1920_v50 = vld [vmem:[%s2491_s16 + $0x8] sm:$0xff] }
 0x6c6   : > { %1372 = vadd.xlane.f32.xlu2 %v1371_v52  ;;  %1639 = vmatpush.bf16.msra.mxu3 %v1920_v50 }
 0x6c7   : > { %1879 = vmatmul.msk.bf16.vlgmr.msrb.gmra.mxu1 %vm796_vm1, %v1379_v51  ;;  %v1924_v51 = vld [vmem:[%s2493_s18 + $0x18] sm:$0xff] }
 0x6d1   : > { %v1409_v55 = vpop.permute.xlu1 %1408 }
 0x6d2   : > { %v1414_v56 = vsel %vm939_vm2, %v1409_v55, 0 }
 0x6d3   : > { %1423 = vmatpush.bf16.msrb.mxu0 %v1414_v56 }
 0x6d6   : > { %1878 = vmatmul.msk.bf16.vlgmr.msrb.gmra.mxu0 %vm796_vm1, %v1378_v57 }
 0x6d7   : > { %1521 = vmatpush.bf16.msra.mxu0 %v1512_v7  ;;  %v1921_v7 = vld [vmem:[%s2493_s18] sm:$0xff] }
 0x6db   : > { %1692 = vmatpush.bf16.msrb.mxu0 %v1924_v51 }
 0x6dd   : > { %v1401_v58 = vpop.f32.mrf.mxu3 }
 0x6df   : > { %1693 = vmatpush.bf16.msrb.mxu0 %v1923_v54 }
 0x6e3   : > { %1694 = vmatpush.bf16.msrb.mxu0 %v1922_v6 }
 0x6e5   : > { %v1403_v59 = vpop.f32.mrf.mxu3 }
 0x6e7   : > { %1695 = vmatpush.bf16.msrb.mxu0 %v1921_v7 }
 0x6e8   : > { %v1367_v60 = vpop.xlane.xlu2 %1366 }
 0x6e9   : > { %2001 = vrcp.f32 %v1367_v60 }
 0x6ef   : > { %v2002_v61 = vpop.eup %2001 }
 0x6f0   : > { %v1481_v62 = vmul.f32 %v2002_v61, %v1401_v58 }
 0x6f2   : > { %v1485_v63 = vpack.c.bf16 %v1481_v62, %v1481_v62  ;;  %v1967_v62 = vld [vmem:[%s2489_s14] ss:$0 sm:$0xff] }
 0x6f4   : > { %1881 = vmatmul.msk.bf16.vlgmr.msrb.gmra.mxu3 %vm796_vm1, %v1485_v63 }
 0x727   : > { %v1376_v5 = vpop.xlane.xlu1 %1375 }
 0x728   : > { %2003 = vrcp.f32 %v1376_v5 }
 0x729   : > { %v1370_v18 = vpop.xlane.xlu0 %1369 }
 0x72e   : > { %v2004_v8 = vpop.eup %2003 }
 0x738   : > { %v1473_v9 = vpop.f32.mrf.mxu2 }
 0x739   : > { %v1484_v10 = vmul.f32 %v2004_v8, %v1473_v9  ;;  %v1373_v11 = vpop.xlane.xlu2 %1372  ;;  %v1969_v8 = vld [vmem:[%s2492_s17] ss:$0 sm:$0xff] }
 0x73a   : > { %2005 = vrcp.f32 %v1373_v11 }
 0x73b   : > { %v1488_v2 = vpack.c.bf16 %v1484_v10, %v1484_v10  ;;  %2007 = vrcp.f32 %v1370_v18 }
 0x73d   : > { %1884 = vmatmul.msk.bf16.vlgmr.msra.gmra.mxu2 %vm796_vm1, %v1488_v2 }
 0x740   : > { %v1475_v12 = vpop.f32.mrf.mxu2  ;;  %v2006_v13 = vpop.eup %2005 }
 0x741   : > { %v2008_v20 = vpop.eup %2007 }
 0x744   : > { %v1449_v14 = vpop.f32.mrf.mxu1 }
 0x745   : > { %v1483_v15 = vmul.f32 %v2006_v13, %v1449_v14  ;;  %v1970_v13 = vld [vmem:[%s2494_s19] ss:$0 sm:$0xff] }
 0x747   : > { %v1487_v17 = vpack.c.bf16 %v1483_v15, %v1483_v15 }
 0x749   : > { %1883 = vmatmul.msk.bf16.vlgmr.msra.gmra.mxu1 %vm796_vm1, %v1487_v17 }
 0x74c   : > { %v1451_v19 = vpop.f32.mrf.mxu1 }
 0x753   : > { %v1425_v21 = vpop.f32.mrf.mxu0 }
 0x754   : > { %v1482_v22 = vmul.f32 %v2008_v20, %v1425_v21 }
 0x756   : > { %v1486_v23 = vpack.c.bf16 %v1482_v22, %v1482_v22 }
 0x758   : > { %1882 = vmatmul.msk.bf16.vlgmr.msra.gmra.mxu0 %vm796_vm1, %v1486_v23 }
 0x75b   : > { %v1427_v24 = vpop.f32.mrf.mxu0 }
 0x777   : > { %v1504_v25 = vpop.f32.mrf.mxu3 }
 0x778   : > { %v1565_v32 = vsel %vm755_vm0, %v1504_v25, 0.0 }
 0x77f   : > { %v1506_v26 = vpop.f32.mrf.mxu3 }
 0x7c0   : > { %v1561_v27 = vpop.f32.mrf.mxu2 }
 0x7c1   : > { %v1570_v38 = vsel %vm755_vm0, %v1561_v27, 0.0 }
 0x7c6   : > { %v1542_v28 = vpop.f32.mrf.mxu1 }
 0x7c7   : > { %v1568_v35 = vsel %vm755_vm0, %v1542_v28, 0.0 }
 0x7c8   : > { %v1563_v29 = vpop.f32.mrf.mxu2 }
 0x7ce   : > { %v1544_v30 = vpop.f32.mrf.mxu1 }
 0x7d5   : > { %v1523_v31 = vpop.f32.mrf.mxu0 }
 0x7d6   : > { %v1566_v33 = vsel %vm755_vm0, %v1523_v31, 0.0 }
 0x7d7   : > { %v1567_v34 = vadd.f32 %v1566_v33, %v1565_v32 }
 0x7d9   : > { %v1569_v36 = vadd.f32 %v1568_v35, %v1567_v34  ;;  %v1971_v34 = vld [vmem:[#allocation2] ss:$0 sm:$0xff] }
 0x7db   : > { %v1571_v39 = vadd.f32 %v1570_v38, %v1569_v36  ;;  %v1972_v36 = vld [vmem:[#allocation4] ss:$0 sm:$0xff] }
 0x7dd   : > { %v1525_v40 = vpop.f32.mrf.mxu0  ;;  %v1575_v41 = vadd.f32 %v1966_v37, %v1571_v39 }
 0x7df   : > { %v1576_v42 = vadd.f32 %v1575_v41, %v2362_v44  ;;  %v1919_v44 = vld [vmem:[%s2491_s16] sm:$0xff] }
 0x7e0   : > { %1640 = vmatpush.bf16.msra.mxu3 %v1919_v44 }
 0x7e1   : > { %v1579_v43 = vsel %vm755_vm0, %v1576_v42, 0.0 }
 0x7e2   : > { %1580 = vadd.xlane.f32.xlu1 %v1579_v43 }
 0x855   : > { %v1581_v45 = vpop.xlane.xlu1 %1580 }
 0x856   : > { %v1582_v46 = vmul.f32 %v1581_v45, %v2338_v16 }
 0x858   : > { %v1583_v47 = vsub.f32 %v1576_v42, %v1582_v46 }
 0x85a   : > { %v1584_v48 = vmul.f32 %v1583_v47, %v1583_v47 }
 0x85c   : > { %v1585_v49 = vsel %vm755_vm0, %v1584_v48, 0.0 }
 0x85d   : > { %1586 = vadd.xlane.f32.xlu0 %v1585_v49 }
 0x8d0   : > { %v1587_v52 = vpop.xlane.xlu0 %1586 }
 0x8d1   : > { %v1588_v53 = vmul.f32 %v1587_v52, %v2338_v16 }
 0x8d3   : > { %v1589_v55 = vadd.f32 1e-05, %v1588_v53 }
 0x8d5   : > { %2009 = vrsqrt.f32 %v1589_v55  ;;  %vm1596_vm9 = vweird.f32 %v1589_v55 }
 0x8db   : > { %v2010_v56 = vpop.eup %2009 }
 0x8dc   : > { %v1591_v57 = vmul.f32 %v2010_v56, %v1589_v55  ;;  %vm1597_vm8 = vweird.f32 %v2010_v56 }
 0x8dd   : > { %vm1598_vm10 = vmor %vm1596_vm9, %vm1597_vm8 }
 0x8de   : > { %v1592_v58 = vmul.f32 %v2010_v56, %v1591_v57 }
 0x8e0   : > { %v1593_v59 = vmul.f32 0.5, %v1592_v58 }
 0x8e2   : > { %v1594_v60 = vsub.f32 1.5, %v1593_v59 }
 0x8e4   : > { %v1595_v61 = vmul.f32 %v2010_v56, %v1594_v60 }
 0x8e6   : > { %v1599_v63 = vsel %vm1598_vm10, %v2010_v56, %v1595_v61 }
 0x8e7   : > { %v1600_v1 = vmul.f32 %v1599_v63, %v1583_v47 }
 0x8e9   : > { %v1604_v3 = vmul.f32 %v1967_v62, %v1600_v1 }
 0x8eb   : > { %v1608_v4 = vadd.f32 %v1968_v0, %v1604_v3 }
 0x8ed   : > { %v1609_v5 = vpack.c.bf16 %v1608_v4, %v1608_v4 }
 0x8ef   : > { %1893 = vmatmul.msk.bf16.vlgmr.msra.gmra.mxu3 %vm755_vm0, %v1609_v5 }
 0x972   : > { %v1642_v9 = vpop.f32.mrf.mxu3 }
 0x973   : > { %v1643_v10 = vadd.f32 %v1969_v8, %v1642_v9 }
 0x975   : > { %v1646_v2 = vmax.f32 %v1643_v10, 0.0 }
 0x977   : > { %v1647_v11 = vpack.c.bf16 %v1646_v2, %v1646_v2 }
 0x979   : > { %1910 = vmatmul.msk.bf16.vlgmr.msrb.gmra.mxu0 %vm1684_vm11, %v1647_v11 }
 0x97a   : > { %v1644_v12 = vpop.f32.mrf.mxu3 }
 0x9f6   : > { %v1697_v14 = vpop.f32.mrf.mxu0 }
 0x9f7   : > { %v1698_v15 = vadd.f32 %v1970_v13, %v1697_v14 }
 0x9f9   : > { %v1701_v17 = vadd.f32 %v1698_v15, %v1608_v4 }
 0x9fb   : > { %v1704_v18 = vsel %vm755_vm0, %v1701_v17, 0.0 }
 0x9fc   : > { %1705 = vadd.xlane.f32.xlu2 %v1704_v18 }
 0x9fe   : > { %v1699_v19 = vpop.f32.mrf.mxu0 }
 0xa6f   : > { %v1706_v20 = vpop.xlane.xlu2 %1705 }
 0xa70   : > { %v1707_v21 = vmul.f32 %v1706_v20, %v2338_v16 }
 0xa72   : > { %v1708_v22 = vsub.f32 %v1701_v17, %v1707_v21 }
 0xa74   : > { %v1709_v23 = vmul.f32 %v1708_v22, %v1708_v22 }
 0xa76   : > { %v1710_v24 = vsel %vm755_vm0, %v1709_v23, 0.0 }
 0xa77   : > { %1711 = vadd.xlane.f32.xlu1 %v1710_v24 }
 0xaea   : > { %v1712_v25 = vpop.xlane.xlu1 %1711 }
 0xaeb   : > { %v1713_v26 = vmul.f32 %v1712_v25, %v2338_v16 }
 0xaed   : > { %v1714_v27 = vadd.f32 1e-05, %v1713_v26 }
 0xaef   : > { %2011 = vrsqrt.f32 %v1714_v27  ;;  %vm1721_vm13 = vweird.f32 %v1714_v27 }
 0xaf5   : > { %v2012_v28 = vpop.eup %2011 }
 0xaf6   : > { %v1716_v29 = vmul.f32 %v2012_v28, %v1714_v27  ;;  %vm1722_vm12 = vweird.f32 %v2012_v28 }
 0xaf7   : > { %vm1723_vm14 = vmor %vm1721_vm13, %vm1722_vm12 }
 0xaf8   : > { %v1717_v30 = vmul.f32 %v2012_v28, %v1716_v29 }
 0xafa   : > { %v1718_v31 = vmul.f32 0.5, %v1717_v30 }
 0xafc   : > { %v1719_v32 = vsub.f32 1.5, %v1718_v31 }
 0xafe   : > { %v1720_v33 = vmul.f32 %v2012_v28, %v1719_v32 }
 0xb00   : > { %v1724_v35 = vsel %vm1723_vm14, %v2012_v28, %v1720_v33 }
 0xb01   : > { %v1725_v37 = vmul.f32 %v1724_v35, %v1708_v22 }
 0xb03   : > { %v1729_v38 = vmul.f32 %v1971_v34, %v1725_v37 }
 0xb05   : > { %v1733_v16 = vadd.f32 %v1972_v36, %v1729_v38 }
 0xb07   : > { %1734 = vst.msk [vmem:[%s725_s30] sm:$0xff] %vm755_vm0, %v1733_v16 }
 0xb08 PF: > { %s34_s3 = sadd.s32 1, %s2087_s3  }
 0xb09   : > { %p31_p7 = scmp.ge.s32.totalorder %s34_s3, 4  }
 0xb0b   :  { %33 = sbr.rel (!%p31_p7) target bundleno = 10 (0xa), region = 150 }
 0xb10   :  { %1754 = vsyncpa [#allocation3], 1 }
 0xb11   :  { %1756 = vsyncpa [#allocation3 + $0x1], 1 }
 0xb12   :  { %1757 = vsyncpa [#allocation5], 1 }

// kernel: decoder_forward.3
= control target key start
LH: loop header
LB: loop body
LE: loop exit
PB: predicated region body
PF: predicated region fallthrough
CT: control target
= control target key end

     0   :  { %s2315_s0 = inlined_call_operand.vmem [shape: f32[2,8,32], index: 0, kind: input, shape index: {}]   ;;  %s2316_s1 = inlined_call_operand.vmem [shape: f32[2,8,32], index: 1, kind: input, shape index: {}]   ;;  %s2317_s2 = inlined_call_operand.vmem [shape: bf16[32,96], index: 2, kind: input, shape index: {}]   ;;  %s2318_s3 = inlined_call_operand.vmem [shape: f32[1,96], index: 3, kind: input, shape index: {}]   ;;  %s2319_s4 = inlined_call_operand.vmem [shape: bf16[4,8,32], index: 4, kind: input, shape index: {}]   ;;  %s2320_s5 = inlined_call_operand.vmem [shape: f32[1,32], index: 5, kind: input, shape index: {}]   ;;  %s2321_s6 = inlined_call_operand.vmem [shape: f32[1,32], index: 6, kind: input, shape index: {}]   ;;  %s2322_s7 = inlined_call_operand.vmem [shape: f32[1,32], index: 7, kind: input, shape index: {}]   ;;  %s2323_s8 = inlined_call_operand.vmem [shape: bf16[32,32], index: 8, kind: input, shape index: {}]   ;;  %s2324_s9 = inlined_call_operand.vmem [shape: f32[1,32], index: 9, kind: input, shape index: {}]   ;;  %s2325_s10 = inlined_call_operand.vmem [shape: bf16[32,64], index: 10, kind: input, shape index: {}]   ;;  %s2326_s11 = inlined_call_operand.vmem [shape: f32[1,64], index: 11, kind: input, shape index: {}]   ;;  %s2327_s12 = inlined_call_operand.vmem [shape: bf16[4,8,32], index: 12, kind: input, shape index: {}]   ;;  %s2328_s13 = inlined_call_operand.vmem [shape: f32[1,32], index: 13, kind: input, shape index: {}]   ;;  %s2329_s14 = inlined_call_operand.vmem [shape: f32[1,32], index: 14, kind: input, shape index: {}]   ;;  %s2330_s15 = inlined_call_operand.vmem [shape: f32[1,32], index: 15, kind: input, shape index: {}]   ;;  %s2331_s16 = inlined_call_operand.vmem [shape: bf16[32,64], index: 16, kind: input, shape index: {}]   ;;  %s2332_s17 = inlined_call_operand.vmem [shape: f32[1,64], index: 17, kind: input, shape index: {}]   ;;  %s2333_s18 = inlined_call_operand.vmem [shape: bf16[64,32], index: 18, kind: input, shape index: {}]   ;;  %s2334_s19 = inlined_call_operand.vmem [shape: f32[1,32], index: 19, kind: input, shape index: {}]   ;;  %s2335_s20 = inlined_call_operand.vmem [shape: f32[1,32], index: 20, kind: input, shape index: {}]   ;;  %s2336_s21 = inlined_call_operand.vmem [shape: f32[1,32], index: 21, kind: input, shape index: {}]   ;;  %s2337_s22 = inlined_call_operand.vmem [shape: f32[2,8,32], index: 22, kind: output, shape index: {}]  }
   0x1   :  { %2344 = sst [smem:[#allocation2_spill]] %s2315_s0 }
   0x2   :  { %2345 = sst [smem:[#allocation3_spill]] %s2316_s1 }
   0x3   :  { %2346 = sst [smem:[#allocation4_spill]] %s2317_s2 }
   0x4   :  { %2347 = sst [smem:[#allocation5_spill]] %s2318_s3  ;;  %s2065_s3 = smov 0  }
   0x5   :  { %2348 = sst [smem:[#allocation6_spill]] %s2319_s4 }
   0x6   :  { %2349 = sst [smem:[#allocation7_spill]] %s2320_s5 }
   0x7   :  { %2350 = sst [smem:[#allocation8_spill]] %s2321_s6 }
   0x8 LB: > { %s1770_s28 = sadd.s32 4294967295, %s1942_s3   ;;  %p1774_p0 = scmp.ge.s32.totalorder %s1942_s3, 1  ;;  %s1942_s3 = sphi %s2065_s3, %s32_s3  }
   0x9   : > { %p620_p1 = scmp.lt.s32.totalorder %s1942_s3, 3 }
   0xb   : > { %p621_p2 = pnand %p1774_p0, %p620_p1 }
   0xc   : > { %s2351_s4 = sld [smem:[#allocation4_spill]] (!%p621_p2)  ;;  %p684_p3 = scmp.lt.s32.totalorder (!%p621_p2), %s1770_s28, 1 }
   0xd   : > { %624 = sbr.rel (%p621_p2) target bundleno = 2811 (0xafb), region = 108  ;;  %s2352_s6 = sld [smem:[#allocation2_spill]] (!%p621_p2) }
   0xe   : > { %s2353_s27 = sld [smem:[#allocation5_spill]] (!%p621_p2)  ;;  %s1945_s29 = smov (!%p621_p2), 120  }
   0xf   : > { %s2342_s30 = smov (!%p621_p2), 112   ;;  %s2340_s0 = smov (!%p621_p2), 96  }
  0x10   : > { %s1948_s23 = smov (!%p621_p2), 64   ;;  %s2355_s26 = sld [smem:[#allocation7_spill]] (!%p621_p2) }
  0x12   : > { %v1858_v0 = vld [vmem:[%s2351_s4 + $0x8] sm:$0xff]  ;;  %v1857_v1 = vld [vmem:[%s2351_s4] sm:$0xff]  ;;  %s2361_s28 = smov (!%p684_p3, %s1770_s28), 1  ;;  %vm725_vm0 = vcmask 261120   ;;  %vm766_vm1 = vcmask 64512   ;;  %vm909_vm2 = vcmask 1043456   ;;  %v699_v33 = vlaneseq }
  0x13   : > { %735 = vmatpush.bf16.msra.mxu0 %v1858_v0  ;;  %s2079_s1 = sshll.u32 %s2361_s28, 3  ;;  %s1944_s28 = smov 104   ;;  %vm1654_vm11 = vcmask 523264  }
  0x14   : > { %s687_s25 = scalar_lea.vmem %s2352_s6, %s2079_s1  ;;  %v1883_v4 = vld [vmem:[%s2353_s27] ss:$0 sm:$0xff]  ;;  %v700_v34 = vshrl.u32 %v699_v33, 7  ;;  %v702_v35 = vand.u32 127, %v699_v33  ;;  %s2354_s6 = sld [smem:[#allocation6_spill]] }
  0x15   : > { %v2085_v2 = vld [vmem:[%s687_s25] sm:$0xff]  ;;  %s695_s24 = scalar_lea.vmem %s2337_s22, %s2079_s1 }
  0x16   : > { %v704_v3 = vpack.c.bf16 %v2085_v2, %v2085_v2  ;;  %vm703_vm3 = vcmp.le.s32.totalorder %v702_v35, %v700_v34 }
  0x17   : > { %736 = vmatpush.bf16.msra.mxu0 %v1857_v1 }
  0x1a   : > { %1786 = vmatmul.msk.bf16.vlgmr.msra.gmra.mxu0 %vm725_vm0, %v704_v3 }
  0x97   : > { %v738_v5 = vpop.f32.mrf.mxu0 }
  0x98   : > { %v739_v6 = vadd.f32 %v1883_v4, %v738_v5 }
  0x9a   : > { %754 = vrot.lane.b32.xlu1 %v739_v6, %s1944_s28  ;;  %748 = vrot.lane.b32.xlu0 %v739_v6, %s1945_s29  ;;  %v757_v20 = vpack.c.bf16 %v739_v6, %v739_v6 }
  0x9c   : > { %v762_v21 = vunpack.c.l.b16 %v757_v20 }
  0x9e   : > { %v763_v22 = vpack.c.b16 %v762_v21, %v762_v21  ;;  %v743_v21 = vld [vmem:[%s2354_s6 + $0x4] sm:$0xf] }
  0x9f   : > { %v740_v7 = vpop.f32.mrf.mxu0 }
  0xa2   : > { %751 = vrot.lane.b32.xlu0 %v739_v6, %s2342_s30  ;;  %s2358_s30 = sld [smem:[#allocation8_spill]] }
 0x10c   : > { %v755_v8 = vpop.permute.xlu1 %754  ;;  %v749_v9 = vpop.permute.xlu0 %748 }
 0x10d   : > { %v760_v10 = vpack.c.bf16 %v755_v8, %v755_v8  ;;  %v758_v11 = vpack.c.bf16 %v749_v9, %v749_v9 }
 0x10f   : > { %v835_v12 = vunpack.c.l.b16 %v760_v10  ;;  %v787_v13 = vunpack.c.l.b16 %v758_v11 }
 0x111   : > { %v836_v14 = vpack.c.b16 %v835_v12, %v835_v12  ;;  %v788_v15 = vpack.c.b16 %v787_v13, %v787_v13 }
 0x113   : > { %837 = vrot.lane.b32.xlu0 %v836_v14, %s2340_s0  ;;  %789 = vrot.lane.b32.xlu1 %v788_v15, %s2340_s0 }
 0x114   : > { %v752_v16 = vpop.permute.xlu0 %751 }
 0x115   : > { %v759_v17 = vpack.c.bf16 %v752_v16, %v752_v16 }
 0x117   : > { %v811_v18 = vunpack.c.l.b16 %v759_v17 }
 0x119   : > { %v812_v19 = vpack.c.b16 %v811_v18, %v811_v18 }
 0x11b   : > { %926 = vrot.lane.b32.xlu0 %v788_v15, %s1948_s23  ;;  %813 = vrot.lane.b32.xlu2 %v812_v19, %s2340_s0 }
 0x123   : > { %764 = vrot.lane.b32.xlu2 %v763_v22, %s2340_s0 }
 0x175   : > { %v814_v23 = vpop.permute.xlu2 %813 }
 0x176   : > { %v819_v24 = vsel %vm766_vm1, %v814_v23, 0  ;;  %v745_v23 = vld [vmem:[%s2354_s6 + $0xc] sm:$0xf] }
 0x177   : > { %828 = vmatpush.bf16.xpose.msra.mxu3 %v819_v24  ;;  %v1062_v24 = vsel %vm909_vm2, %v745_v23, 0  ;;  %v1859_v23 = vld [vmem:[%s2323_s8] sm:$0xff] }
 0x17d   : > { %v765_v25 = vpop.permute.xlu2 %764 }
 0x17e   : > { %1789 = vmatmul.msk.bf16.vlgmr.msra.gmra.mxu3 %vm766_vm1, %v759_v17  ;;  %v771_v26 = vsel %vm766_vm1, %v765_v25, 0 }
 0x17f   : > { %780 = vmatpush.bf16.xpose.msra.mxu1 %v771_v26 }
 0x185   : > { %v790_v27 = vpop.permute.xlu1 %789  ;;  %v838_v28 = vpop.permute.xlu0 %837 }
 0x186   : > { %1787 = vmatmul.msk.bf16.vlgmr.msra.gmra.mxu1 %vm766_vm1, %v757_v20  ;;  %v795_v29 = vsel %vm766_vm1, %v790_v27, 0  ;;  %v843_v30 = vsel %vm766_vm1, %v838_v28, 0 }
 0x187   : > { %804 = vmatpush.bf16.xpose.msra.mxu2 %v795_v29  ;;  %852 = vmatpush.bf16.xpose.msrb.mxu0 %v843_v30  ;;  %v742_v30 = vld [vmem:[%s2354_s6] sm:$0xf] }
 0x18d   : > { %v927_v31 = vpop.permute.xlu0 %926 }
 0x18e   : > { %1788 = vmatmul.msk.bf16.vlgmr.msra.gmra.mxu2 %vm766_vm1, %v758_v11  ;;  %1790 = vmatmul.msk.bf16.vlgmr.msrb.gmra.mxu0 %vm766_vm1, %v760_v10  ;;  %v932_v32 = vsel %vm909_vm2, %v927_v31, 0  ;;  %v1005_v31 = vsel %vm909_vm2, %v742_v30, 0 }
 0x18f   : > { %941 = vmatpush.bf16.msrb.mxu2 %v932_v32 }
 0x201   : > { %v830_v36 = vpop.f32.mrf.mxu3 }
 0x202   : > { %v862_v37 = vsel %vm703_vm3, %v830_v36, -1e+30 }
 0x203   : > { %v782_v38 = vpop.f32.mrf.mxu1  ;;  %v870_v39 = vsel %vm766_vm1, %v862_v37, -inf }
 0x204   : > { %v860_v40 = vsel %vm703_vm3, %v782_v38, -1e+30  ;;  %871 = vmax.xlane.f32.xlu2 %v870_v39 }
 0x205   : > { %v864_v41 = vsel %vm766_vm1, %v860_v40, -inf }
 0x206   : > { %865 = vmax.xlane.f32.xlu0 %v864_v41 }
 0x209   : > { %v832_v42 = vpop.f32.mrf.mxu3 }
 0x20b   : > { %v784_v43 = vpop.f32.mrf.mxu1  ;;  %v854_v44 = vpop.f32.mrf.mxu0 }
 0x20c   : > { %v863_v49 = vsel %vm703_vm3, %v854_v44, -1e+30 }
 0x20d   : > { %v873_v51 = vsel %vm766_vm1, %v863_v49, -inf }
 0x211   : > { %v806_v45 = vpop.f32.mrf.mxu2 }
 0x212   : > { %v861_v46 = vsel %vm703_vm3, %v806_v45, -1e+30 }
 0x213   : > { %v856_v47 = vpop.f32.mrf.mxu0  ;;  %v867_v48 = vsel %vm766_vm1, %v861_v46, -inf }
 0x214   : > { %868 = vmax.xlane.f32.xlu1 %v867_v48 }
 0x219   : > { %v808_v50 = vpop.f32.mrf.mxu2 }
 0x21a   : > { %968 = vrot.lane.b32.xlu0 %v836_v14, %s1948_s23 }
 0x21c   : > { %874 = vmax.xlane.f32.xlu1 %v873_v51  ;;  %947 = vrot.lane.b32.xlu2 %v812_v19, %s1948_s23  ;;  %v744_v19 = vld [vmem:[%s2354_s6 + $0x8] sm:$0xf] }
 0x21d   : > { %v1043_v20 = vsel %vm909_vm2, %v744_v19, 0 }
 0x235   : > { %904 = vrot.lane.b32.xlu1 %v763_v22, %s1948_s23  ;;  %v1024_v22 = vsel %vm909_vm2, %v743_v21, 0  ;;  %s2356_s23 = sld [smem:[#allocation3_spill]] }
 0x236   : > { %1033 = vmatpush.bf16.msra.mxu2 %v1024_v22  ;;  %v1860_v22 = vld [vmem:[%s2323_s8 + $0x8] sm:$0xff] }
 0x23b   : > { %s691_s5 = scalar_lea.vmem %s2356_s23, %s2079_s1  ;;  %s2359_s23 = smov 96  }
 0x277   : > { %v872_v52 = vpop.xlane.xlu2 %871 }
 0x278   : > { %v878_v53 = vsub.f32 %v862_v37, %v872_v52 }
 0x279   : > { %v866_v54 = vpop.xlane.xlu0 %865 }
 0x27a   : > { %v884_v55 = vmul.f32 1.442695, %v878_v53  ;;  %v876_v56 = vsub.f32 %v860_v40, %v866_v54 }
 0x27c   : > { %1896 = vpow2.f32 %v884_v55  ;;  %v880_v57 = vmul.f32 1.442695, %v876_v56 }
 0x27e   : > { %1898 = vpow2.f32 %v880_v57 }
 0x27f   : > { %v948_v58 = vpop.permute.xlu2 %947 }
 0x280   : > { %v953_v59 = vsel %vm909_vm2, %v948_v58, 0 }
 0x281   : > { %962 = vmatpush.bf16.msrb.mxu3 %v953_v59 }
 0x282   : > { %v1897_v60 = vpop.eup %1896 }
 0x283   : > { %v894_v61 = vsel %vm766_vm1, %v1897_v60, 0.0  ;;  %v902_v62 = vpack.c.bf16 %v1897_v60, %v1897_v60 }
 0x284   : > { %v1899_v63 = vpop.eup %1898  ;;  %895 = vadd.xlane.f32.xlu1 %v894_v61 }
 0x285   : > { %1793 = vmatmul.msk.bf16.vlgmr.msrb.gmra.mxu3 %vm766_vm1, %v902_v62  ;;  %v888_v0 = vsel %vm766_vm1, %v1899_v63, 0.0  ;;  %v900_v18 = vpack.c.bf16 %v1899_v63, %v1899_v63  ;;  %v1884_v63 = vld [vmem:[%s2355_s26] ss:$0 sm:$0xff] }
 0x286   : > { %889 = vadd.xlane.f32.xlu0 %v888_v0  ;;  %1052 = vmatpush.bf16.msra.mxu3 %v1043_v20 }
 0x287   : > { %v869_v1 = vpop.xlane.xlu1 %868 }
 0x288   : > { %v877_v3 = vsub.f32 %v861_v46, %v869_v1 }
 0x28a   : > { %v882_v4 = vmul.f32 1.442695, %v877_v3 }
 0x28c   : > { %1900 = vpow2.f32 %v882_v4  ;;  %v969_v5 = vpop.permute.xlu0 %968 }
 0x28d   : > { %v974_v6 = vsel %vm909_vm2, %v969_v5, 0 }
 0x28e   : > { %983 = vmatpush.bf16.msra.mxu0 %v974_v6 }
 0x28f   : > { %v875_v7 = vpop.xlane.xlu1 %874 }
 0x290   : > { %v879_v8 = vsub.f32 %v863_v49, %v875_v7  ;;  %v1949_v7 = vmov 32.0  }
 0x292   : > { %v1901_v9 = vpop.eup %1900  ;;  %v886_v10 = vmul.f32 1.442695, %v879_v8  ;;  %1071 = vmatpush.bf16.msrb.mxu0 %v1062_v24  ;;  %v1862_v8 = vld [vmem:[%s2325_s10 + $0x8] sm:$0xff]  ;;  %v1887_v24 = vld [vmem:[%s2326_s11] ss:$0 sm:$0xff] }
 0x293   : > { %v891_v11 = vsel %vm766_vm1, %v1901_v9, 0.0  ;;  %v901_v12 = vpack.c.bf16 %v1901_v9, %v1901_v9  ;;  %v698_v9 = vld [vmem:[%s691_s5] sm:$0xff]  ;;  %s2357_s5 = smov 112  }
 0x294   : > { %1902 = vpow2.f32 %v886_v10  ;;  %892 = vadd.xlane.f32.xlu2 %v891_v11  ;;  %v1861_v10 = vld [vmem:[%s2325_s10] sm:$0xff]  ;;  %v1165_v11 = vpack.c.bf16 %v698_v9, %v698_v9 }
 0x295   : > { %1792 = vmatmul.msk.bf16.vlgmr.msrb.gmra.mxu2 %vm766_vm1, %v901_v12 }
 0x296   : > { %1195 = vmatpush.bf16.msrb.mxu2 %v1862_v8 }
 0x29a   : > { %v1903_v13 = vpop.eup %1902  ;;  %1196 = vmatpush.bf16.msrb.mxu2 %v1861_v10 }
 0x29b   : > { %v903_v14 = vpack.c.bf16 %v1903_v13, %v1903_v13  ;;  %v897_v15 = vsel %vm766_vm1, %v1903_v13, 0.0 }
 0x29c   : > { %898 = vadd.xlane.f32.xlu2 %v897_v15 }
 0x29d   : > { %1794 = vmatmul.msk.bf16.vlgmr.msra.gmra.mxu0 %vm766_vm1, %v903_v14 }
 0x2a7   : > { %v905_v16 = vpop.permute.xlu1 %904 }
 0x2a8   : > { %v911_v17 = vsel %vm909_vm2, %v905_v16, 0 }
 0x2a9   : > { %920 = vmatpush.bf16.msrb.mxu1 %v911_v17 }
 0x2ac   : > { %1791 = vmatmul.msk.bf16.vlgmr.msrb.gmra.mxu1 %vm766_vm1, %v900_v18 }
 0x2ad   : > { %1014 = vmatpush.bf16.msra.mxu1 %v1005_v31 }
 0x2b1   : > { %1158 = vmatpush.bf16.msrb.mxu1 %v1860_v22 }
 0x2b5   : > { %1159 = vmatpush.bf16.msrb.mxu1 %v1859_v23 }
 0x2f7   : > { %v896_v25 = vpop.xlane.xlu1 %895 }
 0x2f8   : > { %1904 = vrcp.f32 %v896_v25 }
 0x2f9   : > { %v890_v43 = vpop.xlane.xlu0 %889 }
 0x2fe   : > { %v1905_v27 = vpop.eup %1904 }
 0x307   : > { %v893_v26 = vpop.xlane.xlu2 %892 }
 0x308   : > { %v964_v28 = vpop.f32.mrf.mxu3  ;;  %1906 = vrcp.f32 %v893_v26 }
 0x309   : > { %v995_v29 = vmul.f32 %v1905_v27, %v964_v28 }
 0x30b   : > { %v999_v32 = vpack.c.bf16 %v995_v29, %v995_v29 }
 0x30d   : > { %1797 = vmatmul.msk.bf16.vlgmr.msra.gmra.mxu3 %vm766_vm1, %v999_v32 }
 0x30e   : > { %v1907_v35 = vpop.eup %1906 }
 0x30f   : > { %v899_v34 = vpop.xlane.xlu2 %898 }
 0x310   : > { %v966_v33 = vpop.f32.mrf.mxu3  ;;  %1908 = vrcp.f32 %v899_v34 }
 0x311   : > { %1910 = vrcp.f32 %v890_v43 }
 0x312   : > { %1912 = vrcp.f32 %v1949_v7 }
 0x316   : > { %v1909_v38 = vpop.eup %1908 }
 0x317   : > { %v1911_v46 = vpop.eup %1910 }
 0x318   : > { %v943_v36 = vpop.f32.mrf.mxu2 }
 0x319   : > { %v994_v37 = vmul.f32 %v1907_v35, %v943_v36 }
 0x31a   : > { %v985_v39 = vpop.f32.mrf.mxu0 }
 0x31b   : > { %v998_v40 = vpack.c.bf16 %v994_v37, %v994_v37  ;;  %v996_v41 = vmul.f32 %v1909_v38, %v985_v39  ;;  %v1885_v39 = vld [vmem:[%s2358_s30] ss:$0 sm:$0xff] }
 0x31d   : > { %v1000_v42 = vpack.c.bf16 %v996_v41, %v996_v41  ;;  %1796 = vmatmul.msk.bf16.vlgmr.msra.gmra.mxu2 %vm766_vm1, %v998_v40  ;;  %v1886_v41 = vld [vmem:[%s2322_s7] ss:$0 sm:$0xff] }
 0x31f   : > { %1798 = vmatmul.msk.bf16.vlgmr.msrb.gmra.mxu0 %vm766_vm1, %v1000_v42 }
 0x320   : > { %v945_v44 = vpop.f32.mrf.mxu2 }
 0x322   : > { %v987_v45 = vpop.f32.mrf.mxu0 }
 0x329   : > { %v922_v47 = vpop.f32.mrf.mxu1 }
 0x32a   : > { %v993_v48 = vmul.f32 %v1911_v46, %v922_v47 }
 0x32c   : > { %v997_v49 = vpack.c.bf16 %v993_v48, %v993_v48 }
 0x32d   : > { %1816 = vmatmul.msk.bf16.vlgmr.msrb.gmra.mxu2 %vm725_vm0, %v1165_v11 }
 0x32e   : > { %1795 = vmatmul.msk.bf16.vlgmr.msra.gmra.mxu1 %vm766_vm1, %v997_v49  ;;  %v1888_v49 = vld [vmem:[%s2324_s9] ss:$0 sm:$0xff] }
 0x331   : > { %v924_v50 = vpop.f32.mrf.mxu1 }
 0x390   : > { %v1054_v51 = vpop.f32.mrf.mxu3 }
 0x391   : > { %v1080_v61 = vsel %vm725_vm0, %v1054_v51, 0.0 }
 0x398   : > { %v1056_v52 = vpop.f32.mrf.mxu3 }
 0x39c   : > { %v1073_v53 = vpop.f32.mrf.mxu0 }
 0x39d   : > { %v1082_v0 = vsel %vm725_vm0, %v1073_v53, 0.0 }
 0x3a0   : > { %v1035_v54 = vpop.f32.mrf.mxu2 }
 0x3a1   : > { %v1078_v58 = vsel %vm725_vm0, %v1035_v54, 0.0 }
 0x3a4   : > { %v1075_v55 = vpop.f32.mrf.mxu0 }
 0x3a8   : > { %v1037_v56 = vpop.f32.mrf.mxu2 }
 0x3ab   : > { %v1016_v57 = vpop.f32.mrf.mxu1 }
 0x3ac   : > { %v1077_v59 = vsel %vm725_vm0, %v1016_v57, 0.0 }
 0x3ad   : > { %v1079_v60 = vadd.f32 %v1078_v58, %v1077_v59 }
 0x3af   : > { %v1081_v62 = vadd.f32 %v1080_v61, %v1079_v60 }
 0x3b0   : > { %v1198_v25 = vpop.f32.mrf.mxu2 }
 0x3b1   : > { %v1083_v1 = vadd.f32 %v1082_v0, %v1081_v62  ;;  %v1199_v28 = vadd.f32 %v1887_v24, %v1198_v25 }
 0x3b3   : > { %v1018_v3 = vpop.f32.mrf.mxu1  ;;  %v1087_v4 = vadd.f32 %v1884_v63, %v1083_v1  ;;  %1228 = vrot.lane.b32.xlu0 %v1199_v28, %s1944_s28  ;;  %v1231_v30 = vpack.c.bf16 %v1199_v28, %v1199_v28 }
 0x3b5   : > { %v1088_v5 = vadd.f32 %v1087_v4, %v2085_v2  ;;  %v1913_v2 = vpop.eup %1912  ;;  %v1239_v31 = vsel %vm766_vm1, %v1231_v30, 0  ;;  %v1352_v53 = vunpack.c.l.b16 %v1231_v30 }
 0x3b6   : > { %v1095_v12 = vmul.f32 32.0, %v1913_v2  ;;  %vm1099_vm4 = vweird.f32 %v1913_v2  ;;  %1248 = vmatpush.bf16.xpose.msrb.mxu3 %v1239_v31 }
 0x3b7   : > { %v1091_v6 = vsel %vm725_vm0, %v1088_v5, 0.0  ;;  %v1353_v55 = vpack.c.b16 %v1352_v53, %v1352_v53  ;;  %v1202_v53 = vld [vmem:[%s2327_s12] sm:$0xf] }
 0x3b8   : > { %1092 = vadd.xlane.f32.xlu2 %v1091_v6  ;;  %v1096_v13 = vsub.f32 1.0, %v1095_v12  ;;  %v1200_v32 = vpop.f32.mrf.mxu2 }
 0x3ba   : > { %v1097_v14 = vmul.f32 %v1913_v2, %v1096_v13 }
 0x3bb   : > { %1225 = vrot.lane.b32.xlu0 %v1199_v28, %s2357_s5 }
 0x3bc   : > { %v1098_v15 = vadd.f32 %v1913_v2, %v1097_v14 }
 0x3be   : > { %v2172_v16 = vsel %vm1099_vm4, %v1913_v2, %v1098_v15 }
 0x425   : > { %v1229_v46 = vpop.permute.xlu0 %1228 }
 0x426   : > { %v1234_v47 = vpack.c.bf16 %v1229_v46, %v1229_v46 }
 0x428   : > { %v1296_v48 = vsel %vm766_vm1, %v1234_v47, 0 }
 0x429   : > { %1305 = vmatpush.bf16.xpose.msra.mxu2 %v1296_v48 }
 0x42b   : > { %v1093_v17 = vpop.xlane.xlu2 %1092 }
 0x42c   : > { %v1101_v18 = vmul.f32 %v2172_v16, %v1093_v17 }
 0x42d   : > { %v1226_v59 = vpop.permute.xlu0 %1225 }
 0x42e   : > { %v1102_v19 = vsub.f32 %v1088_v5, %v1101_v18  ;;  %v1233_v60 = vpack.c.bf16 %v1226_v59, %v1226_v59 }
 0x430   : > { %v1103_v20 = vmul.f32 %v1102_v19, %v1102_v19  ;;  %v1277_v61 = vsel %vm766_vm1, %v1233_v60, 0  ;;  %v1400_v15 = vunpack.c.l.b16 %v1233_v60 }
 0x431   : > { %1286 = vmatpush.bf16.xpose.msra.mxu1 %v1277_v61 }
 0x432   : > { %v1104_v21 = vsel %vm725_vm0, %v1103_v20, 0.0  ;;  %v1401_v20 = vpack.c.b16 %v1400_v15, %v1400_v15 }
 0x433   : > { %1105 = vadd.xlane.f32.xlu1 %v1104_v21 }
 0x44c   : > { %1222 = vrot.lane.b32.xlu1 %v1199_v28, %s1945_s29 }
 0x4a6   : > { %v1106_v26 = vpop.xlane.xlu1 %1105 }
 0x4a7   : > { %v1107_v27 = vmul.f32 %v1106_v26, %v2172_v16 }
 0x4a9   : > { %v1108_v29 = vadd.f32 1e-05, %v1107_v27 }
 0x4ab   : > { %1914 = vrsqrt.f32 %v1108_v29  ;;  %vm1115_vm6 = vweird.f32 %v1108_v29 }
 0x4b1   : > { %v1915_v33 = vpop.eup %1914 }
 0x4b2   : > { %v1110_v34 = vmul.f32 %v1915_v33, %v1108_v29  ;;  %vm1116_vm5 = vweird.f32 %v1915_v33 }
 0x4b3   : > { %vm1117_vm7 = vmor %vm1115_vm6, %vm1116_vm5 }
 0x4b4   : > { %v1111_v35 = vmul.f32 %v1915_v33, %v1110_v34 }
 0x4b6   : > { %v1112_v36 = vmul.f32 0.5, %v1111_v35 }
 0x4b8   : > { %v1113_v37 = vsub.f32 1.5, %v1112_v36 }
 0x4ba   : > { %v1114_v38 = vmul.f32 %v1915_v33, %v1113_v37 }
 0x4bc   : > { %v1118_v40 = vsel %vm1117_vm7, %v1915_v33, %v1114_v38 }
 0x4bd   : > { %v1119_v42 = vmul.f32 %v1118_v40, %v1102_v19  ;;  %v1424_v19 = vunpack.c.l.b16 %v1234_v47 }
 0x4be   : > { %v1223_v56 = vpop.permute.xlu1 %1222 }
 0x4bf   : > { %v1123_v43 = vmul.f32 %v1885_v39, %v1119_v42  ;;  %v1232_v57 = vpack.c.bf16 %v1223_v56, %v1223_v56  ;;  %v1425_v21 = vpack.c.b16 %v1424_v19, %v1424_v19 }
 0x4c1   : > { %v2196_v44 = vadd.f32 %v1886_v41, %v1123_v43  ;;  %v1258_v58 = vsel %vm766_vm1, %v1232_v57, 0  ;;  %v1376_v28 = vunpack.c.l.b16 %v1232_v57 }
 0x4c2   : > { %1267 = vmatpush.bf16.xpose.msra.mxu0 %v1258_v58 }
 0x4c3   : > { %v1128_v45 = vpack.c.bf16 %v2196_v44, %v2196_v44  ;;  %v1377_v29 = vpack.c.b16 %v1376_v28, %v1376_v28 }
 0x4c5   : > { %1807 = vmatmul.msk.bf16.vlgmr.msrb.gmra.mxu1 %vm725_vm0, %v1128_v45 }
 0x542   : > { %v1161_v50 = vpop.f32.mrf.mxu1 }
 0x543   : > { %v1162_v51 = vadd.f32 %v1888_v49, %v1161_v50 }
 0x545   : > { %v1217_v52 = vpack.c.bf16 %v1162_v51, %v1162_v51  ;;  %1211 = vrot.lane.b32.xlu0 %v1162_v51, %s2357_s5  ;;  %1214 = vrot.lane.b32.xlu2 %v1162_v51, %s1944_s28 }
 0x547   : > { %1817 = vmatmul.msk.bf16.vlgmr.msrb.gmra.mxu3 %vm766_vm1, %v1217_v52 }
 0x54a   : > { %v1163_v54 = vpop.f32.mrf.mxu1 }
 0x54b   : > { %v1463_v54 = vsel %vm909_vm2, %v1202_v53, 0 }
 0x54d   : > { %1354 = vrot.lane.b32.xlu0 %v1353_v55, %s2359_s23  ;;  %1208 = vrot.lane.b32.xlu2 %v1162_v51, %s1945_s29 }
 0x59f   : > { %v1215_v62 = vpop.permute.xlu2 %1214 }
 0x5a0   : > { %v1220_v63 = vpack.c.bf16 %v1215_v62, %v1215_v62 }
 0x5a2   : > { %1820 = vmatmul.msk.bf16.vlgmr.msra.gmra.mxu2 %vm766_vm1, %v1220_v63 }
 0x5a7   : > { %v1209_v0 = vpop.permute.xlu2 %1208 }
 0x5a8   : > { %v1218_v1 = vpack.c.bf16 %v1209_v0, %v1209_v0  ;;  %v1205_v0 = vld [vmem:[%s2327_s12 + $0xc] sm:$0xf] }
 0x5aa   : > { %1818 = vmatmul.msk.bf16.vlgmr.msra.gmra.mxu0 %vm766_vm1, %v1218_v1  ;;  %v1520_v1 = vsel %vm909_vm2, %v1205_v0, 0  ;;  %v1891_v0 = vld [vmem:[%s2330_s15] ss:$0 sm:$0xff] }
 0x5b7   : > { %v1212_v3 = vpop.permute.xlu0 %1211 }
 0x5b8   : > { %v1219_v4 = vpack.c.bf16 %v1212_v3, %v1212_v3  ;;  %v1204_v3 = vld [vmem:[%s2327_s12 + $0x8] sm:$0xf] }
 0x5ba   : > { %1819 = vmatmul.msk.bf16.vlgmr.msra.gmra.mxu1 %vm766_vm1, %v1219_v4  ;;  %v1501_v4 = vsel %vm909_vm2, %v1204_v3, 0 }
 0x5bf   : > { %v1355_v5 = vpop.permute.xlu0 %1354 }
 0x5c0   : > { %v1360_v6 = vsel %vm909_vm2, %v1355_v5, 0 }
 0x5c1   : > { %1369 = vmatpush.bf16.msra.mxu3 %v1360_v6  ;;  %v1203_v6 = vld [vmem:[%s2327_s12 + $0x4] sm:$0xf] }
 0x5c5   : > { %1472 = vmatpush.bf16.msrb.mxu3 %v1463_v54  ;;  %v1867_v54 = vld [vmem:[%s2333_s18 + $0x10] sm:$0xff] }
 0x5ca   : > { %v1250_v7 = vpop.f32.mrf.mxu3 }
 0x5cb   : > { %v1311_v8 = vsel %vm766_vm1, %v1250_v7, -inf }
 0x5cc   : > { %1312 = vmax.xlane.f32.xlu1 %v1311_v8 }
 0x5d2   : > { %v1252_v9 = vpop.f32.mrf.mxu3 }
 0x625   : > { %v1307_v10 = vpop.f32.mrf.mxu2 }
 0x626   : > { %v1320_v2 = vsel %vm766_vm1, %v1307_v10, -inf }
 0x627   : > { %1321 = vmax.xlane.f32.xlu2 %v1320_v2  ;;  %v1269_v11 = vpop.f32.mrf.mxu0 }
 0x628   : > { %v1314_v12 = vsel %vm766_vm1, %v1269_v11, -inf }
 0x629   : > { %1315 = vmax.xlane.f32.xlu0 %v1314_v12 }
 0x62d   : > { %v1309_v13 = vpop.f32.mrf.mxu2 }
 0x62f   : > { %v1271_v14 = vpop.f32.mrf.mxu0 }
 0x637   : > { %v1288_v17 = vpop.f32.mrf.mxu1 }
 0x638   : > { %v1317_v18 = vsel %vm766_vm1, %v1288_v17, -inf }
 0x639   : > { %1318 = vmax.xlane.f32.xlu1 %v1317_v18 }
 0x63d   : > { %1402 = vrot.lane.b32.xlu0 %v1401_v20, %s2359_s23 }
 0x63f   : > { %v1290_v22 = vpop.f32.mrf.mxu1  ;;  %1426 = vrot.lane.b32.xlu2 %v1425_v21, %s2359_s23  ;;  %v1313_v23 = vpop.xlane.xlu1 %1312 }
 0x640   : > { %v1323_v24 = vsub.f32 %v1250_v7, %v1313_v23  ;;  %v1482_v7 = vsel %vm909_vm2, %v1203_v6, 0  ;;  %v1866_v6 = vld [vmem:[%s2333_s18 + $0x8] sm:$0xff] }
 0x642   : > { %v1327_v25 = vmul.f32 1.442695, %v1323_v24 }
 0x644   : > { %1916 = vpow2.f32 %v1327_v25 }
 0x64a   : > { %v1917_v26 = vpop.eup %1916 }
 0x64b   : > { %v1347_v27 = vpack.c.bf16 %v1917_v26, %v1917_v26  ;;  %v1335_v30 = vsel %vm766_vm1, %v1917_v26, 0.0 }
 0x64d   : > { %1821 = vmatmul.msk.bf16.vlgmr.msra.gmra.mxu3 %vm766_vm1, %v1347_v27 }
 0x652   : > { %1378 = vrot.lane.b32.xlu1 %v1377_v29, %s2359_s23 }
 0x668   : > { %1336 = vadd.xlane.f32.xlu2 %v1335_v30 }
 0x69a   : > { %v1322_v31 = vpop.xlane.xlu2 %1321 }
 0x69b   : > { %v1326_v32 = vsub.f32 %v1307_v10, %v1322_v31 }
 0x69c   : > { %v1316_v33 = vpop.xlane.xlu0 %1315 }
 0x69d   : > { %v1333_v34 = vmul.f32 1.442695, %v1326_v32  ;;  %v1324_v35 = vsub.f32 %v1269_v11, %v1316_v33 }
 0x69f   : > { %1918 = vpow2.f32 %v1333_v34  ;;  %v1329_v36 = vmul.f32 1.442695, %v1324_v35 }
 0x6a1   : > { %1920 = vpow2.f32 %v1329_v36 }
 0x6a2   : > { %v1427_v37 = vpop.permute.xlu2 %1426 }
 0x6a3   : > { %v1432_v38 = vsel %vm909_vm2, %v1427_v37, 0  ;;  %v1889_v37 = vld [vmem:[%s2328_s13] ss:$0 sm:$0xff] }
 0x6a4   : > { %1441 = vmatpush.bf16.msrb.mxu2 %v1432_v38 }
 0x6a5   : > { %v1919_v39 = vpop.eup %1918 }
 0x6a6   : > { %v1350_v40 = vpack.c.bf16 %v1919_v39, %v1919_v39  ;;  %v1344_v41 = vsel %vm766_vm1, %v1919_v39, 0.0 }
 0x6a7   : > { %v1921_v42 = vpop.eup %1920  ;;  %1345 = vadd.xlane.f32.xlu1 %v1344_v41 }
 0x6a8   : > { %1824 = vmatmul.msk.bf16.vlgmr.msrb.gmra.mxu2 %vm766_vm1, %v1350_v40  ;;  %v1338_v43 = vsel %vm766_vm1, %v1921_v42, 0.0  ;;  %v1348_v57 = vpack.c.bf16 %v1921_v42, %v1921_v42 }
 0x6a9   : > { %1339 = vadd.xlane.f32.xlu0 %v1338_v43  ;;  %1529 = vmatpush.bf16.msra.mxu2 %v1520_v1 }
 0x6ac   : > { %v1319_v45 = vpop.xlane.xlu1 %1318 }
 0x6ad   : > { %v1325_v46 = vsub.f32 %v1288_v17, %v1319_v45 }
 0x6af   : > { %v1331_v47 = vmul.f32 1.442695, %v1325_v46  ;;  %v1403_v48 = vpop.permute.xlu0 %1402 }
 0x6b0   : > { %v1408_v49 = vsel %vm909_vm2, %v1403_v48, 0 }
 0x6b1   : > { %1922 = vpow2.f32 %v1331_v47  ;;  %1417 = vmatpush.bf16.msrb.mxu1 %v1408_v49 }
 0x6b5   : > { %1510 = vmatpush.bf16.msra.mxu1 %v1501_v4 }
 0x6b7   : > { %v1923_v50 = vpop.eup %1922 }
 0x6b8   : > { %v1349_v51 = vpack.c.bf16 %v1923_v50, %v1923_v50  ;;  %v1341_v52 = vsel %vm766_vm1, %v1923_v50, 0.0  ;;  %v1864_v50 = vld [vmem:[%s2331_s16 + $0x8] sm:$0xff] }
 0x6b9   : > { %1342 = vadd.xlane.f32.xlu2 %v1341_v52  ;;  %1609 = vmatpush.bf16.msra.mxu3 %v1864_v50 }
 0x6ba   : > { %1823 = vmatmul.msk.bf16.vlgmr.msrb.gmra.mxu1 %vm766_vm1, %v1349_v51  ;;  %v1868_v51 = vld [vmem:[%s2333_s18 + $0x18] sm:$0xff] }
 0x6c4   : > { %v1379_v55 = vpop.permute.xlu1 %1378 }
 0x6c5   : > { %v1384_v56 = vsel %vm909_vm2, %v1379_v55, 0 }
 0x6c6   : > { %1393 = vmatpush.bf16.msrb.mxu0 %v1384_v56 }
 0x6c9   : > { %1822 = vmatmul.msk.bf16.vlgmr.msrb.gmra.mxu0 %vm766_vm1, %v1348_v57 }
 0x6ca   : > { %1491 = vmatpush.bf16.msra.mxu0 %v1482_v7  ;;  %v1865_v7 = vld [vmem:[%s2333_s18] sm:$0xff] }
 0x6ce   : > { %1662 = vmatpush.bf16.msrb.mxu0 %v1868_v51 }
 0x6d0   : > { %v1371_v58 = vpop.f32.mrf.mxu3 }
 0x6d2   : > { %1663 = vmatpush.bf16.msrb.mxu0 %v1867_v54 }
 0x6d6   : > { %1664 = vmatpush.bf16.msrb.mxu0 %v1866_v6 }
 0x6d8   : > { %v1373_v59 = vpop.f32.mrf.mxu3 }
 0x6da   : > { %1665 = vmatpush.bf16.msrb.mxu0 %v1865_v7 }
 0x6db   : > { %v1337_v60 = vpop.xlane.xlu2 %1336 }
 0x6dc   : > { %1924 = vrcp.f32 %v1337_v60 }
 0x6e2   : > { %v1925_v61 = vpop.eup %1924 }
 0x6e3   : > { %v1451_v62 = vmul.f32 %v1925_v61, %v1371_v58 }
 0x6e5   : > { %v1455_v63 = vpack.c.bf16 %v1451_v62, %v1451_v62  ;;  %v1890_v62 = vld [vmem:[%s2329_s14] ss:$0 sm:$0xff] }
 0x6e7   : > { %1825 = vmatmul.msk.bf16.vlgmr.msrb.gmra.mxu3 %vm766_vm1, %v1455_v63 }
 0x71a   : > { %v1346_v5 = vpop.xlane.xlu1 %1345 }
 0x71b   : > { %1926 = vrcp.f32 %v1346_v5 }
 0x71c   : > { %v1340_v18 = vpop.xlane.xlu0 %1339 }
 0x721   : > { %v1927_v8 = vpop.eup %1926 }
 0x72b   : > { %v1443_v9 = vpop.f32.mrf.mxu2 }
 0x72c   : > { %v1454_v10 = vmul.f32 %v1927_v8, %v1443_v9  ;;  %v1343_v11 = vpop.xlane.xlu2 %1342  ;;  %v1892_v8 = vld [vmem:[%s2332_s17] ss:$0 sm:$0xff] }
 0x72d   : > { %1928 = vrcp.f32 %v1343_v11 }
 0x72e   : > { %v1458_v2 = vpack.c.bf16 %v1454_v10, %v1454_v10  ;;  %1930 = vrcp.f32 %v1340_v18 }
 0x730   : > { %1828 = vmatmul.msk.bf16.vlgmr.msra.gmra.mxu2 %vm766_vm1, %v1458_v2 }
 0x733   : > { %v1445_v12 = vpop.f32.mrf.mxu2  ;;  %v1929_v13 = vpop.eup %1928 }
 0x734   : > { %v1931_v20 = vpop.eup %1930 }
 0x737   : > { %v1419_v14 = vpop.f32.mrf.mxu1 }
 0x738   : > { %v1453_v15 = vmul.f32 %v1929_v13, %v1419_v14  ;;  %v1893_v13 = vld [vmem:[%s2334_s19] ss:$0 sm:$0xff] }
 0x73a   : > { %v1457_v17 = vpack.c.bf16 %v1453_v15, %v1453_v15 }
 0x73c   : > { %1827 = vmatmul.msk.bf16.vlgmr.msra.gmra.mxu1 %vm766_vm1, %v1457_v17 }
 0x73f   : > { %v1421_v19 = vpop.f32.mrf.mxu1 }
 0x746   : > { %v1395_v21 = vpop.f32.mrf.mxu0 }
 0x747   : > { %v1452_v22 = vmul.f32 %v1931_v20, %v1395_v21 }
 0x749   : > { %v1456_v23 = vpack.c.bf16 %v1452_v22, %v1452_v22 }
 0x74b   : > { %1826 = vmatmul.msk.bf16.vlgmr.msra.gmra.mxu0 %vm766_vm1, %v1456_v23 }
 0x74e   : > { %v1397_v24 = vpop.f32.mrf.mxu0 }
 0x76a   : > { %v1474_v25 = vpop.f32.mrf.mxu3 }
 0x76b   : > { %v1535_v32 = vsel %vm725_vm0, %v1474_v25, 0.0 }
 0x772   : > { %v1476_v26 = vpop.f32.mrf.mxu3 }
 0x7b3   : > { %v1531_v27 = vpop.f32.mrf.mxu2 }
 0x7b4   : > { %v1540_v38 = vsel %vm725_vm0, %v1531_v27, 0.0 }
 0x7b9   : > { %v1512_v28 = vpop.f32.mrf.mxu1 }
 0x7ba   : > { %v1538_v35 = vsel %vm725_vm0, %v1512_v28, 0.0 }
 0x7bb   : > { %v1533_v29 = vpop.f32.mrf.mxu2 }
 0x7c1   : > { %v1514_v30 = vpop.f32.mrf.mxu1 }
 0x7c8   : > { %v1493_v31 = vpop.f32.mrf.mxu0 }
 0x7c9   : > { %v1536_v33 = vsel %vm725_vm0, %v1493_v31, 0.0 }
 0x7ca   : > { %v1537_v34 = vadd.f32 %v1536_v33, %v1535_v32 }
 0x7cc   : > { %v1539_v36 = vadd.f32 %v1538_v35, %v1537_v34  ;;  %v1894_v34 = vld [vmem:[%s2335_s20] ss:$0 sm:$0xff] }
 0x7ce   : > { %v1541_v39 = vadd.f32 %v1540_v38, %v1539_v36 }
 0x7d0   : > { %v1495_v40 = vpop.f32.mrf.mxu0  ;;  %v1545_v41 = vadd.f32 %v1889_v37, %v1541_v39 }
 0x7d2   : > { %v1546_v42 = vadd.f32 %v1545_v41, %v2196_v44  ;;  %v1863_v44 = vld [vmem:[%s2331_s16] sm:$0xff] }
 0x7d3   : > { %1610 = vmatpush.bf16.msra.mxu3 %v1863_v44 }
 0x7d4   : > { %v1549_v43 = vsel %vm725_vm0, %v1546_v42, 0.0 }
 0x7d5   : > { %1550 = vadd.xlane.f32.xlu1 %v1549_v43 }
 0x848   : > { %v1551_v45 = vpop.xlane.xlu1 %1550 }
 0x849   : > { %v1552_v46 = vmul.f32 %v1551_v45, %v2172_v16 }
 0x84b   : > { %v1553_v47 = vsub.f32 %v1546_v42, %v1552_v46 }
 0x84d   : > { %v1554_v48 = vmul.f32 %v1553_v47, %v1553_v47 }
 0x84f   : > { %v1555_v49 = vsel %vm725_vm0, %v1554_v48, 0.0 }
 0x850   : > { %1556 = vadd.xlane.f32.xlu0 %v1555_v49 }
 0x8c3   : > { %v1557_v52 = vpop.xlane.xlu0 %1556 }
 0x8c4   : > { %v1558_v53 = vmul.f32 %v1557_v52, %v2172_v16 }
 0x8c6   : > { %v1559_v55 = vadd.f32 1e-05, %v1558_v53 }
 0x8c8   : > { %1932 = vrsqrt.f32 %v1559_v55  ;;  %vm1566_vm9 = vweird.f32 %v1559_v55 }
 0x8ce   : > { %v1933_v56 = vpop.eup %1932 }
 0x8cf   : > { %v1561_v57 = vmul.f32 %v1933_v56, %v1559_v55  ;;  %vm1567_vm8 = vweird.f32 %v1933_v56 }
 0x8d0   : > { %vm1568_vm10 = vmor %vm1566_vm9, %vm1567_vm8 }
 0x8d1   : > { %v1562_v58 = vmul.f32 %v1933_v56, %v1561_v57 }
 0x8d3   : > { %v1563_v59 = vmul.f32 0.5, %v1562_v58 }
 0x8d5   : > { %v1564_v60 = vsub.f32 1.5, %v1563_v59 }
 0x8d7   : > { %v1565_v61 = vmul.f32 %v1933_v56, %v1564_v60 }
 0x8d9   : > { %v1569_v63 = vsel %vm1568_vm10, %v1933_v56, %v1565_v61 }
 0x8da   : > { %v1570_v1 = vmul.f32 %v1569_v63, %v1553_v47 }
 0x8dc   : > { %v1574_v3 = vmul.f32 %v1890_v62, %v1570_v1 }
 0x8de   : > { %v1578_v4 = vadd.f32 %v1891_v0, %v1574_v3 }
 0x8e0   : > { %v1579_v5 = vpack.c.bf16 %v1578_v4, %v1578_v4 }
 0x8e2   : > { %1837 = vmatmul.msk.bf16.vlgmr.msra.gmra.mxu3 %vm725_vm0, %v1579_v5 }
 0x965   : > { %v1612_v9 = vpop.f32.mrf.mxu3 }
 0x966   : > { %v1613_v10 = vadd.f32 %v1892_v8, %v1612_v9 }
 0x968   : > { %v1616_v2 = vmax.f32 %v1613_v10, 0.0 }
 0x96a   : > { %v1617_v11 = vpack.c.bf16 %v1616_v2, %v1616_v2 }
 0x96c   : > { %1854 = vmatmul.msk.bf16.vlgmr.msrb.gmra.mxu0 %vm1654_vm11, %v1617_v11 }
 0x96d   : > { %v1614_v12 = vpop.f32.mrf.mxu3 }
 0x9e9   : > { %v1667_v14 = vpop.f32.mrf.mxu0 }
 0x9ea   : > { %v1668_v15 = vadd.f32 %v1893_v13, %v1667_v14 }
 0x9ec   : > { %v1671_v17 = vadd.f32 %v1668_v15, %v1578_v4 }
 0x9ee   : > { %v1674_v18 = vsel %vm725_vm0, %v1671_v17, 0.0 }
 0x9ef   : > { %1675 = vadd.xlane.f32.xlu2 %v1674_v18 }
 0x9f1   : > { %v1669_v19 = vpop.f32.mrf.mxu0 }
 0xa62   : > { %v1676_v20 = vpop.xlane.xlu2 %1675 }
 0xa63   : > { %v1677_v21 = vmul.f32 %v1676_v20, %v2172_v16 }
 0xa65   : > { %v1678_v22 = vsub.f32 %v1671_v17, %v1677_v21 }
 0xa67   : > { %v1679_v23 = vmul.f32 %v1678_v22, %v1678_v22 }
 0xa69   : > { %v1680_v24 = vsel %vm725_vm0, %v1679_v23, 0.0 }
 0xa6a   : > { %1681 = vadd.xlane.f32.xlu1 %v1680_v24 }
 0xadd   : > { %v1682_v25 = vpop.xlane.xlu1 %1681 }
 0xade   : > { %v1683_v26 = vmul.f32 %v1682_v25, %v2172_v16  ;;  %v1895_v16 = vld [vmem:[%s2336_s21] ss:$0 sm:$0xff] }
 0xae0   : > { %v1684_v27 = vadd.f32 1e-05, %v1683_v26 }
 0xae2   : > { %1934 = vrsqrt.f32 %v1684_v27  ;;  %vm1691_vm13 = vweird.f32 %v1684_v27 }
 0xae8   : > { %v1935_v28 = vpop.eup %1934 }
 0xae9   : > { %v1686_v29 = vmul.f32 %v1935_v28, %v1684_v27  ;;  %vm1692_vm12 = vweird.f32 %v1935_v28 }
 0xaea   : > { %vm1693_vm14 = vmor %vm1691_vm13, %vm1692_vm12 }
 0xaeb   : > { %v1687_v30 = vmul.f32 %v1935_v28, %v1686_v29 }
 0xaed   : > { %v1688_v31 = vmul.f32 0.5, %v1687_v30 }
 0xaef   : > { %v1689_v32 = vsub.f32 1.5, %v1688_v31 }
 0xaf1   : > { %v1690_v33 = vmul.f32 %v1935_v28, %v1689_v32 }
 0xaf3   : > { %v1694_v35 = vsel %vm1693_vm14, %v1935_v28, %v1690_v33 }
 0xaf4   : > { %v1695_v36 = vmul.f32 %v1694_v35, %v1678_v22 }
 0xaf6   : > { %v1699_v37 = vmul.f32 %v1894_v34, %v1695_v36 }
 0xaf8   : > { %v1703_v38 = vadd.f32 %v1895_v16, %v1699_v37 }
 0xafa   : > { %1704 = vst.msk [vmem:[%s695_s24] sm:$0xff] %vm725_vm0, %v1703_v38 }
 0xafb PF: > { %s32_s3 = sadd.s32 1, %s1942_s3  }
 0xafc   : > { %p29_p4 = scmp.ge.s32.totalorder %s32_s3, 4  }
 0xafe   :  { %31 = sbr.rel (!%p29_p4) target bundleno = 8 (0x8), region = 141 }

</bundles_post_ra>
